<compile_context>
chip_gen: v6e
topology: v6e:2x2x1
jax: 0.10.0
libtpu: 0.0.40
codegen_flags: <defaults>
</compile_context>

<pallas_src>
import jax
import jax.numpy as jnp
from jax.experimental import pallas as pl
from jax.experimental.pallas import tpu as pltpu


# Model dims (what the torch module's `opt` would carry), kept small for the demo.
BATCH = 2          # batch
FRAME = 8          # sequence length (z1.shape[1])
NZ = 32            # opt.nz
THETA_DIM = 32     # opt.theta_dim
N_PARTICLE = 4     # opt.n_particle


def _prior_sampler_kernel(
    # --- inputs (all whole-array VMEM residents) -------------------------
    z1_ref,        # (T*B, nz)    time-major flattened frames
    im_ref,        # (B, D)       initial_mean
    iv_ref,        # (B, D)       initial_variance
    h0_ref,        # (2, B, D)    initial GRU hidden state
    noise_ref,     # (T*B, P*D)   gaussian noise, lane-dense particle packing
    rep_ref,       # (D, P*D)     constant 0/1 replication matrix (P copies of I_D)
    wz_ref, wm_ref, wv_ref, bb_ref,            # bottom linear (split over the concat)
    wih0_ref, whh0_ref, bih0_ref, bhh0_ref,    # GRU layer 0 (gates fused → (D,3D))
    wih1_ref, whh1_ref, bih1_ref, bhh1_ref,    # GRU layer 1
    wheads_ref, bheads_ref,                    # fused heads: [mean | var_pre] (D,2D)
    # --- outputs ----------------------------------------------------------
    particles_ref,  # (T*B, P*D)
    mean_ref,       # (T*B, D)
    var_ref,        # (T*B, D)
    hid_ref,        # (2, B, D)
    # --- scratch ------------------------------------------------------------
    y_scratch,      # VMEM (T*B, D) f32 — GRU layer-2 outputs for all frames
):
    f32 = jnp.float32
    B, D = im_ref.shape
    TB = z1_ref.shape[0]
    T = TB // B

    # ---- time-invariant bottom term: im@Wm + iv@Wv + b (computed once) ----
    base = (jnp.dot(im_ref[...], wm_ref[...], preferred_element_type=f32)
            + jnp.dot(iv_ref[...], wv_ref[...], preferred_element_type=f32)
            + bb_ref[...])                                            # (B, D)

    # ---- batched bottom projection for all T frames (one MXU pass) --------
    zproj = jnp.dot(z1_ref[...], wz_ref[...], preferred_element_type=f32)   # (T*B, D)

    # ---- fused-gate GRU weights, loaded once -------------------------------
    wih0 = wih0_ref[...]; whh0 = whh0_ref[...]
    bih0 = bih0_ref[...]; bhh0 = bhh0_ref[...]
    wih1 = wih1_ref[...]; whh1 = whh1_ref[...]
    bih1 = bih1_ref[...]; bhh1 = bhh1_ref[...]

    def sigmoid(x):
        # identical to 1/(1+exp(-x)) but uses the EUP tanh slot (no VALU divide)
        return 0.5 * (jnp.tanh(0.5 * x) + 1.0)

    def gru_cell(x_t, h_prev, wih, whh, bih, bhh):
        # PyTorch gate order [r, z, n], fused into single (B,3D) matmuls.
        gi = jnp.dot(x_t, wih, preferred_element_type=f32) + bih      # (B, 3D)
        gh = jnp.dot(h_prev, whh, preferred_element_type=f32) + bhh   # (B, 3D)
        r = sigmoid(gi[:, :D] + gh[:, :D])
        zg = sigmoid(gi[:, D:2 * D] + gh[:, D:2 * D])
        n = jnp.tanh(gi[:, 2 * D:] + r * gh[:, 2 * D:])
        return (1.0 - zg) * n + zg * h_prev

    # ---- serial GRU recurrence (T small & static → fully unrolled) ---------
    h0 = h0_ref[0]
    h1 = h0_ref[1]
    for t in range(T):
        x_t = jnp.maximum(zproj[t * B:(t + 1) * B, :] + base, 0.0)    # bottom ReLU
        h0 = gru_cell(x_t, h0, wih0, whh0, bih0, bhh0)
        h1 = gru_cell(h0, h1, wih1, whh1, bih1, bhh1)
        y_scratch[t * B:(t + 1) * B, :] = h1
    hid_ref[0] = h0.astype(hid_ref.dtype)
    hid_ref[1] = h1.astype(hid_ref.dtype)

    # ---- heads: one fused (T*B, D) @ (D, 2D) matmul -------------------------
    y_all = y_scratch[...]
    heads = jnp.dot(y_all, wheads_ref[...], preferred_element_type=f32) + bheads_ref[...]
    mean = heads[:, :D]
    var_pre = heads[:, D:]
    # numerically stable softplus
    var = jnp.maximum(var_pre, 0.0) + jnp.log(1.0 + jnp.exp(-jnp.abs(var_pre)))

    mean_ref[...] = mean.astype(mean_ref.dtype)
    var_ref[...] = var.astype(var_ref.dtype)

    # ---- particles: one lane-dense (T*B, P*D) fused multiply-add ------------
    # Replicate mean/std into the P lane-blocks via a constant 0/1 matmul
    # (exact in f32, layout-safe, MXU is otherwise idle here).
    std = jnp.sqrt(var)
    std_rep = jnp.dot(std, rep_ref[...], preferred_element_type=f32)     # (T*B, P*D)
    mean_rep = jnp.dot(mean, rep_ref[...], preferred_element_type=f32)   # (T*B, P*D)
    particles_ref[...] = (noise_ref[...] * std_rep + mean_rep).astype(particles_ref.dtype)


def prior_sampler_forward(params, initial_value, z1, noise, hidden=None):
    """JAX/Pallas equivalent of PriorSampler.forward.

    z1            : (B, T, nz)                     (batch-first, like torch)
    initial_value : (initial_mean, initial_variance), each (B, theta_dim)
    noise         : (B, T, n_particle, theta_dim)  standard-normal draws
    hidden        : optional (2, B, theta_dim) initial GRU state (zeros if None)

    Returns (particles, proposal_mean, proposal_variance, hidden_state) with
    shapes (B,T,P,D), (B,T,D), (B,T,D), (2,B,D).
    """
    f32 = jnp.float32
    initial_mean, initial_variance = initial_value
    B, T, nz = z1.shape
    D = params["w_head1"].shape[0]
    P = noise.shape[2]
    if hidden is None:
        hidden = jnp.zeros((2, B, D), dtype=f32)

    # time-major, row-flattened layouts; particles packed lane-dense (row=(t,b), lane=(p,d))
    z1_tm = jnp.transpose(z1, (1, 0, 2)).reshape(T * B, nz).astype(f32)                # (T*B, nz)
    noise_tm = jnp.transpose(noise, (1, 0, 2, 3)).reshape(T * B, P * D).astype(f32)    # (T*B, P*D)

    # bottom Linear split over the concat axis [z | mean | var]
    w_bottom = params["w_bottom"].astype(f32)                 # (nz + 2D, D)
    wz = w_bottom[:nz]
    wm = w_bottom[nz:nz + D]
    wv = w_bottom[nz + D:]
    bb = params["b_bottom"].reshape(1, D).astype(f32)

    def fuse_gru(layer):
        wih = params[f"w_ih{layer}"].astype(f32)              # (3, D, D) gate order [r,z,n]
        whh = params[f"w_hh{layer}"].astype(f32)
        bih = params[f"b_ih{layer}"].astype(f32)              # (3, D)
        bhh = params[f"b_hh{layer}"].astype(f32)
        wih_f = jnp.concatenate([wih[0], wih[1], wih[2]], axis=1)   # (D, 3D)
        whh_f = jnp.concatenate([whh[0], whh[1], whh[2]], axis=1)   # (D, 3D)
        return wih_f, whh_f, bih.reshape(1, 3 * D), bhh.reshape(1, 3 * D)

    wih0, whh0, bih0, bhh0 = fuse_gru(0)
    wih1, whh1, bih1, bhh1 = fuse_gru(1)

    # fused heads: columns [0:D]=mean head, [D:2D]=variance head (pre-softplus)
    w_heads = jnp.concatenate([params["w_head1"], params["w_head2"]], axis=1).astype(f32)  # (D, 2D)
    b_heads = jnp.concatenate([params["b_head1"], params["b_head2"]]).reshape(1, 2 * D).astype(f32)

    # constant replication matrix: P side-by-side copies of I_D
    rep = jnp.concatenate([jnp.eye(D, dtype=f32)] * P, axis=1)                          # (D, P*D)

    out_shape = (
        jax.ShapeDtypeStruct((T * B, P * D), f32),   # particles (lane-dense packed)
        jax.ShapeDtypeStruct((T * B, D), f32),       # proposal_mean
        jax.ShapeDtypeStruct((T * B, D), f32),       # proposal_variance
        jax.ShapeDtypeStruct((2, B, D), f32),        # hidden_state
    )

    particles_p, mean_p, var_p, hid = pl.pallas_call(
        _prior_sampler_kernel,
        out_shape=out_shape,
        # single invocation, whole arrays resident in VMEM (no grid, no tiling needed)
        scratch_shapes=[pltpu.VMEM((T * B, D), f32)],
    )(z1_tm, initial_mean.astype(f32), initial_variance.astype(f32), hidden.astype(f32),
      noise_tm, rep,
      wz, wm, wv, bb,
      wih0, whh0, bih0, bhh0,
      wih1, whh1, bih1, bhh1,
      w_heads, b_heads)

    particles = particles_p.reshape(T, B, P, D).transpose(1, 0, 2, 3)   # (B, T, P, D)
    mean = mean_p.reshape(T, B, D).transpose(1, 0, 2)                   # (B, T, D)
    var = var_p.reshape(T, B, D).transpose(1, 0, 2)                     # (B, T, D)
    return particles, mean, var, hid


def init_params(key, nz=NZ, d=THETA_DIM):
    ks = jax.random.split(key, 14)

    def u(k, shape, fan_in):
        bound = 1.0 / (float(fan_in) ** 0.5)
        return jax.random.uniform(k, shape, jnp.float32, -bound, bound)

    return {
        # bottom Linear(nz + 2*theta_dim -> theta_dim), stored as (in, out)
        "w_bottom": u(ks[0], (nz + 2 * d, d), nz + 2 * d),
        "b_bottom": u(ks[1], (d,), nz + 2 * d),
        # GRU layer 0 (input = theta_dim), gates stacked on axis 0 in order [r, z, n]
        "w_ih0": u(ks[2], (3, d, d), d),
        "w_hh0": u(ks[3], (3, d, d), d),
        "b_ih0": u(ks[4], (3, d), d),
        "b_hh0": u(ks[5], (3, d), d),
        # GRU layer 1
        "w_ih1": u(ks[6], (3, d, d), d),
        "w_hh1": u(ks[7], (3, d, d), d),
        "b_ih1": u(ks[8], (3, d), d),
        "b_hh1": u(ks[9], (3, d), d),
        # heads
        "w_head1": u(ks[10], (d, d), d),
        "b_head1": u(ks[11], (d,), d),
        "w_head2": u(ks[12], (d, d), d),
        "b_head2": u(ks[13], (d,), d),
    }


def prior_sampler_reference(params, initial_value, z1, noise, hidden=None):
    """Pure-JAX (non-Pallas) reference with the torch module's math."""
    initial_mean, initial_variance = initial_value
    B, T, _ = z1.shape
    D = params["w_head1"].shape[0]
    if hidden is None:
        hidden = jnp.zeros((2, B, D), jnp.float32)

    im = jnp.broadcast_to(initial_mean[:, None, :], (B, T, D))
    iv = jnp.broadcast_to(initial_variance[:, None, :], (B, T, D))
    x = jnp.concatenate([z1, im, iv], axis=-1) @ params["w_bottom"] + params["b_bottom"]
    x = jnp.maximum(x, 0.0)                                   # (B, T, D)

    def cell(x_t, h_prev, wih, whh, bih, bhh):
        i_r = x_t @ wih[0] + bih[0]
        i_z = x_t @ wih[1] + bih[1]
        i_n = x_t @ wih[2] + bih[2]
        h_r = h_prev @ whh[0] + bhh[0]
        h_z = h_prev @ whh[1] + bhh[1]
        h_n = h_prev @ whh[2] + bhh[2]
        r = jax.nn.sigmoid(i_r + h_r)
        z = jax.nn.sigmoid(i_z + h_z)
        n = jnp.tanh(i_n + r * h_n)
        return (1.0 - z) * n + z * h_prev

    h0, h1 = hidden[0], hidden[1]
    ys = []
    for t in range(T):
        h0 = cell(x[:, t], h0, params["w_ih0"], params["w_hh0"],
                  params["b_ih0"], params["b_hh0"])
        h1 = cell(h0, h1, params["w_ih1"], params["w_hh1"],
                  params["b_ih1"], params["b_hh1"])
        ys.append(h1)
    y = jnp.stack(ys, axis=1)                                 # (B, T, D)

    mean = y @ params["w_head1"] + params["b_head1"]
    pre = y @ params["w_head2"] + params["b_head2"]
    var = jnp.maximum(pre, 0.0) + jnp.log(1.0 + jnp.exp(-jnp.abs(pre)))
    particles = noise * jnp.sqrt(var)[:, :, None, :] + mean[:, :, None, :]
    hid = jnp.stack([h0, h1], axis=0)
    return particles, mean, var, hid


if __name__ == "__main__":
    key = jax.random.PRNGKey(0)
    kp, kz, km, kv, kn = jax.random.split(key, 5)

    params = init_params(kp)
    z1 = jax.random.normal(kz, (BATCH, FRAME, NZ), jnp.float32)
    init_mean = jax.random.normal(km, (BATCH, THETA_DIM), jnp.float32)
    init_var = jax.nn.softplus(jax.random.normal(kv, (BATCH, THETA_DIM), jnp.float32))
    noise = jax.random.normal(kn, (BATCH, FRAME, N_PARTICLE, THETA_DIM), jnp.float32)

    fwd = jax.jit(prior_sampler_forward)
    out = fwd(params, (init_mean, init_var), z1, noise)
    out = jax.block_until_ready(out)
    particles, mean, var, hid = out

    ref_particles, ref_mean, ref_var, ref_hid = prior_sampler_reference(
        params, (init_mean, init_var), z1, noise)

    assert particles.shape == (BATCH, FRAME, N_PARTICLE, THETA_DIM), particles.shape
    assert mean.shape == (BATCH, FRAME, THETA_DIM), mean.shape
    assert var.shape == (BATCH, FRAME, THETA_DIM), var.shape
    assert hid.shape == (2, BATCH, THETA_DIM), hid.shape

    assert bool(jnp.allclose(mean, ref_mean, atol=1e-4, rtol=1e-4))
    assert bool(jnp.allclose(var, ref_var, atol=1e-4, rtol=1e-4))
    assert bool(jnp.allclose(particles, ref_particles, atol=1e-4, rtol=1e-4))
    assert bool(jnp.allclose(hid, ref_hid, atol=1e-4, rtol=1e-4))
    assert bool(jnp.all(var > 0.0))   # softplus output must be positive

    print("KERNEL_OK")
</pallas_src>

<mosaic_0001>
module attributes {stable_mosaic.version = 11 : i64} {
  func.func @_prior_sampler_kernel(%arg0: memref<16x32xf32, #tpu.memory_space<vmem>>, %arg1: memref<2x32xf32, #tpu.memory_space<vmem>>, %arg2: memref<2x32xf32, #tpu.memory_space<vmem>>, %arg3: memref<2x2x32xf32, #tpu.memory_space<vmem>>, %arg4: memref<16x128xf32, #tpu.memory_space<vmem>>, %arg5: memref<32x128xf32, #tpu.memory_space<vmem>>, %arg6: memref<32x32xf32, #tpu.memory_space<vmem>>, %arg7: memref<32x32xf32, #tpu.memory_space<vmem>>, %arg8: memref<32x32xf32, #tpu.memory_space<vmem>>, %arg9: memref<1x32xf32, #tpu.memory_space<vmem>>, %arg10: memref<32x96xf32, #tpu.memory_space<vmem>>, %arg11: memref<32x96xf32, #tpu.memory_space<vmem>>, %arg12: memref<1x96xf32, #tpu.memory_space<vmem>>, %arg13: memref<1x96xf32, #tpu.memory_space<vmem>>, %arg14: memref<32x96xf32, #tpu.memory_space<vmem>>, %arg15: memref<32x96xf32, #tpu.memory_space<vmem>>, %arg16: memref<1x96xf32, #tpu.memory_space<vmem>>, %arg17: memref<1x96xf32, #tpu.memory_space<vmem>>, %arg18: memref<32x64xf32, #tpu.memory_space<vmem>>, %arg19: memref<1x64xf32, #tpu.memory_space<vmem>>, %arg20: memref<16x128xf32, #tpu.memory_space<vmem>>, %arg21: memref<16x32xf32, #tpu.memory_space<vmem>>, %arg22: memref<16x32xf32, #tpu.memory_space<vmem>>, %arg23: memref<2x2x32xf32, #tpu.memory_space<vmem>>, %arg24: memref<16x32xf32, #tpu.memory_space<vmem>>) attributes {dimension_semantics = [], scalar_prefetch = 0 : i64, scratch_operands = 1 : i64, tpu.core_type = #tpu.core_type<tc>} {
    %c0 = arith.constant 0 : index
    %c0_0 = arith.constant 0 : index
    %0 = vector.load %arg1[%c0, %c0_0] : memref<2x32xf32, #tpu.memory_space<vmem>>, vector<2x32xf32>
    %c0_1 = arith.constant 0 : index
    %c0_2 = arith.constant 0 : index
    %1 = vector.load %arg7[%c0_1, %c0_2] : memref<32x32xf32, #tpu.memory_space<vmem>>, vector<32x32xf32>
    %cst = arith.constant dense<0.000000e+00> : vector<2x32xf32>
    %2 = tpu.matmul %0, %1, %cst {dimension_numbers = #tpu.dot_dimension_numbers<[1], [0], [0], [1], [0, 0, 1, 1], [], []>} : vector<2x32xf32>, vector<32x32xf32>, vector<2x32xf32> -> vector<2x32xf32>
    %c0_3 = arith.constant 0 : index
    %c0_4 = arith.constant 0 : index
    %3 = vector.load %arg2[%c0_3, %c0_4] : memref<2x32xf32, #tpu.memory_space<vmem>>, vector<2x32xf32>
    %c0_5 = arith.constant 0 : index
    %c0_6 = arith.constant 0 : index
    %4 = vector.load %arg8[%c0_5, %c0_6] : memref<32x32xf32, #tpu.memory_space<vmem>>, vector<32x32xf32>
    %cst_7 = arith.constant dense<0.000000e+00> : vector<2x32xf32>
    %5 = tpu.matmul %3, %4, %cst_7 {dimension_numbers = #tpu.dot_dimension_numbers<[1], [0], [0], [1], [0, 0, 1, 1], [], []>} : vector<2x32xf32>, vector<32x32xf32>, vector<2x32xf32> -> vector<2x32xf32>
    %6 = arith.addf %2, %5 : vector<2x32xf32>
    %c0_8 = arith.constant 0 : index
    %c0_9 = arith.constant 0 : index
    %7 = vector.load %arg9[%c0_8, %c0_9] : memref<1x32xf32, #tpu.memory_space<vmem>>, vector<1x32xf32>
    %8 = vector.broadcast %7 : vector<1x32xf32> to vector<2x32xf32>
    %9 = arith.addf %6, %8 : vector<2x32xf32>
    %c0_10 = arith.constant 0 : index
    %c0_11 = arith.constant 0 : index
    %10 = vector.load %arg0[%c0_10, %c0_11] : memref<16x32xf32, #tpu.memory_space<vmem>>, vector<16x32xf32>
    %c0_12 = arith.constant 0 : index
    %c0_13 = arith.constant 0 : index
    %11 = vector.load %arg6[%c0_12, %c0_13] : memref<32x32xf32, #tpu.memory_space<vmem>>, vector<32x32xf32>
    %cst_14 = arith.constant dense<0.000000e+00> : vector<16x32xf32>
    %12 = tpu.matmul %10, %11, %cst_14 {dimension_numbers = #tpu.dot_dimension_numbers<[1], [0], [0], [1], [0, 0, 1, 1], [], []>} : vector<16x32xf32>, vector<32x32xf32>, vector<16x32xf32> -> vector<16x32xf32>
    %c0_15 = arith.constant 0 : index
    %c0_16 = arith.constant 0 : index
    %13 = vector.load %arg10[%c0_15, %c0_16] : memref<32x96xf32, #tpu.memory_space<vmem>>, vector<32x96xf32>
    %c0_17 = arith.constant 0 : index
    %c0_18 = arith.constant 0 : index
    %14 = vector.load %arg11[%c0_17, %c0_18] : memref<32x96xf32, #tpu.memory_space<vmem>>, vector<32x96xf32>
    %c0_19 = arith.constant 0 : index
    %c0_20 = arith.constant 0 : index
    %15 = vector.load %arg12[%c0_19, %c0_20] : memref<1x96xf32, #tpu.memory_space<vmem>>, vector<1x96xf32>
    %c0_21 = arith.constant 0 : index
    %c0_22 = arith.constant 0 : index
    %16 = vector.load %arg13[%c0_21, %c0_22] : memref<1x96xf32, #tpu.memory_space<vmem>>, vector<1x96xf32>
    %c0_23 = arith.constant 0 : index
    %c0_24 = arith.constant 0 : index
    %17 = vector.load %arg14[%c0_23, %c0_24] : memref<32x96xf32, #tpu.memory_space<vmem>>, vector<32x96xf32>
    %c0_25 = arith.constant 0 : index
    %c0_26 = arith.constant 0 : index
    %18 = vector.load %arg15[%c0_25, %c0_26] : memref<32x96xf32, #tpu.memory_space<vmem>>, vector<32x96xf32>
    %c0_27 = arith.constant 0 : index
    %c0_28 = arith.constant 0 : index
    %19 = vector.load %arg16[%c0_27, %c0_28] : memref<1x96xf32, #tpu.memory_space<vmem>>, vector<1x96xf32>
    %c0_29 = arith.constant 0 : index
    %c0_30 = arith.constant 0 : index
    %20 = vector.load %arg17[%c0_29, %c0_30] : memref<1x96xf32, #tpu.memory_space<vmem>>, vector<1x96xf32>
    %c0_31 = arith.constant 0 : index
    %c0_32 = arith.constant 0 : index
    %c0_33 = arith.constant 0 : index
    %21 = vector.load %arg3[%c0_31, %c0_32, %c0_33] : memref<2x2x32xf32, #tpu.memory_space<vmem>>, vector<1x2x32xf32>
    %22 = vector.shape_cast %21 : vector<1x2x32xf32> to vector<2x32xf32>
    %c1 = arith.constant 1 : index
    %c0_34 = arith.constant 0 : index
    %c0_35 = arith.constant 0 : index
    %23 = vector.load %arg3[%c1, %c0_34, %c0_35] : memref<2x2x32xf32, #tpu.memory_space<vmem>>, vector<1x2x32xf32>
    %24 = vector.shape_cast %23 : vector<1x2x32xf32> to vector<2x32xf32>
    %25 = vector.extract_strided_slice %12 {offsets = [0, 0], sizes = [2, 32], strides = [1, 1]} : vector<16x32xf32> to vector<2x32xf32>
    %26 = arith.addf %25, %9 : vector<2x32xf32>
    %cst_36 = arith.constant 0.000000e+00 : f32
    %27 = vector.broadcast %cst_36 : f32 to vector<2x32xf32>
    %28 = arith.maximumf %26, %27 : vector<2x32xf32>
    %cst_37 = arith.constant dense<0.000000e+00> : vector<2x96xf32>
    %29 = tpu.matmul %28, %13, %cst_37 {dimension_numbers = #tpu.dot_dimension_numbers<[1], [0], [0], [1], [0, 0, 1, 1], [], []>} : vector<2x32xf32>, vector<32x96xf32>, vector<2x96xf32> -> vector<2x96xf32>
    %30 = vector.broadcast %15 : vector<1x96xf32> to vector<2x96xf32>
    %31 = arith.addf %29, %30 : vector<2x96xf32>
    %cst_38 = arith.constant dense<0.000000e+00> : vector<2x96xf32>
    %32 = tpu.matmul %22, %14, %cst_38 {dimension_numbers = #tpu.dot_dimension_numbers<[1], [0], [0], [1], [0, 0, 1, 1], [], []>} : vector<2x32xf32>, vector<32x96xf32>, vector<2x96xf32> -> vector<2x96xf32>
    %33 = vector.broadcast %16 : vector<1x96xf32> to vector<2x96xf32>
    %34 = arith.addf %32, %33 : vector<2x96xf32>
    %35 = vector.extract_strided_slice %31 {offsets = [0, 0], sizes = [2, 32], strides = [1, 1]} : vector<2x96xf32> to vector<2x32xf32>
    %36 = vector.extract_strided_slice %34 {offsets = [0, 0], sizes = [2, 32], strides = [1, 1]} : vector<2x96xf32> to vector<2x32xf32>
    %37 = arith.addf %35, %36 : vector<2x32xf32>
    %cst_39 = arith.constant 5.000000e-01 : f32
    %38 = vector.broadcast %cst_39 : f32 to vector<2x32xf32>
    %39 = arith.mulf %38, %37 : vector<2x32xf32>
    %40 = math.tanh %39 : vector<2x32xf32>
    %cst_40 = arith.constant 1.000000e+00 : f32
    %41 = vector.broadcast %cst_40 : f32 to vector<2x32xf32>
    %42 = arith.addf %40, %41 : vector<2x32xf32>
    %cst_41 = arith.constant 5.000000e-01 : f32
    %43 = vector.broadcast %cst_41 : f32 to vector<2x32xf32>
    %44 = arith.mulf %43, %42 : vector<2x32xf32>
    %45 = vector.extract_strided_slice %31 {offsets = [0, 32], sizes = [2, 32], strides = [1, 1]} : vector<2x96xf32> to vector<2x32xf32>
    %46 = vector.extract_strided_slice %34 {offsets = [0, 32], sizes = [2, 32], strides = [1, 1]} : vector<2x96xf32> to vector<2x32xf32>
    %47 = arith.addf %45, %46 : vector<2x32xf32>
    %cst_42 = arith.constant 5.000000e-01 : f32
    %48 = vector.broadcast %cst_42 : f32 to vector<2x32xf32>
    %49 = arith.mulf %48, %47 : vector<2x32xf32>
    %50 = math.tanh %49 : vector<2x32xf32>
    %cst_43 = arith.constant 1.000000e+00 : f32
    %51 = vector.broadcast %cst_43 : f32 to vector<2x32xf32>
    %52 = arith.addf %50, %51 : vector<2x32xf32>
    %cst_44 = arith.constant 5.000000e-01 : f32
    %53 = vector.broadcast %cst_44 : f32 to vector<2x32xf32>
    %54 = arith.mulf %53, %52 : vector<2x32xf32>
    %55 = vector.extract_strided_slice %31 {offsets = [0, 64], sizes = [2, 32], strides = [1, 1]} : vector<2x96xf32> to vector<2x32xf32>
    %56 = vector.extract_strided_slice %34 {offsets = [0, 64], sizes = [2, 32], strides = [1, 1]} : vector<2x96xf32> to vector<2x32xf32>
    %57 = arith.mulf %44, %56 : vector<2x32xf32>
    %58 = arith.addf %55, %57 : vector<2x32xf32>
    %59 = math.tanh %58 : vector<2x32xf32>
    %cst_45 = arith.constant 1.000000e+00 : f32
    %60 = vector.broadcast %cst_45 : f32 to vector<2x32xf32>
    %61 = arith.subf %60, %54 : vector<2x32xf32>
    %62 = arith.mulf %61, %59 : vector<2x32xf32>
    %63 = arith.mulf %54, %22 : vector<2x32xf32>
    %64 = arith.addf %62, %63 : vector<2x32xf32>
    %cst_46 = arith.constant dense<0.000000e+00> : vector<2x96xf32>
    %65 = tpu.matmul %64, %17, %cst_46 {dimension_numbers = #tpu.dot_dimension_numbers<[1], [0], [0], [1], [0, 0, 1, 1], [], []>} : vector<2x32xf32>, vector<32x96xf32>, vector<2x96xf32> -> vector<2x96xf32>
    %66 = vector.broadcast %19 : vector<1x96xf32> to vector<2x96xf32>
    %67 = arith.addf %65, %66 : vector<2x96xf32>
    %cst_47 = arith.constant dense<0.000000e+00> : vector<2x96xf32>
    %68 = tpu.matmul %24, %18, %cst_47 {dimension_numbers = #tpu.dot_dimension_numbers<[1], [0], [0], [1], [0, 0, 1, 1], [], []>} : vector<2x32xf32>, vector<32x96xf32>, vector<2x96xf32> -> vector<2x96xf32>
    %69 = vector.broadcast %20 : vector<1x96xf32> to vector<2x96xf32>
    %70 = arith.addf %68, %69 : vector<2x96xf32>
    %71 = vector.extract_strided_slice %67 {offsets = [0, 0], sizes = [2, 32], strides = [1, 1]} : vector<2x96xf32> to vector<2x32xf32>
    %72 = vector.extract_strided_slice %70 {offsets = [0, 0], sizes = [2, 32], strides = [1, 1]} : vector<2x96xf32> to vector<2x32xf32>
    %73 = arith.addf %71, %72 : vector<2x32xf32>
    %cst_48 = arith.constant 5.000000e-01 : f32
    %74 = vector.broadcast %cst_48 : f32 to vector<2x32xf32>
    %75 = arith.mulf %74, %73 : vector<2x32xf32>
    %76 = math.tanh %75 : vector<2x32xf32>
    %cst_49 = arith.constant 1.000000e+00 : f32
    %77 = vector.broadcast %cst_49 : f32 to vector<2x32xf32>
    %78 = arith.addf %76, %77 : vector<2x32xf32>
    %cst_50 = arith.constant 5.000000e-01 : f32
    %79 = vector.broadcast %cst_50 : f32 to vector<2x32xf32>
    %80 = arith.mulf %79, %78 : vector<2x32xf32>
    %81 = vector.extract_strided_slice %67 {offsets = [0, 32], sizes = [2, 32], strides = [1, 1]} : vector<2x96xf32> to vector<2x32xf32>
    %82 = vector.extract_strided_slice %70 {offsets = [0, 32], sizes = [2, 32], strides = [1, 1]} : vector<2x96xf32> to vector<2x32xf32>
    %83 = arith.addf %81, %82 : vector<2x32xf32>
    %cst_51 = arith.constant 5.000000e-01 : f32
    %84 = vector.broadcast %cst_51 : f32 to vector<2x32xf32>
    %85 = arith.mulf %84, %83 : vector<2x32xf32>
    %86 = math.tanh %85 : vector<2x32xf32>
    %cst_52 = arith.constant 1.000000e+00 : f32
    %87 = vector.broadcast %cst_52 : f32 to vector<2x32xf32>
    %88 = arith.addf %86, %87 : vector<2x32xf32>
    %cst_53 = arith.constant 5.000000e-01 : f32
    %89 = vector.broadcast %cst_53 : f32 to vector<2x32xf32>
    %90 = arith.mulf %89, %88 : vector<2x32xf32>
    %91 = vector.extract_strided_slice %67 {offsets = [0, 64], sizes = [2, 32], strides = [1, 1]} : vector<2x96xf32> to vector<2x32xf32>
    %92 = vector.extract_strided_slice %70 {offsets = [0, 64], sizes = [2, 32], strides = [1, 1]} : vector<2x96xf32> to vector<2x32xf32>
    %93 = arith.mulf %80, %92 : vector<2x32xf32>
    %94 = arith.addf %91, %93 : vector<2x32xf32>
    %95 = math.tanh %94 : vector<2x32xf32>
    %cst_54 = arith.constant 1.000000e+00 : f32
    %96 = vector.broadcast %cst_54 : f32 to vector<2x32xf32>
    %97 = arith.subf %96, %90 : vector<2x32xf32>
    %98 = arith.mulf %97, %95 : vector<2x32xf32>
    %99 = arith.mulf %90, %24 : vector<2x32xf32>
    %100 = arith.addf %98, %99 : vector<2x32xf32>
    %c0_55 = arith.constant 0 : index
    %c0_56 = arith.constant 0 : index
    %101 = vector.load %arg24[%c0_55, %c0_56] : memref<16x32xf32, #tpu.memory_space<vmem>>, vector<2x32xf32>
    tpu.vector_store %arg24[%c0_55, %c0_56], %100 {strides = array<i32>} : memref<16x32xf32, #tpu.memory_space<vmem>>, vector<2x32xf32>,
    %102 = vector.extract_strided_slice %12 {offsets = [2, 0], sizes = [2, 32], strides = [1, 1]} : vector<16x32xf32> to vector<2x32xf32>
    %103 = arith.addf %102, %9 : vector<2x32xf32>
    %cst_57 = arith.constant 0.000000e+00 : f32
    %104 = vector.broadcast %cst_57 : f32 to vector<2x32xf32>
    %105 = arith.maximumf %103, %104 : vector<2x32xf32>
    %cst_58 = arith.constant dense<0.000000e+00> : vector<2x96xf32>
    %106 = tpu.matmul %105, %13, %cst_58 {dimension_numbers = #tpu.dot_dimension_numbers<[1], [0], [0], [1], [0, 0, 1, 1], [], []>} : vector<2x32xf32>, vector<32x96xf32>, vector<2x96xf32> -> vector<2x96xf32>
    %107 = vector.broadcast %15 : vector<1x96xf32> to vector<2x96xf32>
    %108 = arith.addf %106, %107 : vector<2x96xf32>
    %cst_59 = arith.constant dense<0.000000e+00> : vector<2x96xf32>
    %109 = tpu.matmul %64, %14, %cst_59 {dimension_numbers = #tpu.dot_dimension_numbers<[1], [0], [0], [1], [0, 0, 1, 1], [], []>} : vector<2x32xf32>, vector<32x96xf32>, vector<2x96xf32> -> vector<2x96xf32>
    %110 = vector.broadcast %16 : vector<1x96xf32> to vector<2x96xf32>
    %111 = arith.addf %109, %110 : vector<2x96xf32>
    %112 = vector.extract_strided_slice %108 {offsets = [0, 0], sizes = [2, 32], strides = [1, 1]} : vector<2x96xf32> to vector<2x32xf32>
    %113 = vector.extract_strided_slice %111 {offsets = [0, 0], sizes = [2, 32], strides = [1, 1]} : vector<2x96xf32> to vector<2x32xf32>
    %114 = arith.addf %112, %113 : vector<2x32xf32>
    %cst_60 = arith.constant 5.000000e-01 : f32
    %115 = vector.broadcast %cst_60 : f32 to vector<2x32xf32>
    %116 = arith.mulf %115, %114 : vector<2x32xf32>
    %117 = math.tanh %116 : vector<2x32xf32>
    %cst_61 = arith.constant 1.000000e+00 : f32
    %118 = vector.broadcast %cst_61 : f32 to vector<2x32xf32>
    %119 = arith.addf %117, %118 : vector<2x32xf32>
    %cst_62 = arith.constant 5.000000e-01 : f32
    %120 = vector.broadcast %cst_62 : f32 to vector<2x32xf32>
    %121 = arith.mulf %120, %119 : vector<2x32xf32>
    %122 = vector.extract_strided_slice %108 {offsets = [0, 32], sizes = [2, 32], strides = [1, 1]} : vector<2x96xf32> to vector<2x32xf32>
    %123 = vector.extract_strided_slice %111 {offsets = [0, 32], sizes = [2, 32], strides = [1, 1]} : vector<2x96xf32> to vector<2x32xf32>
    %124 = arith.addf %122, %123 : vector<2x32xf32>
    %cst_63 = arith.constant 5.000000e-01 : f32
    %125 = vector.broadcast %cst_63 : f32 to vector<2x32xf32>
    %126 = arith.mulf %125, %124 : vector<2x32xf32>
    %127 = math.tanh %126 : vector<2x32xf32>
    %cst_64 = arith.constant 1.000000e+00 : f32
    %128 = vector.broadcast %cst_64 : f32 to vector<2x32xf32>
    %129 = arith.addf %127, %128 : vector<2x32xf32>
    %cst_65 = arith.constant 5.000000e-01 : f32
    %130 = vector.broadcast %cst_65 : f32 to vector<2x32xf32>
    %131 = arith.mulf %130, %129 : vector<2x32xf32>
    %132 = vector.extract_strided_slice %108 {offsets = [0, 64], sizes = [2, 32], strides = [1, 1]} : vector<2x96xf32> to vector<2x32xf32>
    %133 = vector.extract_strided_slice %111 {offsets = [0, 64], sizes = [2, 32], strides = [1, 1]} : vector<2x96xf32> to vector<2x32xf32>
    %134 = arith.mulf %121, %133 : vector<2x32xf32>
    %135 = arith.addf %132, %134 : vector<2x32xf32>
    %136 = math.tanh %135 : vector<2x32xf32>
    %cst_66 = arith.constant 1.000000e+00 : f32
    %137 = vector.broadcast %cst_66 : f32 to vector<2x32xf32>
    %138 = arith.subf %137, %131 : vector<2x32xf32>
    %139 = arith.mulf %138, %136 : vector<2x32xf32>
    %140 = arith.mulf %131, %64 : vector<2x32xf32>
    %141 = arith.addf %139, %140 : vector<2x32xf32>
    %cst_67 = arith.constant dense<0.000000e+00> : vector<2x96xf32>
    %142 = tpu.matmul %141, %17, %cst_67 {dimension_numbers = #tpu.dot_dimension_numbers<[1], [0], [0], [1], [0, 0, 1, 1], [], []>} : vector<2x32xf32>, vector<32x96xf32>, vector<2x96xf32> -> vector<2x96xf32>
    %143 = vector.broadcast %19 : vector<1x96xf32> to vector<2x96xf32>
    %144 = arith.addf %142, %143 : vector<2x96xf32>
    %cst_68 = arith.constant dense<0.000000e+00> : vector<2x96xf32>
    %145 = tpu.matmul %100, %18, %cst_68 {dimension_numbers = #tpu.dot_dimension_numbers<[1], [0], [0], [1], [0, 0, 1, 1], [], []>} : vector<2x32xf32>, vector<32x96xf32>, vector<2x96xf32> -> vector<2x96xf32>
    %146 = vector.broadcast %20 : vector<1x96xf32> to vector<2x96xf32>
    %147 = arith.addf %145, %146 : vector<2x96xf32>
    %148 = vector.extract_strided_slice %144 {offsets = [0, 0], sizes = [2, 32], strides = [1, 1]} : vector<2x96xf32> to vector<2x32xf32>
    %149 = vector.extract_strided_slice %147 {offsets = [0, 0], sizes = [2, 32], strides = [1, 1]} : vector<2x96xf32> to vector<2x32xf32>
    %150 = arith.addf %148, %149 : vector<2x32xf32>
    %cst_69 = arith.constant 5.000000e-01 : f32
    %151 = vector.broadcast %cst_69 : f32 to vector<2x32xf32>
    %152 = arith.mulf %151, %150 : vector<2x32xf32>
    %153 = math.tanh %152 : vector<2x32xf32>
    %cst_70 = arith.constant 1.000000e+00 : f32
    %154 = vector.broadcast %cst_70 : f32 to vector<2x32xf32>
    %155 = arith.addf %153, %154 : vector<2x32xf32>
    %cst_71 = arith.constant 5.000000e-01 : f32
    %156 = vector.broadcast %cst_71 : f32 to vector<2x32xf32>
    %157 = arith.mulf %156, %155 : vector<2x32xf32>
    %158 = vector.extract_strided_slice %144 {offsets = [0, 32], sizes = [2, 32], strides = [1, 1]} : vector<2x96xf32> to vector<2x32xf32>
    %159 = vector.extract_strided_slice %147 {offsets = [0, 32], sizes = [2, 32], strides = [1, 1]} : vector<2x96xf32> to vector<2x32xf32>
    %160 = arith.addf %158, %159 : vector<2x32xf32>
    %cst_72 = arith.constant 5.000000e-01 : f32
    %161 = vector.broadcast %cst_72 : f32 to vector<2x32xf32>
    %162 = arith.mulf %161, %160 : vector<2x32xf32>
    %163 = math.tanh %162 : vector<2x32xf32>
    %cst_73 = arith.constant 1.000000e+00 : f32
    %164 = vector.broadcast %cst_73 : f32 to vector<2x32xf32>
    %165 = arith.addf %163, %164 : vector<2x32xf32>
    %cst_74 = arith.constant 5.000000e-01 : f32
    %166 = vector.broadcast %cst_74 : f32 to vector<2x32xf32>
    %167 = arith.mulf %166, %165 : vector<2x32xf32>
    %168 = vector.extract_strided_slice %144 {offsets = [0, 64], sizes = [2, 32], strides = [1, 1]} : vector<2x96xf32> to vector<2x32xf32>
    %169 = vector.extract_strided_slice %147 {offsets = [0, 64], sizes = [2, 32], strides = [1, 1]} : vector<2x96xf32> to vector<2x32xf32>
    %170 = arith.mulf %157, %169 : vector<2x32xf32>
    %171 = arith.addf %168, %170 : vector<2x32xf32>
    %172 = math.tanh %171 : vector<2x32xf32>
    %cst_75 = arith.constant 1.000000e+00 : f32
    %173 = vector.broadcast %cst_75 : f32 to vector<2x32xf32>
    %174 = arith.subf %173, %167 : vector<2x32xf32>
    %175 = arith.mulf %174, %172 : vector<2x32xf32>
    %176 = arith.mulf %167, %100 : vector<2x32xf32>
    %177 = arith.addf %175, %176 : vector<2x32xf32>
    %c2 = arith.constant 2 : index
    %c0_76 = arith.constant 0 : index
    %178 = vector.load %arg24[%c2, %c0_76] : memref<16x32xf32, #tpu.memory_space<vmem>>, vector<2x32xf32>
    tpu.vector_store %arg24[%c2, %c0_76], %177 {strides = array<i32>} : memref<16x32xf32, #tpu.memory_space<vmem>>, vector<2x32xf32>,
    %179 = vector.extract_strided_slice %12 {offsets = [4, 0], sizes = [2, 32], strides = [1, 1]} : vector<16x32xf32> to vector<2x32xf32>
    %180 = arith.addf %179, %9 : vector<2x32xf32>
    %cst_77 = arith.constant 0.000000e+00 : f32
    %181 = vector.broadcast %cst_77 : f32 to vector<2x32xf32>
    %182 = arith.maximumf %180, %181 : vector<2x32xf32>
    %cst_78 = arith.constant dense<0.000000e+00> : vector<2x96xf32>
    %183 = tpu.matmul %182, %13, %cst_78 {dimension_numbers = #tpu.dot_dimension_numbers<[1], [0], [0], [1], [0, 0, 1, 1], [], []>} : vector<2x32xf32>, vector<32x96xf32>, vector<2x96xf32> -> vector<2x96xf32>
    %184 = vector.broadcast %15 : vector<1x96xf32> to vector<2x96xf32>
    %185 = arith.addf %183, %184 : vector<2x96xf32>
    %cst_79 = arith.constant dense<0.000000e+00> : vector<2x96xf32>
    %186 = tpu.matmul %141, %14, %cst_79 {dimension_numbers = #tpu.dot_dimension_numbers<[1], [0], [0], [1], [0, 0, 1, 1], [], []>} : vector<2x32xf32>, vector<32x96xf32>, vector<2x96xf32> -> vector<2x96xf32>
    %187 = vector.broadcast %16 : vector<1x96xf32> to vector<2x96xf32>
    %188 = arith.addf %186, %187 : vector<2x96xf32>
    %189 = vector.extract_strided_slice %185 {offsets = [0, 0], sizes = [2, 32], strides = [1, 1]} : vector<2x96xf32> to vector<2x32xf32>
    %190 = vector.extract_strided_slice %188 {offsets = [0, 0], sizes = [2, 32], strides = [1, 1]} : vector<2x96xf32> to vector<2x32xf32>
    %191 = arith.addf %189, %190 : vector<2x32xf32>
    %cst_80 = arith.constant 5.000000e-01 : f32
    %192 = vector.broadcast %cst_80 : f32 to vector<2x32xf32>
    %193 = arith.mulf %192, %191 : vector<2x32xf32>
    %194 = math.tanh %193 : vector<2x32xf32>
    %cst_81 = arith.constant 1.000000e+00 : f32
    %195 = vector.broadcast %cst_81 : f32 to vector<2x32xf32>
    %196 = arith.addf %194, %195 : vector<2x32xf32>
    %cst_82 = arith.constant 5.000000e-01 : f32
    %197 = vector.broadcast %cst_82 : f32 to vector<2x32xf32>
    %198 = arith.mulf %197, %196 : vector<2x32xf32>
    %199 = vector.extract_strided_slice %185 {offsets = [0, 32], sizes = [2, 32], strides = [1, 1]} : vector<2x96xf32> to vector<2x32xf32>
    %200 = vector.extract_strided_slice %188 {offsets = [0, 32], sizes = [2, 32], strides = [1, 1]} : vector<2x96xf32> to vector<2x32xf32>
    %201 = arith.addf %199, %200 : vector<2x32xf32>
    %cst_83 = arith.constant 5.000000e-01 : f32
    %202 = vector.broadcast %cst_83 : f32 to vector<2x32xf32>
    %203 = arith.mulf %202, %201 : vector<2x32xf32>
    %204 = math.tanh %203 : vector<2x32xf32>
    %cst_84 = arith.constant 1.000000e+00 : f32
    %205 = vector.broadcast %cst_84 : f32 to vector<2x32xf32>
    %206 = arith.addf %204, %205 : vector<2x32xf32>
    %cst_85 = arith.constant 5.000000e-01 : f32
    %207 = vector.broadcast %cst_85 : f32 to vector<2x32xf32>
    %208 = arith.mulf %207, %206 : vector<2x32xf32>
    %209 = vector.extract_strided_slice %185 {offsets = [0, 64], sizes = [2, 32], strides = [1, 1]} : vector<2x96xf32> to vector<2x32xf32>
    %210 = vector.extract_strided_slice %188 {offsets = [0, 64], sizes = [2, 32], strides = [1, 1]} : vector<2x96xf32> to vector<2x32xf32>
    %211 = arith.mulf %198, %210 : vector<2x32xf32>
    %212 = arith.addf %209, %211 : vector<2x32xf32>
    %213 = math.tanh %212 : vector<2x32xf32>
    %cst_86 = arith.constant 1.000000e+00 : f32
    %214 = vector.broadcast %cst_86 : f32 to vector<2x32xf32>
    %215 = arith.subf %214, %208 : vector<2x32xf32>
    %216 = arith.mulf %215, %213 : vector<2x32xf32>
    %217 = arith.mulf %208, %141 : vector<2x32xf32>
    %218 = arith.addf %216, %217 : vector<2x32xf32>
    %cst_87 = arith.constant dense<0.000000e+00> : vector<2x96xf32>
    %219 = tpu.matmul %218, %17, %cst_87 {dimension_numbers = #tpu.dot_dimension_numbers<[1], [0], [0], [1], [0, 0, 1, 1], [], []>} : vector<2x32xf32>, vector<32x96xf32>, vector<2x96xf32> -> vector<2x96xf32>
    %220 = vector.broadcast %19 : vector<1x96xf32> to vector<2x96xf32>
    %221 = arith.addf %219, %220 : vector<2x96xf32>
    %cst_88 = arith.constant dense<0.000000e+00> : vector<2x96xf32>
    %222 = tpu.matmul %177, %18, %cst_88 {dimension_numbers = #tpu.dot_dimension_numbers<[1], [0], [0], [1], [0, 0, 1, 1], [], []>} : vector<2x32xf32>, vector<32x96xf32>, vector<2x96xf32> -> vector<2x96xf32>
    %223 = vector.broadcast %20 : vector<1x96xf32> to vector<2x96xf32>
    %224 = arith.addf %222, %223 : vector<2x96xf32>
    %225 = vector.extract_strided_slice %221 {offsets = [0, 0], sizes = [2, 32], strides = [1, 1]} : vector<2x96xf32> to vector<2x32xf32>
    %226 = vector.extract_strided_slice %224 {offsets = [0, 0], sizes = [2, 32], strides = [1, 1]} : vector<2x96xf32> to vector<2x32xf32>
    %227 = arith.addf %225, %226 : vector<2x32xf32>
    %cst_89 = arith.constant 5.000000e-01 : f32
    %228 = vector.broadcast %cst_89 : f32 to vector<2x32xf32>
    %229 = arith.mulf %228, %227 : vector<2x32xf32>
    %230 = math.tanh %229 : vector<2x32xf32>
    %cst_90 = arith.constant 1.000000e+00 : f32
    %231 = vector.broadcast %cst_90 : f32 to vector<2x32xf32>
    %232 = arith.addf %230, %231 : vector<2x32xf32>
    %cst_91 = arith.constant 5.000000e-01 : f32
    %233 = vector.broadcast %cst_91 : f32 to vector<2x32xf32>
    %234 = arith.mulf %233, %232 : vector<2x32xf32>
    %235 = vector.extract_strided_slice %221 {offsets = [0, 32], sizes = [2, 32], strides = [1, 1]} : vector<2x96xf32> to vector<2x32xf32>
    %236 = vector.extract_strided_slice %224 {offsets = [0, 32], sizes = [2, 32], strides = [1, 1]} : vector<2x96xf32> to vector<2x32xf32>
    %237 = arith.addf %235, %236 : vector<2x32xf32>
    %cst_92 = arith.constant 5.000000e-01 : f32
    %238 = vector.broadcast %cst_92 : f32 to vector<2x32xf32>
    %239 = arith.mulf %238, %237 : vector<2x32xf32>
    %240 = math.tanh %239 : vector<2x32xf32>
    %cst_93 = arith.constant 1.000000e+00 : f32
    %241 = vector.broadcast %cst_93 : f32 to vector<2x32xf32>
    %242 = arith.addf %240, %241 : vector<2x32xf32>
    %cst_94 = arith.constant 5.000000e-01 : f32
    %243 = vector.broadcast %cst_94 : f32 to vector<2x32xf32>
    %244 = arith.mulf %243, %242 : vector<2x32xf32>
    %245 = vector.extract_strided_slice %221 {offsets = [0, 64], sizes = [2, 32], strides = [1, 1]} : vector<2x96xf32> to vector<2x32xf32>
    %246 = vector.extract_strided_slice %224 {offsets = [0, 64], sizes = [2, 32], strides = [1, 1]} : vector<2x96xf32> to vector<2x32xf32>
    %247 = arith.mulf %234, %246 : vector<2x32xf32>
    %248 = arith.addf %245, %247 : vector<2x32xf32>
    %249 = math.tanh %248 : vector<2x32xf32>
    %cst_95 = arith.constant 1.000000e+00 : f32
    %250 = vector.broadcast %cst_95 : f32 to vector<2x32xf32>
    %251 = arith.subf %250, %244 : vector<2x32xf32>
    %252 = arith.mulf %251, %249 : vector<2x32xf32>
    %253 = arith.mulf %244, %177 : vector<2x32xf32>
    %254 = arith.addf %252, %253 : vector<2x32xf32>
    %c4 = arith.constant 4 : index
    %c0_96 = arith.constant 0 : index
    %255 = vector.load %arg24[%c4, %c0_96] : memref<16x32xf32, #tpu.memory_space<vmem>>, vector<2x32xf32>
    tpu.vector_store %arg24[%c4, %c0_96], %254 {strides = array<i32>} : memref<16x32xf32, #tpu.memory_space<vmem>>, vector<2x32xf32>,
    %256 = vector.extract_strided_slice %12 {offsets = [6, 0], sizes = [2, 32], strides = [1, 1]} : vector<16x32xf32> to vector<2x32xf32>
    %257 = arith.addf %256, %9 : vector<2x32xf32>
    %cst_97 = arith.constant 0.000000e+00 : f32
    %258 = vector.broadcast %cst_97 : f32 to vector<2x32xf32>
    %259 = arith.maximumf %257, %258 : vector<2x32xf32>
    %cst_98 = arith.constant dense<0.000000e+00> : vector<2x96xf32>
    %260 = tpu.matmul %259, %13, %cst_98 {dimension_numbers = #tpu.dot_dimension_numbers<[1], [0], [0], [1], [0, 0, 1, 1], [], []>} : vector<2x32xf32>, vector<32x96xf32>, vector<2x96xf32> -> vector<2x96xf32>
    %261 = vector.broadcast %15 : vector<1x96xf32> to vector<2x96xf32>
    %262 = arith.addf %260, %261 : vector<2x96xf32>
    %cst_99 = arith.constant dense<0.000000e+00> : vector<2x96xf32>
    %263 = tpu.matmul %218, %14, %cst_99 {dimension_numbers = #tpu.dot_dimension_numbers<[1], [0], [0], [1], [0, 0, 1, 1], [], []>} : vector<2x32xf32>, vector<32x96xf32>, vector<2x96xf32> -> vector<2x96xf32>
    %264 = vector.broadcast %16 : vector<1x96xf32> to vector<2x96xf32>
    %265 = arith.addf %263, %264 : vector<2x96xf32>
    %266 = vector.extract_strided_slice %262 {offsets = [0, 0], sizes = [2, 32], strides = [1, 1]} : vector<2x96xf32> to vector<2x32xf32>
    %267 = vector.extract_strided_slice %265 {offsets = [0, 0], sizes = [2, 32], strides = [1, 1]} : vector<2x96xf32> to vector<2x32xf32>
    %268 = arith.addf %266, %267 : vector<2x32xf32>
    %cst_100 = arith.constant 5.000000e-01 : f32
    %269 = vector.broadcast %cst_100 : f32 to vector<2x32xf32>
    %270 = arith.mulf %269, %268 : vector<2x32xf32>
    %271 = math.tanh %270 : vector<2x32xf32>
    %cst_101 = arith.constant 1.000000e+00 : f32
    %272 = vector.broadcast %cst_101 : f32 to vector<2x32xf32>
    %273 = arith.addf %271, %272 : vector<2x32xf32>
    %cst_102 = arith.constant 5.000000e-01 : f32
    %274 = vector.broadcast %cst_102 : f32 to vector<2x32xf32>
    %275 = arith.mulf %274, %273 : vector<2x32xf32>
    %276 = vector.extract_strided_slice %262 {offsets = [0, 32], sizes = [2, 32], strides = [1, 1]} : vector<2x96xf32> to vector<2x32xf32>
    %277 = vector.extract_strided_slice %265 {offsets = [0, 32], sizes = [2, 32], strides = [1, 1]} : vector<2x96xf32> to vector<2x32xf32>
    %278 = arith.addf %276, %277 : vector<2x32xf32>
    %cst_103 = arith.constant 5.000000e-01 : f32
    %279 = vector.broadcast %cst_103 : f32 to vector<2x32xf32>
    %280 = arith.mulf %279, %278 : vector<2x32xf32>
    %281 = math.tanh %280 : vector<2x32xf32>
    %cst_104 = arith.constant 1.000000e+00 : f32
    %282 = vector.broadcast %cst_104 : f32 to vector<2x32xf32>
    %283 = arith.addf %281, %282 : vector<2x32xf32>
    %cst_105 = arith.constant 5.000000e-01 : f32
    %284 = vector.broadcast %cst_105 : f32 to vector<2x32xf32>
    %285 = arith.mulf %284, %283 : vector<2x32xf32>
    %286 = vector.extract_strided_slice %262 {offsets = [0, 64], sizes = [2, 32], strides = [1, 1]} : vector<2x96xf32> to vector<2x32xf32>
    %287 = vector.extract_strided_slice %265 {offsets = [0, 64], sizes = [2, 32], strides = [1, 1]} : vector<2x96xf32> to vector<2x32xf32>
    %288 = arith.mulf %275, %287 : vector<2x32xf32>
    %289 = arith.addf %286, %288 : vector<2x32xf32>
    %290 = math.tanh %289 : vector<2x32xf32>
    %cst_106 = arith.constant 1.000000e+00 : f32
    %291 = vector.broadcast %cst_106 : f32 to vector<2x32xf32>
    %292 = arith.subf %291, %285 : vector<2x32xf32>
    %293 = arith.mulf %292, %290 : vector<2x32xf32>
    %294 = arith.mulf %285, %218 : vector<2x32xf32>
    %295 = arith.addf %293, %294 : vector<2x32xf32>
    %cst_107 = arith.constant dense<0.000000e+00> : vector<2x96xf32>
    %296 = tpu.matmul %295, %17, %cst_107 {dimension_numbers = #tpu.dot_dimension_numbers<[1], [0], [0], [1], [0, 0, 1, 1], [], []>} : vector<2x32xf32>, vector<32x96xf32>, vector<2x96xf32> -> vector<2x96xf32>
    %297 = vector.broadcast %19 : vector<1x96xf32> to vector<2x96xf32>
    %298 = arith.addf %296, %297 : vector<2x96xf32>
    %cst_108 = arith.constant dense<0.000000e+00> : vector<2x96xf32>
    %299 = tpu.matmul %254, %18, %cst_108 {dimension_numbers = #tpu.dot_dimension_numbers<[1], [0], [0], [1], [0, 0, 1, 1], [], []>} : vector<2x32xf32>, vector<32x96xf32>, vector<2x96xf32> -> vector<2x96xf32>
    %300 = vector.broadcast %20 : vector<1x96xf32> to vector<2x96xf32>
    %301 = arith.addf %299, %300 : vector<2x96xf32>
    %302 = vector.extract_strided_slice %298 {offsets = [0, 0], sizes = [2, 32], strides = [1, 1]} : vector<2x96xf32> to vector<2x32xf32>
    %303 = vector.extract_strided_slice %301 {offsets = [0, 0], sizes = [2, 32], strides = [1, 1]} : vector<2x96xf32> to vector<2x32xf32>
    %304 = arith.addf %302, %303 : vector<2x32xf32>
    %cst_109 = arith.constant 5.000000e-01 : f32
    %305 = vector.broadcast %cst_109 : f32 to vector<2x32xf32>
    %306 = arith.mulf %305, %304 : vector<2x32xf32>
    %307 = math.tanh %306 : vector<2x32xf32>
    %cst_110 = arith.constant 1.000000e+00 : f32
    %308 = vector.broadcast %cst_110 : f32 to vector<2x32xf32>
    %309 = arith.addf %307, %308 : vector<2x32xf32>
    %cst_111 = arith.constant 5.000000e-01 : f32
    %310 = vector.broadcast %cst_111 : f32 to vector<2x32xf32>
    %311 = arith.mulf %310, %309 : vector<2x32xf32>
    %312 = vector.extract_strided_slice %298 {offsets = [0, 32], sizes = [2, 32], strides = [1, 1]} : vector<2x96xf32> to vector<2x32xf32>
    %313 = vector.extract_strided_slice %301 {offsets = [0, 32], sizes = [2, 32], strides = [1, 1]} : vector<2x96xf32> to vector<2x32xf32>
    %314 = arith.addf %312, %313 : vector<2x32xf32>
    %cst_112 = arith.constant 5.000000e-01 : f32
    %315 = vector.broadcast %cst_112 : f32 to vector<2x32xf32>
    %316 = arith.mulf %315, %314 : vector<2x32xf32>
    %317 = math.tanh %316 : vector<2x32xf32>
    %cst_113 = arith.constant 1.000000e+00 : f32
    %318 = vector.broadcast %cst_113 : f32 to vector<2x32xf32>
    %319 = arith.addf %317, %318 : vector<2x32xf32>
    %cst_114 = arith.constant 5.000000e-01 : f32
    %320 = vector.broadcast %cst_114 : f32 to vector<2x32xf32>
    %321 = arith.mulf %320, %319 : vector<2x32xf32>
    %322 = vector.extract_strided_slice %298 {offsets = [0, 64], sizes = [2, 32], strides = [1, 1]} : vector<2x96xf32> to vector<2x32xf32>
    %323 = vector.extract_strided_slice %301 {offsets = [0, 64], sizes = [2, 32], strides = [1, 1]} : vector<2x96xf32> to vector<2x32xf32>
    %324 = arith.mulf %311, %323 : vector<2x32xf32>
    %325 = arith.addf %322, %324 : vector<2x32xf32>
    %326 = math.tanh %325 : vector<2x32xf32>
    %cst_115 = arith.constant 1.000000e+00 : f32
    %327 = vector.broadcast %cst_115 : f32 to vector<2x32xf32>
    %328 = arith.subf %327, %321 : vector<2x32xf32>
    %329 = arith.mulf %328, %326 : vector<2x32xf32>
    %330 = arith.mulf %321, %254 : vector<2x32xf32>
    %331 = arith.addf %329, %330 : vector<2x32xf32>
    %c6 = arith.constant 6 : index
    %c0_116 = arith.constant 0 : index
    %332 = vector.load %arg24[%c6, %c0_116] : memref<16x32xf32, #tpu.memory_space<vmem>>, vector<2x32xf32>
    tpu.vector_store %arg24[%c6, %c0_116], %331 {strides = array<i32>} : memref<16x32xf32, #tpu.memory_space<vmem>>, vector<2x32xf32>,
    %333 = vector.extract_strided_slice %12 {offsets = [8, 0], sizes = [2, 32], strides = [1, 1]} : vector<16x32xf32> to vector<2x32xf32>
    %334 = arith.addf %333, %9 : vector<2x32xf32>
    %cst_117 = arith.constant 0.000000e+00 : f32
    %335 = vector.broadcast %cst_117 : f32 to vector<2x32xf32>
    %336 = arith.maximumf %334, %335 : vector<2x32xf32>
    %cst_118 = arith.constant dense<0.000000e+00> : vector<2x96xf32>
    %337 = tpu.matmul %336, %13, %cst_118 {dimension_numbers = #tpu.dot_dimension_numbers<[1], [0], [0], [1], [0, 0, 1, 1], [], []>} : vector<2x32xf32>, vector<32x96xf32>, vector<2x96xf32> -> vector<2x96xf32>
    %338 = vector.broadcast %15 : vector<1x96xf32> to vector<2x96xf32>
    %339 = arith.addf %337, %338 : vector<2x96xf32>
    %cst_119 = arith.constant dense<0.000000e+00> : vector<2x96xf32>
    %340 = tpu.matmul %295, %14, %cst_119 {dimension_numbers = #tpu.dot_dimension_numbers<[1], [0], [0], [1], [0, 0, 1, 1], [], []>} : vector<2x32xf32>, vector<32x96xf32>, vector<2x96xf32> -> vector<2x96xf32>
    %341 = vector.broadcast %16 : vector<1x96xf32> to vector<2x96xf32>
    %342 = arith.addf %340, %341 : vector<2x96xf32>
    %343 = vector.extract_strided_slice %339 {offsets = [0, 0], sizes = [2, 32], strides = [1, 1]} : vector<2x96xf32> to vector<2x32xf32>
    %344 = vector.extract_strided_slice %342 {offsets = [0, 0], sizes = [2, 32], strides = [1, 1]} : vector<2x96xf32> to vector<2x32xf32>
    %345 = arith.addf %343, %344 : vector<2x32xf32>
    %cst_120 = arith.constant 5.000000e-01 : f32
    %346 = vector.broadcast %cst_120 : f32 to vector<2x32xf32>
    %347 = arith.mulf %346, %345 : vector<2x32xf32>
    %348 = math.tanh %347 : vector<2x32xf32>
    %cst_121 = arith.constant 1.000000e+00 : f32
    %349 = vector.broadcast %cst_121 : f32 to vector<2x32xf32>
    %350 = arith.addf %348, %349 : vector<2x32xf32>
    %cst_122 = arith.constant 5.000000e-01 : f32
    %351 = vector.broadcast %cst_122 : f32 to vector<2x32xf32>
    %352 = arith.mulf %351, %350 : vector<2x32xf32>
    %353 = vector.extract_strided_slice %339 {offsets = [0, 32], sizes = [2, 32], strides = [1, 1]} : vector<2x96xf32> to vector<2x32xf32>
    %354 = vector.extract_strided_slice %342 {offsets = [0, 32], sizes = [2, 32], strides = [1, 1]} : vector<2x96xf32> to vector<2x32xf32>
    %355 = arith.addf %353, %354 : vector<2x32xf32>
    %cst_123 = arith.constant 5.000000e-01 : f32
    %356 = vector.broadcast %cst_123 : f32 to vector<2x32xf32>
    %357 = arith.mulf %356, %355 : vector<2x32xf32>
    %358 = math.tanh %357 : vector<2x32xf32>
    %cst_124 = arith.constant 1.000000e+00 : f32
    %359 = vector.broadcast %cst_124 : f32 to vector<2x32xf32>
    %360 = arith.addf %358, %359 : vector<2x32xf32>
    %cst_125 = arith.constant 5.000000e-01 : f32
    %361 = vector.broadcast %cst_125 : f32 to vector<2x32xf32>
    %362 = arith.mulf %361, %360 : vector<2x32xf32>
    %363 = vector.extract_strided_slice %339 {offsets = [0, 64], sizes = [2, 32], strides = [1, 1]} : vector<2x96xf32> to vector<2x32xf32>
    %364 = vector.extract_strided_slice %342 {offsets = [0, 64], sizes = [2, 32], strides = [1, 1]} : vector<2x96xf32> to vector<2x32xf32>
    %365 = arith.mulf %352, %364 : vector<2x32xf32>
    %366 = arith.addf %363, %365 : vector<2x32xf32>
    %367 = math.tanh %366 : vector<2x32xf32>
    %cst_126 = arith.constant 1.000000e+00 : f32
    %368 = vector.broadcast %cst_126 : f32 to vector<2x32xf32>
    %369 = arith.subf %368, %362 : vector<2x32xf32>
    %370 = arith.mulf %369, %367 : vector<2x32xf32>
    %371 = arith.mulf %362, %295 : vector<2x32xf32>
    %372 = arith.addf %370, %371 : vector<2x32xf32>
    %cst_127 = arith.constant dense<0.000000e+00> : vector<2x96xf32>
    %373 = tpu.matmul %372, %17, %cst_127 {dimension_numbers = #tpu.dot_dimension_numbers<[1], [0], [0], [1], [0, 0, 1, 1], [], []>} : vector<2x32xf32>, vector<32x96xf32>, vector<2x96xf32> -> vector<2x96xf32>
    %374 = vector.broadcast %19 : vector<1x96xf32> to vector<2x96xf32>
    %375 = arith.addf %373, %374 : vector<2x96xf32>
    %cst_128 = arith.constant dense<0.000000e+00> : vector<2x96xf32>
    %376 = tpu.matmul %331, %18, %cst_128 {dimension_numbers = #tpu.dot_dimension_numbers<[1], [0], [0], [1], [0, 0, 1, 1], [], []>} : vector<2x32xf32>, vector<32x96xf32>, vector<2x96xf32> -> vector<2x96xf32>
    %377 = vector.broadcast %20 : vector<1x96xf32> to vector<2x96xf32>
    %378 = arith.addf %376, %377 : vector<2x96xf32>
    %379 = vector.extract_strided_slice %375 {offsets = [0, 0], sizes = [2, 32], strides = [1, 1]} : vector<2x96xf32> to vector<2x32xf32>
    %380 = vector.extract_strided_slice %378 {offsets = [0, 0], sizes = [2, 32], strides = [1, 1]} : vector<2x96xf32> to vector<2x32xf32>
    %381 = arith.addf %379, %380 : vector<2x32xf32>
    %cst_129 = arith.constant 5.000000e-01 : f32
    %382 = vector.broadcast %cst_129 : f32 to vector<2x32xf32>
    %383 = arith.mulf %382, %381 : vector<2x32xf32>
    %384 = math.tanh %383 : vector<2x32xf32>
    %cst_130 = arith.constant 1.000000e+00 : f32
    %385 = vector.broadcast %cst_130 : f32 to vector<2x32xf32>
    %386 = arith.addf %384, %385 : vector<2x32xf32>
    %cst_131 = arith.constant 5.000000e-01 : f32
    %387 = vector.broadcast %cst_131 : f32 to vector<2x32xf32>
    %388 = arith.mulf %387, %386 : vector<2x32xf32>
    %389 = vector.extract_strided_slice %375 {offsets = [0, 32], sizes = [2, 32], strides = [1, 1]} : vector<2x96xf32> to vector<2x32xf32>
    %390 = vector.extract_strided_slice %378 {offsets = [0, 32], sizes = [2, 32], strides = [1, 1]} : vector<2x96xf32> to vector<2x32xf32>
    %391 = arith.addf %389, %390 : vector<2x32xf32>
    %cst_132 = arith.constant 5.000000e-01 : f32
    %392 = vector.broadcast %cst_132 : f32 to vector<2x32xf32>
    %393 = arith.mulf %392, %391 : vector<2x32xf32>
    %394 = math.tanh %393 : vector<2x32xf32>
    %cst_133 = arith.constant 1.000000e+00 : f32
    %395 = vector.broadcast %cst_133 : f32 to vector<2x32xf32>
    %396 = arith.addf %394, %395 : vector<2x32xf32>
    %cst_134 = arith.constant 5.000000e-01 : f32
    %397 = vector.broadcast %cst_134 : f32 to vector<2x32xf32>
    %398 = arith.mulf %397, %396 : vector<2x32xf32>
    %399 = vector.extract_strided_slice %375 {offsets = [0, 64], sizes = [2, 32], strides = [1, 1]} : vector<2x96xf32> to vector<2x32xf32>
    %400 = vector.extract_strided_slice %378 {offsets = [0, 64], sizes = [2, 32], strides = [1, 1]} : vector<2x96xf32> to vector<2x32xf32>
    %401 = arith.mulf %388, %400 : vector<2x32xf32>
    %402 = arith.addf %399, %401 : vector<2x32xf32>
    %403 = math.tanh %402 : vector<2x32xf32>
    %cst_135 = arith.constant 1.000000e+00 : f32
    %404 = vector.broadcast %cst_135 : f32 to vector<2x32xf32>
    %405 = arith.subf %404, %398 : vector<2x32xf32>
    %406 = arith.mulf %405, %403 : vector<2x32xf32>
    %407 = arith.mulf %398, %331 : vector<2x32xf32>
    %408 = arith.addf %406, %407 : vector<2x32xf32>
    %c8 = arith.constant 8 : index
    %c0_136 = arith.constant 0 : index
    %409 = vector.load %arg24[%c8, %c0_136] : memref<16x32xf32, #tpu.memory_space<vmem>>, vector<2x32xf32>
    tpu.vector_store %arg24[%c8, %c0_136], %408 {strides = array<i32>} : memref<16x32xf32, #tpu.memory_space<vmem>>, vector<2x32xf32>,
    %410 = vector.extract_strided_slice %12 {offsets = [10, 0], sizes = [2, 32], strides = [1, 1]} : vector<16x32xf32> to vector<2x32xf32>
    %411 = arith.addf %410, %9 : vector<2x32xf32>
    %cst_137 = arith.constant 0.000000e+00 : f32
    %412 = vector.broadcast %cst_137 : f32 to vector<2x32xf32>
    %413 = arith.maximumf %411, %412 : vector<2x32xf32>
    %cst_138 = arith.constant dense<0.000000e+00> : vector<2x96xf32>
    %414 = tpu.matmul %413, %13, %cst_138 {dimension_numbers = #tpu.dot_dimension_numbers<[1], [0], [0], [1], [0, 0, 1, 1], [], []>} : vector<2x32xf32>, vector<32x96xf32>, vector<2x96xf32> -> vector<2x96xf32>
    %415 = vector.broadcast %15 : vector<1x96xf32> to vector<2x96xf32>
    %416 = arith.addf %414, %415 : vector<2x96xf32>
    %cst_139 = arith.constant dense<0.000000e+00> : vector<2x96xf32>
    %417 = tpu.matmul %372, %14, %cst_139 {dimension_numbers = #tpu.dot_dimension_numbers<[1], [0], [0], [1], [0, 0, 1, 1], [], []>} : vector<2x32xf32>, vector<32x96xf32>, vector<2x96xf32> -> vector<2x96xf32>
    %418 = vector.broadcast %16 : vector<1x96xf32> to vector<2x96xf32>
    %419 = arith.addf %417, %418 : vector<2x96xf32>
    %420 = vector.extract_strided_slice %416 {offsets = [0, 0], sizes = [2, 32], strides = [1, 1]} : vector<2x96xf32> to vector<2x32xf32>
    %421 = vector.extract_strided_slice %419 {offsets = [0, 0], sizes = [2, 32], strides = [1, 1]} : vector<2x96xf32> to vector<2x32xf32>
    %422 = arith.addf %420, %421 : vector<2x32xf32>
    %cst_140 = arith.constant 5.000000e-01 : f32
    %423 = vector.broadcast %cst_140 : f32 to vector<2x32xf32>
    %424 = arith.mulf %423, %422 : vector<2x32xf32>
    %425 = math.tanh %424 : vector<2x32xf32>
    %cst_141 = arith.constant 1.000000e+00 : f32
    %426 = vector.broadcast %cst_141 : f32 to vector<2x32xf32>
    %427 = arith.addf %425, %426 : vector<2x32xf32>
    %cst_142 = arith.constant 5.000000e-01 : f32
    %428 = vector.broadcast %cst_142 : f32 to vector<2x32xf32>
    %429 = arith.mulf %428, %427 : vector<2x32xf32>
    %430 = vector.extract_strided_slice %416 {offsets = [0, 32], sizes = [2, 32], strides = [1, 1]} : vector<2x96xf32> to vector<2x32xf32>
    %431 = vector.extract_strided_slice %419 {offsets = [0, 32], sizes = [2, 32], strides = [1, 1]} : vector<2x96xf32> to vector<2x32xf32>
    %432 = arith.addf %430, %431 : vector<2x32xf32>
    %cst_143 = arith.constant 5.000000e-01 : f32
    %433 = vector.broadcast %cst_143 : f32 to vector<2x32xf32>
    %434 = arith.mulf %433, %432 : vector<2x32xf32>
    %435 = math.tanh %434 : vector<2x32xf32>
    %cst_144 = arith.constant 1.000000e+00 : f32
    %436 = vector.broadcast %cst_144 : f32 to vector<2x32xf32>
    %437 = arith.addf %435, %436 : vector<2x32xf32>
    %cst_145 = arith.constant 5.000000e-01 : f32
    %438 = vector.broadcast %cst_145 : f32 to vector<2x32xf32>
    %439 = arith.mulf %438, %437 : vector<2x32xf32>
    %440 = vector.extract_strided_slice %416 {offsets = [0, 64], sizes = [2, 32], strides = [1, 1]} : vector<2x96xf32> to vector<2x32xf32>
    %441 = vector.extract_strided_slice %419 {offsets = [0, 64], sizes = [2, 32], strides = [1, 1]} : vector<2x96xf32> to vector<2x32xf32>
    %442 = arith.mulf %429, %441 : vector<2x32xf32>
    %443 = arith.addf %440, %442 : vector<2x32xf32>
    %444 = math.tanh %443 : vector<2x32xf32>
    %cst_146 = arith.constant 1.000000e+00 : f32
    %445 = vector.broadcast %cst_146 : f32 to vector<2x32xf32>
    %446 = arith.subf %445, %439 : vector<2x32xf32>
    %447 = arith.mulf %446, %444 : vector<2x32xf32>
    %448 = arith.mulf %439, %372 : vector<2x32xf32>
    %449 = arith.addf %447, %448 : vector<2x32xf32>
    %cst_147 = arith.constant dense<0.000000e+00> : vector<2x96xf32>
    %450 = tpu.matmul %449, %17, %cst_147 {dimension_numbers = #tpu.dot_dimension_numbers<[1], [0], [0], [1], [0, 0, 1, 1], [], []>} : vector<2x32xf32>, vector<32x96xf32>, vector<2x96xf32> -> vector<2x96xf32>
    %451 = vector.broadcast %19 : vector<1x96xf32> to vector<2x96xf32>
    %452 = arith.addf %450, %451 : vector<2x96xf32>
    %cst_148 = arith.constant dense<0.000000e+00> : vector<2x96xf32>
    %453 = tpu.matmul %408, %18, %cst_148 {dimension_numbers = #tpu.dot_dimension_numbers<[1], [0], [0], [1], [0, 0, 1, 1], [], []>} : vector<2x32xf32>, vector<32x96xf32>, vector<2x96xf32> -> vector<2x96xf32>
    %454 = vector.broadcast %20 : vector<1x96xf32> to vector<2x96xf32>
    %455 = arith.addf %453, %454 : vector<2x96xf32>
    %456 = vector.extract_strided_slice %452 {offsets = [0, 0], sizes = [2, 32], strides = [1, 1]} : vector<2x96xf32> to vector<2x32xf32>
    %457 = vector.extract_strided_slice %455 {offsets = [0, 0], sizes = [2, 32], strides = [1, 1]} : vector<2x96xf32> to vector<2x32xf32>
    %458 = arith.addf %456, %457 : vector<2x32xf32>
    %cst_149 = arith.constant 5.000000e-01 : f32
    %459 = vector.broadcast %cst_149 : f32 to vector<2x32xf32>
    %460 = arith.mulf %459, %458 : vector<2x32xf32>
    %461 = math.tanh %460 : vector<2x32xf32>
    %cst_150 = arith.constant 1.000000e+00 : f32
    %462 = vector.broadcast %cst_150 : f32 to vector<2x32xf32>
    %463 = arith.addf %461, %462 : vector<2x32xf32>
    %cst_151 = arith.constant 5.000000e-01 : f32
    %464 = vector.broadcast %cst_151 : f32 to vector<2x32xf32>
    %465 = arith.mulf %464, %463 : vector<2x32xf32>
    %466 = vector.extract_strided_slice %452 {offsets = [0, 32], sizes = [2, 32], strides = [1, 1]} : vector<2x96xf32> to vector<2x32xf32>
    %467 = vector.extract_strided_slice %455 {offsets = [0, 32], sizes = [2, 32], strides = [1, 1]} : vector<2x96xf32> to vector<2x32xf32>
    %468 = arith.addf %466, %467 : vector<2x32xf32>
    %cst_152 = arith.constant 5.000000e-01 : f32
    %469 = vector.broadcast %cst_152 : f32 to vector<2x32xf32>
    %470 = arith.mulf %469, %468 : vector<2x32xf32>
    %471 = math.tanh %470 : vector<2x32xf32>
    %cst_153 = arith.constant 1.000000e+00 : f32
    %472 = vector.broadcast %cst_153 : f32 to vector<2x32xf32>
    %473 = arith.addf %471, %472 : vector<2x32xf32>
    %cst_154 = arith.constant 5.000000e-01 : f32
    %474 = vector.broadcast %cst_154 : f32 to vector<2x32xf32>
    %475 = arith.mulf %474, %473 : vector<2x32xf32>
    %476 = vector.extract_strided_slice %452 {offsets = [0, 64], sizes = [2, 32], strides = [1, 1]} : vector<2x96xf32> to vector<2x32xf32>
    %477 = vector.extract_strided_slice %455 {offsets = [0, 64], sizes = [2, 32], strides = [1, 1]} : vector<2x96xf32> to vector<2x32xf32>
    %478 = arith.mulf %465, %477 : vector<2x32xf32>
    %479 = arith.addf %476, %478 : vector<2x32xf32>
    %480 = math.tanh %479 : vector<2x32xf32>
    %cst_155 = arith.constant 1.000000e+00 : f32
    %481 = vector.broadcast %cst_155 : f32 to vector<2x32xf32>
    %482 = arith.subf %481, %475 : vector<2x32xf32>
    %483 = arith.mulf %482, %480 : vector<2x32xf32>
    %484 = arith.mulf %475, %408 : vector<2x32xf32>
    %485 = arith.addf %483, %484 : vector<2x32xf32>
    %c10 = arith.constant 10 : index
    %c0_156 = arith.constant 0 : index
    %486 = vector.load %arg24[%c10, %c0_156] : memref<16x32xf32, #tpu.memory_space<vmem>>, vector<2x32xf32>
    tpu.vector_store %arg24[%c10, %c0_156], %485 {strides = array<i32>} : memref<16x32xf32, #tpu.memory_space<vmem>>, vector<2x32xf32>,
    %487 = vector.extract_strided_slice %12 {offsets = [12, 0], sizes = [2, 32], strides = [1, 1]} : vector<16x32xf32> to vector<2x32xf32>
    %488 = arith.addf %487, %9 : vector<2x32xf32>
    %cst_157 = arith.constant 0.000000e+00 : f32
    %489 = vector.broadcast %cst_157 : f32 to vector<2x32xf32>
    %490 = arith.maximumf %488, %489 : vector<2x32xf32>
    %cst_158 = arith.constant dense<0.000000e+00> : vector<2x96xf32>
    %491 = tpu.matmul %490, %13, %cst_158 {dimension_numbers = #tpu.dot_dimension_numbers<[1], [0], [0], [1], [0, 0, 1, 1], [], []>} : vector<2x32xf32>, vector<32x96xf32>, vector<2x96xf32> -> vector<2x96xf32>
    %492 = vector.broadcast %15 : vector<1x96xf32> to vector<2x96xf32>
    %493 = arith.addf %491, %492 : vector<2x96xf32>
    %cst_159 = arith.constant dense<0.000000e+00> : vector<2x96xf32>
    %494 = tpu.matmul %449, %14, %cst_159 {dimension_numbers = #tpu.dot_dimension_numbers<[1], [0], [0], [1], [0, 0, 1, 1], [], []>} : vector<2x32xf32>, vector<32x96xf32>, vector<2x96xf32> -> vector<2x96xf32>
    %495 = vector.broadcast %16 : vector<1x96xf32> to vector<2x96xf32>
    %496 = arith.addf %494, %495 : vector<2x96xf32>
    %497 = vector.extract_strided_slice %493 {offsets = [0, 0], sizes = [2, 32], strides = [1, 1]} : vector<2x96xf32> to vector<2x32xf32>
    %498 = vector.extract_strided_slice %496 {offsets = [0, 0], sizes = [2, 32], strides = [1, 1]} : vector<2x96xf32> to vector<2x32xf32>
    %499 = arith.addf %497, %498 : vector<2x32xf32>
    %cst_160 = arith.constant 5.000000e-01 : f32
    %500 = vector.broadcast %cst_160 : f32 to vector<2x32xf32>
    %501 = arith.mulf %500, %499 : vector<2x32xf32>
    %502 = math.tanh %501 : vector<2x32xf32>
    %cst_161 = arith.constant 1.000000e+00 : f32
    %503 = vector.broadcast %cst_161 : f32 to vector<2x32xf32>
    %504 = arith.addf %502, %503 : vector<2x32xf32>
    %cst_162 = arith.constant 5.000000e-01 : f32
    %505 = vector.broadcast %cst_162 : f32 to vector<2x32xf32>
    %506 = arith.mulf %505, %504 : vector<2x32xf32>
    %507 = vector.extract_strided_slice %493 {offsets = [0, 32], sizes = [2, 32], strides = [1, 1]} : vector<2x96xf32> to vector<2x32xf32>
    %508 = vector.extract_strided_slice %496 {offsets = [0, 32], sizes = [2, 32], strides = [1, 1]} : vector<2x96xf32> to vector<2x32xf32>
    %509 = arith.addf %507, %508 : vector<2x32xf32>
    %cst_163 = arith.constant 5.000000e-01 : f32
    %510 = vector.broadcast %cst_163 : f32 to vector<2x32xf32>
    %511 = arith.mulf %510, %509 : vector<2x32xf32>
    %512 = math.tanh %511 : vector<2x32xf32>
    %cst_164 = arith.constant 1.000000e+00 : f32
    %513 = vector.broadcast %cst_164 : f32 to vector<2x32xf32>
    %514 = arith.addf %512, %513 : vector<2x32xf32>
    %cst_165 = arith.constant 5.000000e-01 : f32
    %515 = vector.broadcast %cst_165 : f32 to vector<2x32xf32>
    %516 = arith.mulf %515, %514 : vector<2x32xf32>
    %517 = vector.extract_strided_slice %493 {offsets = [0, 64], sizes = [2, 32], strides = [1, 1]} : vector<2x96xf32> to vector<2x32xf32>
    %518 = vector.extract_strided_slice %496 {offsets = [0, 64], sizes = [2, 32], strides = [1, 1]} : vector<2x96xf32> to vector<2x32xf32>
    %519 = arith.mulf %506, %518 : vector<2x32xf32>
    %520 = arith.addf %517, %519 : vector<2x32xf32>
    %521 = math.tanh %520 : vector<2x32xf32>
    %cst_166 = arith.constant 1.000000e+00 : f32
    %522 = vector.broadcast %cst_166 : f32 to vector<2x32xf32>
    %523 = arith.subf %522, %516 : vector<2x32xf32>
    %524 = arith.mulf %523, %521 : vector<2x32xf32>
    %525 = arith.mulf %516, %449 : vector<2x32xf32>
    %526 = arith.addf %524, %525 : vector<2x32xf32>
    %cst_167 = arith.constant dense<0.000000e+00> : vector<2x96xf32>
    %527 = tpu.matmul %526, %17, %cst_167 {dimension_numbers = #tpu.dot_dimension_numbers<[1], [0], [0], [1], [0, 0, 1, 1], [], []>} : vector<2x32xf32>, vector<32x96xf32>, vector<2x96xf32> -> vector<2x96xf32>
    %528 = vector.broadcast %19 : vector<1x96xf32> to vector<2x96xf32>
    %529 = arith.addf %527, %528 : vector<2x96xf32>
    %cst_168 = arith.constant dense<0.000000e+00> : vector<2x96xf32>
    %530 = tpu.matmul %485, %18, %cst_168 {dimension_numbers = #tpu.dot_dimension_numbers<[1], [0], [0], [1], [0, 0, 1, 1], [], []>} : vector<2x32xf32>, vector<32x96xf32>, vector<2x96xf32> -> vector<2x96xf32>
    %531 = vector.broadcast %20 : vector<1x96xf32> to vector<2x96xf32>
    %532 = arith.addf %530, %531 : vector<2x96xf32>
    %533 = vector.extract_strided_slice %529 {offsets = [0, 0], sizes = [2, 32], strides = [1, 1]} : vector<2x96xf32> to vector<2x32xf32>
    %534 = vector.extract_strided_slice %532 {offsets = [0, 0], sizes = [2, 32], strides = [1, 1]} : vector<2x96xf32> to vector<2x32xf32>
    %535 = arith.addf %533, %534 : vector<2x32xf32>
    %cst_169 = arith.constant 5.000000e-01 : f32
    %536 = vector.broadcast %cst_169 : f32 to vector<2x32xf32>
    %537 = arith.mulf %536, %535 : vector<2x32xf32>
    %538 = math.tanh %537 : vector<2x32xf32>
    %cst_170 = arith.constant 1.000000e+00 : f32
    %539 = vector.broadcast %cst_170 : f32 to vector<2x32xf32>
    %540 = arith.addf %538, %539 : vector<2x32xf32>
    %cst_171 = arith.constant 5.000000e-01 : f32
    %541 = vector.broadcast %cst_171 : f32 to vector<2x32xf32>
    %542 = arith.mulf %541, %540 : vector<2x32xf32>
    %543 = vector.extract_strided_slice %529 {offsets = [0, 32], sizes = [2, 32], strides = [1, 1]} : vector<2x96xf32> to vector<2x32xf32>
    %544 = vector.extract_strided_slice %532 {offsets = [0, 32], sizes = [2, 32], strides = [1, 1]} : vector<2x96xf32> to vector<2x32xf32>
    %545 = arith.addf %543, %544 : vector<2x32xf32>
    %cst_172 = arith.constant 5.000000e-01 : f32
    %546 = vector.broadcast %cst_172 : f32 to vector<2x32xf32>
    %547 = arith.mulf %546, %545 : vector<2x32xf32>
    %548 = math.tanh %547 : vector<2x32xf32>
    %cst_173 = arith.constant 1.000000e+00 : f32
    %549 = vector.broadcast %cst_173 : f32 to vector<2x32xf32>
    %550 = arith.addf %548, %549 : vector<2x32xf32>
    %cst_174 = arith.constant 5.000000e-01 : f32
    %551 = vector.broadcast %cst_174 : f32 to vector<2x32xf32>
    %552 = arith.mulf %551, %550 : vector<2x32xf32>
    %553 = vector.extract_strided_slice %529 {offsets = [0, 64], sizes = [2, 32], strides = [1, 1]} : vector<2x96xf32> to vector<2x32xf32>
    %554 = vector.extract_strided_slice %532 {offsets = [0, 64], sizes = [2, 32], strides = [1, 1]} : vector<2x96xf32> to vector<2x32xf32>
    %555 = arith.mulf %542, %554 : vector<2x32xf32>
    %556 = arith.addf %553, %555 : vector<2x32xf32>
    %557 = math.tanh %556 : vector<2x32xf32>
    %cst_175 = arith.constant 1.000000e+00 : f32
    %558 = vector.broadcast %cst_175 : f32 to vector<2x32xf32>
    %559 = arith.subf %558, %552 : vector<2x32xf32>
    %560 = arith.mulf %559, %557 : vector<2x32xf32>
    %561 = arith.mulf %552, %485 : vector<2x32xf32>
    %562 = arith.addf %560, %561 : vector<2x32xf32>
    %c12 = arith.constant 12 : index
    %c0_176 = arith.constant 0 : index
    %563 = vector.load %arg24[%c12, %c0_176] : memref<16x32xf32, #tpu.memory_space<vmem>>, vector<2x32xf32>
    tpu.vector_store %arg24[%c12, %c0_176], %562 {strides = array<i32>} : memref<16x32xf32, #tpu.memory_space<vmem>>, vector<2x32xf32>,
    %564 = vector.extract_strided_slice %12 {offsets = [14, 0], sizes = [2, 32], strides = [1, 1]} : vector<16x32xf32> to vector<2x32xf32>
    %565 = arith.addf %564, %9 : vector<2x32xf32>
    %cst_177 = arith.constant 0.000000e+00 : f32
    %566 = vector.broadcast %cst_177 : f32 to vector<2x32xf32>
    %567 = arith.maximumf %565, %566 : vector<2x32xf32>
    %cst_178 = arith.constant dense<0.000000e+00> : vector<2x96xf32>
    %568 = tpu.matmul %567, %13, %cst_178 {dimension_numbers = #tpu.dot_dimension_numbers<[1], [0], [0], [1], [0, 0, 1, 1], [], []>} : vector<2x32xf32>, vector<32x96xf32>, vector<2x96xf32> -> vector<2x96xf32>
    %569 = vector.broadcast %15 : vector<1x96xf32> to vector<2x96xf32>
    %570 = arith.addf %568, %569 : vector<2x96xf32>
    %cst_179 = arith.constant dense<0.000000e+00> : vector<2x96xf32>
    %571 = tpu.matmul %526, %14, %cst_179 {dimension_numbers = #tpu.dot_dimension_numbers<[1], [0], [0], [1], [0, 0, 1, 1], [], []>} : vector<2x32xf32>, vector<32x96xf32>, vector<2x96xf32> -> vector<2x96xf32>
    %572 = vector.broadcast %16 : vector<1x96xf32> to vector<2x96xf32>
    %573 = arith.addf %571, %572 : vector<2x96xf32>
    %574 = vector.extract_strided_slice %570 {offsets = [0, 0], sizes = [2, 32], strides = [1, 1]} : vector<2x96xf32> to vector<2x32xf32>
    %575 = vector.extract_strided_slice %573 {offsets = [0, 0], sizes = [2, 32], strides = [1, 1]} : vector<2x96xf32> to vector<2x32xf32>
    %576 = arith.addf %574, %575 : vector<2x32xf32>
    %cst_180 = arith.constant 5.000000e-01 : f32
    %577 = vector.broadcast %cst_180 : f32 to vector<2x32xf32>
    %578 = arith.mulf %577, %576 : vector<2x32xf32>
    %579 = math.tanh %578 : vector<2x32xf32>
    %cst_181 = arith.constant 1.000000e+00 : f32
    %580 = vector.broadcast %cst_181 : f32 to vector<2x32xf32>
    %581 = arith.addf %579, %580 : vector<2x32xf32>
    %cst_182 = arith.constant 5.000000e-01 : f32
    %582 = vector.broadcast %cst_182 : f32 to vector<2x32xf32>
    %583 = arith.mulf %582, %581 : vector<2x32xf32>
    %584 = vector.extract_strided_slice %570 {offsets = [0, 32], sizes = [2, 32], strides = [1, 1]} : vector<2x96xf32> to vector<2x32xf32>
    %585 = vector.extract_strided_slice %573 {offsets = [0, 32], sizes = [2, 32], strides = [1, 1]} : vector<2x96xf32> to vector<2x32xf32>
    %586 = arith.addf %584, %585 : vector<2x32xf32>
    %cst_183 = arith.constant 5.000000e-01 : f32
    %587 = vector.broadcast %cst_183 : f32 to vector<2x32xf32>
    %588 = arith.mulf %587, %586 : vector<2x32xf32>
    %589 = math.tanh %588 : vector<2x32xf32>
    %cst_184 = arith.constant 1.000000e+00 : f32
    %590 = vector.broadcast %cst_184 : f32 to vector<2x32xf32>
    %591 = arith.addf %589, %590 : vector<2x32xf32>
    %cst_185 = arith.constant 5.000000e-01 : f32
    %592 = vector.broadcast %cst_185 : f32 to vector<2x32xf32>
    %593 = arith.mulf %592, %591 : vector<2x32xf32>
    %594 = vector.extract_strided_slice %570 {offsets = [0, 64], sizes = [2, 32], strides = [1, 1]} : vector<2x96xf32> to vector<2x32xf32>
    %595 = vector.extract_strided_slice %573 {offsets = [0, 64], sizes = [2, 32], strides = [1, 1]} : vector<2x96xf32> to vector<2x32xf32>
    %596 = arith.mulf %583, %595 : vector<2x32xf32>
    %597 = arith.addf %594, %596 : vector<2x32xf32>
    %598 = math.tanh %597 : vector<2x32xf32>
    %cst_186 = arith.constant 1.000000e+00 : f32
    %599 = vector.broadcast %cst_186 : f32 to vector<2x32xf32>
    %600 = arith.subf %599, %593 : vector<2x32xf32>
    %601 = arith.mulf %600, %598 : vector<2x32xf32>
    %602 = arith.mulf %593, %526 : vector<2x32xf32>
    %603 = arith.addf %601, %602 : vector<2x32xf32>
    %cst_187 = arith.constant dense<0.000000e+00> : vector<2x96xf32>
    %604 = tpu.matmul %603, %17, %cst_187 {dimension_numbers = #tpu.dot_dimension_numbers<[1], [0], [0], [1], [0, 0, 1, 1], [], []>} : vector<2x32xf32>, vector<32x96xf32>, vector<2x96xf32> -> vector<2x96xf32>
    %605 = vector.broadcast %19 : vector<1x96xf32> to vector<2x96xf32>
    %606 = arith.addf %604, %605 : vector<2x96xf32>
    %cst_188 = arith.constant dense<0.000000e+00> : vector<2x96xf32>
    %607 = tpu.matmul %562, %18, %cst_188 {dimension_numbers = #tpu.dot_dimension_numbers<[1], [0], [0], [1], [0, 0, 1, 1], [], []>} : vector<2x32xf32>, vector<32x96xf32>, vector<2x96xf32> -> vector<2x96xf32>
    %608 = vector.broadcast %20 : vector<1x96xf32> to vector<2x96xf32>
    %609 = arith.addf %607, %608 : vector<2x96xf32>
    %610 = vector.extract_strided_slice %606 {offsets = [0, 0], sizes = [2, 32], strides = [1, 1]} : vector<2x96xf32> to vector<2x32xf32>
    %611 = vector.extract_strided_slice %609 {offsets = [0, 0], sizes = [2, 32], strides = [1, 1]} : vector<2x96xf32> to vector<2x32xf32>
    %612 = arith.addf %610, %611 : vector<2x32xf32>
    %cst_189 = arith.constant 5.000000e-01 : f32
    %613 = vector.broadcast %cst_189 : f32 to vector<2x32xf32>
    %614 = arith.mulf %613, %612 : vector<2x32xf32>
    %615 = math.tanh %614 : vector<2x32xf32>
    %cst_190 = arith.constant 1.000000e+00 : f32
    %616 = vector.broadcast %cst_190 : f32 to vector<2x32xf32>
    %617 = arith.addf %615, %616 : vector<2x32xf32>
    %cst_191 = arith.constant 5.000000e-01 : f32
    %618 = vector.broadcast %cst_191 : f32 to vector<2x32xf32>
    %619 = arith.mulf %618, %617 : vector<2x32xf32>
    %620 = vector.extract_strided_slice %606 {offsets = [0, 32], sizes = [2, 32], strides = [1, 1]} : vector<2x96xf32> to vector<2x32xf32>
    %621 = vector.extract_strided_slice %609 {offsets = [0, 32], sizes = [2, 32], strides = [1, 1]} : vector<2x96xf32> to vector<2x32xf32>
    %622 = arith.addf %620, %621 : vector<2x32xf32>
    %cst_192 = arith.constant 5.000000e-01 : f32
    %623 = vector.broadcast %cst_192 : f32 to vector<2x32xf32>
    %624 = arith.mulf %623, %622 : vector<2x32xf32>
    %625 = math.tanh %624 : vector<2x32xf32>
    %cst_193 = arith.constant 1.000000e+00 : f32
    %626 = vector.broadcast %cst_193 : f32 to vector<2x32xf32>
    %627 = arith.addf %625, %626 : vector<2x32xf32>
    %cst_194 = arith.constant 5.000000e-01 : f32
    %628 = vector.broadcast %cst_194 : f32 to vector<2x32xf32>
    %629 = arith.mulf %628, %627 : vector<2x32xf32>
    %630 = vector.extract_strided_slice %606 {offsets = [0, 64], sizes = [2, 32], strides = [1, 1]} : vector<2x96xf32> to vector<2x32xf32>
    %631 = vector.extract_strided_slice %609 {offsets = [0, 64], sizes = [2, 32], strides = [1, 1]} : vector<2x96xf32> to vector<2x32xf32>
    %632 = arith.mulf %619, %631 : vector<2x32xf32>
    %633 = arith.addf %630, %632 : vector<2x32xf32>
    %634 = math.tanh %633 : vector<2x32xf32>
    %cst_195 = arith.constant 1.000000e+00 : f32
    %635 = vector.broadcast %cst_195 : f32 to vector<2x32xf32>
    %636 = arith.subf %635, %629 : vector<2x32xf32>
    %637 = arith.mulf %636, %634 : vector<2x32xf32>
    %638 = arith.mulf %629, %562 : vector<2x32xf32>
    %639 = arith.addf %637, %638 : vector<2x32xf32>
    %c14 = arith.constant 14 : index
    %c0_196 = arith.constant 0 : index
    %640 = vector.load %arg24[%c14, %c0_196] : memref<16x32xf32, #tpu.memory_space<vmem>>, vector<2x32xf32>
    tpu.vector_store %arg24[%c14, %c0_196], %639 {strides = array<i32>} : memref<16x32xf32, #tpu.memory_space<vmem>>, vector<2x32xf32>,
    %c0_197 = arith.constant 0 : index
    %c0_198 = arith.constant 0 : index
    %c0_199 = arith.constant 0 : index
    %641 = vector.load %arg23[%c0_197, %c0_198, %c0_199] : memref<2x2x32xf32, #tpu.memory_space<vmem>>, vector<1x2x32xf32>
    %642 = vector.shape_cast %641 : vector<1x2x32xf32> to vector<2x32xf32>
    %643 = vector.shape_cast %603 : vector<2x32xf32> to vector<1x2x32xf32>
    tpu.vector_store %arg23[%c0_197, %c0_198, %c0_199], %643 {strides = array<i32>} : memref<2x2x32xf32, #tpu.memory_space<vmem>>, vector<1x2x32xf32>,
    %c1_200 = arith.constant 1 : index
    %c0_201 = arith.constant 0 : index
    %c0_202 = arith.constant 0 : index
    %644 = vector.load %arg23[%c1_200, %c0_201, %c0_202] : memref<2x2x32xf32, #tpu.memory_space<vmem>>, vector<1x2x32xf32>
    %645 = vector.shape_cast %644 : vector<1x2x32xf32> to vector<2x32xf32>
    %646 = vector.shape_cast %639 : vector<2x32xf32> to vector<1x2x32xf32>
    tpu.vector_store %arg23[%c1_200, %c0_201, %c0_202], %646 {strides = array<i32>} : memref<2x2x32xf32, #tpu.memory_space<vmem>>, vector<1x2x32xf32>,
    %c0_203 = arith.constant 0 : index
    %c0_204 = arith.constant 0 : index
    %647 = vector.load %arg24[%c0_203, %c0_204] : memref<16x32xf32, #tpu.memory_space<vmem>>, vector<16x32xf32>
    %c0_205 = arith.constant 0 : index
    %c0_206 = arith.constant 0 : index
    %648 = vector.load %arg18[%c0_205, %c0_206] : memref<32x64xf32, #tpu.memory_space<vmem>>, vector<32x64xf32>
    %cst_207 = arith.constant dense<0.000000e+00> : vector<16x64xf32>
    %649 = tpu.matmul %647, %648, %cst_207 {dimension_numbers = #tpu.dot_dimension_numbers<[1], [0], [0], [1], [0, 0, 1, 1], [], []>} : vector<16x32xf32>, vector<32x64xf32>, vector<16x64xf32> -> vector<16x64xf32>
    %c0_208 = arith.constant 0 : index
    %c0_209 = arith.constant 0 : index
    %650 = vector.load %arg19[%c0_208, %c0_209] : memref<1x64xf32, #tpu.memory_space<vmem>>, vector<1x64xf32>
    %651 = vector.broadcast %650 : vector<1x64xf32> to vector<16x64xf32>
    %652 = arith.addf %649, %651 : vector<16x64xf32>
    %653 = vector.extract_strided_slice %652 {offsets = [0, 0], sizes = [16, 32], strides = [1, 1]} : vector<16x64xf32> to vector<16x32xf32>
    %654 = vector.extract_strided_slice %652 {offsets = [0, 32], sizes = [16, 32], strides = [1, 1]} : vector<16x64xf32> to vector<16x32xf32>
    %cst_210 = arith.constant 0.000000e+00 : f32
    %655 = vector.broadcast %cst_210 : f32 to vector<16x32xf32>
    %656 = arith.maximumf %654, %655 : vector<16x32xf32>
    %657 = math.absf %654 : vector<16x32xf32>
    %cst_211 = arith.constant 0.000000e+00 : f32
    %658 = vector.broadcast %cst_211 : f32 to vector<16x32xf32>
    %659 = arith.subf %658, %657 : vector<16x32xf32>
    %660 = math.exp %659 : vector<16x32xf32>
    %cst_212 = arith.constant 1.000000e+00 : f32
    %661 = vector.broadcast %cst_212 : f32 to vector<16x32xf32>
    %662 = arith.addf %661, %660 : vector<16x32xf32>
    %663 = math.log %662 : vector<16x32xf32>
    %664 = arith.addf %656, %663 : vector<16x32xf32>
    %c0_213 = arith.constant 0 : index
    %c0_214 = arith.constant 0 : index
    %665 = vector.load %arg21[%c0_213, %c0_214] : memref<16x32xf32, #tpu.memory_space<vmem>>, vector<16x32xf32>
    tpu.vector_store %arg21[%c0_213, %c0_214], %653 {strides = array<i32>} : memref<16x32xf32, #tpu.memory_space<vmem>>, vector<16x32xf32>,
    %c0_215 = arith.constant 0 : index
    %c0_216 = arith.constant 0 : index
    %666 = vector.load %arg22[%c0_215, %c0_216] : memref<16x32xf32, #tpu.memory_space<vmem>>, vector<16x32xf32>
    tpu.vector_store %arg22[%c0_215, %c0_216], %664 {strides = array<i32>} : memref<16x32xf32, #tpu.memory_space<vmem>>, vector<16x32xf32>,
    %667 = math.sqrt %664 : vector<16x32xf32>
    %c0_217 = arith.constant 0 : index
    %c0_218 = arith.constant 0 : index
    %668 = vector.load %arg5[%c0_217, %c0_218] : memref<32x128xf32, #tpu.memory_space<vmem>>, vector<32x128xf32>
    %cst_219 = arith.constant dense<0.000000e+00> : vector<16x128xf32>
    %669 = tpu.matmul %667, %668, %cst_219 {dimension_numbers = #tpu.dot_dimension_numbers<[1], [0], [0], [1], [0, 0, 1, 1], [], []>} : vector<16x32xf32>, vector<32x128xf32>, vector<16x128xf32> -> vector<16x128xf32>
    %c0_220 = arith.constant 0 : index
    %c0_221 = arith.constant 0 : index
    %670 = vector.load %arg5[%c0_220, %c0_221] : memref<32x128xf32, #tpu.memory_space<vmem>>, vector<32x128xf32>
    %cst_222 = arith.constant dense<0.000000e+00> : vector<16x128xf32>
    %671 = tpu.matmul %653, %670, %cst_222 {dimension_numbers = #tpu.dot_dimension_numbers<[1], [0], [0], [1], [0, 0, 1, 1], [], []>} : vector<16x32xf32>, vector<32x128xf32>, vector<16x128xf32> -> vector<16x128xf32>
    %c0_223 = arith.constant 0 : index
    %c0_224 = arith.constant 0 : index
    %672 = vector.load %arg4[%c0_223, %c0_224] : memref<16x128xf32, #tpu.memory_space<vmem>>, vector<16x128xf32>
    %673 = arith.mulf %672, %669 : vector<16x128xf32>
    %674 = arith.addf %673, %671 : vector<16x128xf32>
    %c0_225 = arith.constant 0 : index
    %c0_226 = arith.constant 0 : index
    %675 = vector.load %arg20[%c0_225, %c0_226] : memref<16x128xf32, #tpu.memory_space<vmem>>, vector<16x128xf32>
    tpu.vector_store %arg20[%c0_225, %c0_226], %674 {strides = array<i32>} : memref<16x128xf32, #tpu.memory_space<vmem>>, vector<16x128xf32>,
    return
  }
}

</mosaic_0001>

<bundles_post_ra>
// kernel: prior_sampler_forward.1
= control target key start
LH: loop header
LB: loop body
LE: loop exit
PB: predicated region body
PF: predicated region fallthrough
CT: control target
= control target key end

     0   :  { %s5294_s0 = inlined_call_operand.vmem [shape: f32[16,32], index: 0, kind: input, shape index: {}]   ;;  %s5295_s1 = inlined_call_operand.vmem [shape: f32[2,32], index: 1, kind: input, shape index: {}]   ;;  %s5296_s2 = inlined_call_operand.vmem [shape: f32[2,32], index: 2, kind: input, shape index: {}]   ;;  %s5297_s3 = inlined_call_operand.vmem [shape: f32[2,2,32], index: 3, kind: input, shape index: {}]   ;;  %s5298_s4 = inlined_call_operand.vmem [shape: f32[16,128], index: 4, kind: input, shape index: {}]   ;;  %s5299_s5 = inlined_call_operand.vmem [shape: f32[32,128], index: 5, kind: input, shape index: {}]   ;;  %s5300_s6 = inlined_call_operand.vmem [shape: f32[32,32], index: 6, kind: input, shape index: {}]   ;;  %s5301_s7 = inlined_call_operand.vmem [shape: f32[32,32], index: 7, kind: input, shape index: {}]   ;;  %s5302_s8 = inlined_call_operand.vmem [shape: f32[32,32], index: 8, kind: input, shape index: {}]   ;;  %s5303_s9 = inlined_call_operand.vmem [shape: f32[1,32], index: 9, kind: input, shape index: {}]   ;;  %s5304_s10 = inlined_call_operand.vmem [shape: f32[32,96], index: 10, kind: input, shape index: {}]   ;;  %s5305_s11 = inlined_call_operand.vmem [shape: f32[32,96], index: 11, kind: input, shape index: {}]   ;;  %s5306_s12 = inlined_call_operand.vmem [shape: f32[1,96], index: 12, kind: input, shape index: {}]   ;;  %s5307_s13 = inlined_call_operand.vmem [shape: f32[1,96], index: 13, kind: input, shape index: {}]   ;;  %s5308_s14 = inlined_call_operand.vmem [shape: f32[32,96], index: 14, kind: input, shape index: {}]   ;;  %s5309_s15 = inlined_call_operand.vmem [shape: f32[32,96], index: 15, kind: input, shape index: {}]   ;;  %s5310_s16 = inlined_call_operand.vmem [shape: f32[1,96], index: 16, kind: input, shape index: {}]   ;;  %s5311_s17 = inlined_call_operand.vmem [shape: f32[1,96], index: 17, kind: input, shape index: {}]   ;;  %s5312_s18 = inlined_call_operand.vmem [shape: f32[32,64], index: 18, kind: input, shape index: {}]   ;;  %s5313_s19 = inlined_call_operand.vmem [shape: f32[1,64], index: 19, kind: input, shape index: {}]   ;;  %s5314_s20 = inlined_call_operand.vmem [shape: f32[16,128], index: 20, kind: output, shape index: {0}]   ;;  %s5315_s21 = inlined_call_operand.vmem [shape: f32[16,32], index: 21, kind: output, shape index: {1}]   ;;  %s5316_s22 = inlined_call_operand.vmem [shape: f32[16,32], index: 22, kind: output, shape index: {2}]   ;;  %s5317_s23 = inlined_call_operand.hbm [shape: f32[2,2,32], index: 23, kind: output, shape index: {3}]  }
   0x1   :  { %5324 = sst [smem:[#allocation6_spill]] %s5294_s0 }
   0x2   :  { %5325 = sst [smem:[#allocation7_spill]] %s5295_s1 }
   0x3   :  { %5326 = sst [smem:[#allocation8_spill]] %s5296_s2 }
   0x4   :  { %5327 = sst [smem:[#allocation9_spill]] %s5297_s3 }
   0x5   :  { %5328 = sst [smem:[#allocation10_spill]] %s5298_s4 }
   0x6   :  { %5329 = sst [smem:[#allocation11_spill]] %s5299_s5 }
   0x7   :  { %5330 = sst [smem:[#allocation12_spill]] %s5300_s6 }
   0x8   :  { %5331 = sst [smem:[#allocation13_spill]] %s5301_s7 }
   0x9   :  { %v79_v0 = vld [vmem:[%s5302_s8 + $0x18] sm:$0xff]  ;;  %s5332_s5 = sld [smem:[#allocation13_spill]]  ;;  %v4287_v2 = vmov 0.0   ;;  %v78_v3 = vld [vmem:[%s5302_s8 + $0x10] sm:$0xff]  ;;  %v77_v5 = vld [vmem:[%s5302_s8 + $0x8] sm:$0xff]  ;;  %vm80_vm0 = vcmask 261120  }
   0xa   :  { %3744 = vmatprep.subr.mxu0 %v4287_v2  ;;  %3755 = vmatprep.subr.mxu1 %v4287_v2  ;;  %v76_v7 = vld [vmem:[%s5302_s8] sm:$0xff]  ;;  %s5333_s24 = sld [smem:[#allocation8_spill]]  ;;  %vm4288_vm1 = vmmov 0  }
   0xb   :  { %3745 = vmatpush3.msra.mxu0 %v79_v0  ;;  %3752 = vmatprep.mubr.msk.f32.mxu0 %vm4288_vm1, %v4287_v2  ;;  %s5334_s8 = sld [smem:[#allocation12_spill]] }
   0xc   :  { %3746 = vmatprep.subr.mxu0 %v4287_v2 }
   0xd   :  { %3747 = vmatpush3.msra.mxu0 %v78_v3 }
   0xe   :  { %3748 = vmatprep.subr.mxu0 %v4287_v2 }
   0xf   :  { %v74_v1 = vld [vmem:[%s5332_s5 + $0x18] sm:$0xff]  ;;  %v73_v4 = vld [vmem:[%s5332_s5 + $0x10] sm:$0xff]  ;;  %v72_v6 = vld [vmem:[%s5332_s5 + $0x8] sm:$0xff]  ;;  %3749 = vmatpush3.msra.mxu0 %v77_v5 }
  0x10   :  { %3756 = vmatpush3.msra.mxu1 %v74_v1  ;;  %v75_v8 = vld [vmem:[%s5333_s24] sm:$0x3]  ;;  %3750 = vmatprep.subr.mxu0 %v4287_v2 }
  0x11   :  { %3757 = vmatprep.subr.mxu1 %v4287_v2  ;;  %v71_v9 = vld [vmem:[%s5332_s5] sm:$0xff]  ;;  %v240_v10 = vld [vmem:[%s5334_s8 + $0x18] sm:$0xff] }
  0x12   :  { %3758 = vmatpush3.msra.mxu1 %v73_v4 }
  0x13   :  { %3759 = vmatprep.subr.mxu1 %v4287_v2 }
  0x14   :  { %3760 = vmatpush3.msra.mxu1 %v72_v6 }
  0x15   :  { %29 = vsyncpa [#allocation4], 0  ;;  %3751 = vmatpush3.msra.mxu0 %v76_v7  ;;  %3761 = vmatprep.subr.mxu1 %v4287_v2  ;;  %s5335_s7 = sld [smem:[#allocation7_spill]]  ;;  %v239_v12 = vld [vmem:[%s5334_s8 + $0x10] sm:$0xff]  ;;  %v238_v14 = vld [vmem:[%s5334_s8 + $0x8] sm:$0xff]  ;;  %s4289_s28 = smov 64  }
  0x16   :  { %3753 = vmatmul.mubr.msk.f32.vlgmr.msra.gmra.mxu0 %vm80_vm0, %v75_v8  ;;  %3762 = vmatpush3.msra.mxu1 %v71_v9  ;;  %s5336_s0 = sld [smem:[#allocation6_spill]]  ;;  %v237_v15 = vld [vmem:[%s5334_s8] sm:$0xff]  ;;  %v4483_v17 = vld [vmem:[%s5305_s11 + $0x18] sm:$0xff]  ;;  %v4490_v18 = vld [vmem:[%s5305_s11 + $0x10] sm:$0xff]  ;;  %s4290_s3 = smov 96   ;;  %vm723_vm2 = vcmask 254976  }
  0x17   :  { %3763 = vmatprep.mubr.msk.f32.mxu1 %vm4288_vm1, %v4287_v2  ;;  %3766 = vmatprep.subr.mxu0 %v240_v10  ;;  %v4499_v19 = vld [vmem:[%s5305_s11 + $0x8] sm:$0xff]  ;;  %v4506_v20 = vld [vmem:[%s5305_s11] sm:$0xff]  ;;  %s5337_s4 = sld [smem:[#allocation9_spill]]  ;;  %v4524_v22 = vld [vmem:[%s5304_s10 + $0x18] sm:$0xff] }
  0x18   :  { %3767 = vmatpush3.msra.mxu0 %v240_v10  ;;  %3777 = vmatprep.subr.mxu1 %v4287_v2  ;;  %v4531_v23 = vld [vmem:[%s5304_s10 + $0x10] sm:$0xff]  ;;  %v4538_v24 = vld [vmem:[%s5304_s10 + $0x8] sm:$0xff]  ;;  %v4545_v25 = vld [vmem:[%s5304_s10] sm:$0xff]  ;;  %s5338_s25 = sld [smem:[#allocation11_spill]] }
  0x19   :  { %3768 = vmatprep.subr.mxu0 %v239_v12  ;;  %v3503_v28 = vld [vmem:[%s5303_s9] ss:$0 sm:$0xff]  ;;  %v4586_v0 = vld [vmem:[%s5309_s15 + $0x18] sm:$0xff]  ;;  %v4591_v1 = vld [vmem:[%s5309_s15 + $0x10] sm:$0xff]  ;;  %s4292_s9 = smov [#allocation3]  }
  0x1a   :  { %3769 = vmatpush3.msra.mxu0 %v239_v12  ;;  %v4569_v47 = vld [vmem:[%s5307_s13] ss:$0 sm:$0xff]  ;;  %v4597_v3 = vld [vmem:[%s5308_s14 + $0x18] sm:$0xff]  ;;  %v4603_v4 = vld [vmem:[%s5309_s15 + $0x8] sm:$0xff] }
  0x1b   :  { %v70_v11 = vld [vmem:[%s5335_s7] sm:$0x3]  ;;  %3770 = vmatprep.subr.mxu0 %v238_v14  ;;  %v4609_v5 = vld [vmem:[%s5308_s14 + $0x10] sm:$0xff]  ;;  %v4623_v8 = vld [vmem:[%s5308_s14 + $0x8] sm:$0xff] }
  0x1c   :  { %v235_v13 = vld [vmem:[%s5336_s0] sm:$0xff]  ;;  %3764 = vmatmul.mubr.msk.f32.vlgmr.msra.gmra.mxu1 %vm80_vm0, %v70_v11  ;;  %3771 = vmatpush3.msra.mxu0 %v238_v14  ;;  %v236_v16 = vld [vmem:[%s5336_s0 + $0x8] sm:$0xff] }
  0x1d   :  { %3774 = vmatprep.mubr.msk.f32.mxu0 %vm80_vm0, %v235_v13  ;;  %3785 = vmatprep.mubr.msk.f32.mxu1 %vm4288_vm1, %v4287_v2  ;;  %v4512_v21 = vld [vmem:[%s5337_s4] sm:$0x3]  ;;  %v4630_v9 = vld [vmem:[%s5337_s4 + $0x2] sm:$0x3]  ;;  %s4291_s4 = smov 32  }
  0x1e   :  { %3772 = vmatprep.subr.mxu0 %v237_v15  ;;  %3778 = vmatpush3.msra.mxu1 %v4524_v22  ;;  %v4579_v51 = vld [vmem:[%s5306_s12] ss:$0 sm:$0xff] }
  0x1f   :  { %3773 = vmatpush3.msra.mxu0 %v237_v15  ;;  %3779 = vmatprep.subr.mxu1 %v4287_v2  ;;  %v4617_v7 = vld [vmem:[%s5309_s15] sm:$0xff] }
  0x20   :  { %3775 = vmatmul.mubr.msk.f32.vlgmr.msra.gmra.mxu0 %vm80_vm0, %v236_v16  ;;  %3788 = vmatprep.subr.mxu0 %v4287_v2  ;;  %v4642_v10 = vld [vmem:[%s5308_s14] sm:$0xff] }
  0x21   :  { %3789 = vmatpush3.msra.mxu0 %v4483_v17  ;;  %3796 = vmatprep.mubr.msk.f32.mxu0 %vm4288_vm1, %v4287_v2 }
  0x22   :  { %3790 = vmatprep.subr.mxu0 %v4287_v2  ;;  %3780 = vmatpush3.msra.mxu1 %v4531_v23 }
  0x23   :  { %3791 = vmatpush3.msra.mxu0 %v4490_v18  ;;  %3781 = vmatprep.subr.mxu1 %v4287_v2 }
  0x24   :  { %3792 = vmatprep.subr.mxu0 %v4287_v2  ;;  %3782 = vmatpush3.msra.mxu1 %v4538_v24 }
  0x25   :  { %3793 = vmatpush3.msra.mxu0 %v4499_v19  ;;  %3783 = vmatprep.subr.mxu1 %v4287_v2 }
  0x26   :  { %3794 = vmatprep.subr.mxu0 %v4287_v2  ;;  %3784 = vmatpush3.msra.mxu1 %v4545_v25 }
  0x27   :  { %3795 = vmatpush3.msra.mxu0 %v4506_v20  ;;  %3799 = vmatprep.subr.mxu1 %v4287_v2 }
  0x28   :  { %3797 = vmatmul.mubr.msk.f32.vlgmr.msra.gmra.mxu0 %vm80_vm0, %v4512_v21  ;;  %3810 = vmatprep.subr.mxu0 %v4287_v2 }
  0x29   :  { %3818 = vmatprep.mubr.msk.f32.mxu0 %vm4288_vm1, %v4287_v2  ;;  %3811 = vmatpush3.msra.mxu0 %v4586_v0 }
  0x2a   :  { %3812 = vmatprep.subr.mxu0 %v4287_v2 }
  0x2b   :  { %3813 = vmatpush3.msra.mxu0 %v4591_v1 }
  0x2c   :  { %3814 = vmatprep.subr.mxu0 %v4287_v2 }
  0x2d   :  { %3815 = vmatpush3.msra.mxu0 %v4603_v4 }
  0x2e   :  { %3816 = vmatprep.subr.mxu0 %v4287_v2 }
  0x2f   :  { %3817 = vmatpush3.msra.mxu0 %v4617_v7 }
  0x30   :  { %3819 = vmatmul.mubr.msk.f32.vlgmr.msra.gmra.mxu0 %vm80_vm0, %v4630_v9  ;;  %3832 = vmatprep.subr.mxu0 %v4287_v2 }
  0x31   :  { %3833 = vmatpush3.msra.mxu0 %v4483_v17  ;;  %3840 = vmatprep.mubr.msk.f32.mxu0 %vm4288_vm1, %v4287_v2 }
  0x32   :  { %3834 = vmatprep.subr.mxu0 %v4287_v2 }
  0x33   :  { %3835 = vmatpush3.msra.mxu0 %v4490_v18 }
  0x34   :  { %3836 = vmatprep.subr.mxu0 %v4287_v2 }
  0x35   :  { %3837 = vmatpush3.msra.mxu0 %v4499_v19 }
  0x36   :  { %3838 = vmatprep.subr.mxu0 %v4287_v2 }
  0x37   :  { %3839 = vmatpush3.msra.mxu0 %v4506_v20 }
  0x38   :  { %3854 = vmatprep.subr.mxu0 %v4287_v2 }
  0xd6   :  { %v150_v26 = vpop.f32.mrf.mxu0 }
  0xd8   :  { %v3754_v29 = vpop.f32.mrf.mxu0 }
  0xdc   :  { %v223_v27 = vpop.f32.mrf.mxu1 }
  0xdd   :  { %v224_v30 = vadd.f32 %v223_v27, %v150_v26 }
  0xde   :  { %v3765_v31 = vpop.f32.mrf.mxu1 }
  0xdf   :  { %v234_v32 = vadd.f32 %v3503_v28, %v224_v30 }
  0xe0   :  { %v3776_v36 = vpop.f32.mrf.mxu0 }
  0xe1   :  { %v726_v33 = vrot.slane %v234_v32, 6  ;;  %v1074_v34 = vrot.slane %v234_v32, 4  ;;  %v1422_v35 = vrot.slane %v234_v32, 2  ;;  %v4552_v37 = vadd.f32 %v3776_v36, %v234_v32 }
  0xe2   :  { %v313_v41 = vpop.f32.mrf.mxu0 }
  0xe3   :  { %v4554_v38 = vadd.f32 %v3776_v36, %v726_v33  ;;  %v4556_v39 = vadd.f32 %v3776_v36, %v1074_v34  ;;  %v4558_v40 = vadd.f32 %v3776_v36, %v1422_v35  ;;  %v345_v42 = vadd.f32 %v313_v41, %v234_v32  ;;  %v4707_v32 = vld [vmem:[%s5310_s16] ss:$0 sm:$0xff] }
  0xe4   :  { %v4560_v43 = vadd.f32 %v726_v33, %v313_v41  ;;  %v4562_v44 = vadd.f32 %v1074_v34, %v313_v41  ;;  %v4564_v45 = vadd.f32 %v1422_v35, %v313_v41 }
  0xe5   :  { %v346_v46 = vmax.f32 %v345_v42, 0.0 }
  0xe6   :  { %v729_v30 = vmax.f32 %v4560_v43, 0.0 }
  0xe7   :  { %3786 = vmatmul.mubr.msk.f32.vlgmr.msra.gmra.mxu1 %vm80_vm0, %v346_v46 }
  0xe8   :  { %v501_v48 = vpop.f32.mrf.mxu0  ;;  %3807 = vmatprep.mubr.msk.f32.mxu1 %vm4288_vm1, %v4287_v2  ;;  %3800 = vmatpush3.msra.mxu1 %v4597_v3  ;;  %v731_v31 = vrot.slane %v729_v30, 2 }
  0xe9   :  { %v502_v49 = vadd.f32 %v4569_v47, %v501_v48  ;;  %3801 = vmatprep.subr.mxu1 %v4287_v2 }
  0xea   :  { %v3798_v50 = vpop.f32.mrf.mxu0  ;;  %3802 = vmatpush3.msra.mxu1 %v4609_v5 }
  0xeb   :  { %511 = vrot.lane.b32.xlu0 %v502_v49, %s4289_s28  ;;  %3803 = vmatprep.subr.mxu1 %v4287_v2 }
  0xec   :  { %3804 = vmatpush3.msra.mxu1 %v4623_v8 }
  0xed   :  { %3805 = vmatprep.subr.mxu1 %v4287_v2 }
  0xee   :  { %3806 = vmatpush3.msra.mxu1 %v4642_v10 }
  0xef   :  { %3821 = vmatprep.subr.mxu1 %v4287_v2 }
  0xf0   :  { %v688_v26 = vpop.f32.mrf.mxu0 }
  0xf2   :  { %v3820_v28 = vpop.f32.mrf.mxu0 }
 0x15d   :  { %v512_v59 = vpop.permute.xlu0 %511 }
 0x1a7   :  { %v422_v52 = vpop.f32.mrf.mxu1 }
 0x1a8   :  { %v423_v53 = vadd.f32 %v4579_v51, %v422_v52 }
 0x1a9   :  { %v3787_v54 = vpop.f32.mrf.mxu1 }
 0x1aa   :  { %v505_v55 = vadd.f32 %v502_v49, %v423_v53 }
 0x1ac   :  { %v506_v56 = vmul.f32 0.5, %v505_v55 }
 0x1ae   :  { %4169 = vtanh.f32 %v506_v56 }
 0x1bb   :  { %v4170_v57 = vpop.eup %4169 }
 0x1bc   :  { %v508_v58 = vadd.f32 1.0, %v4170_v57 }
 0x1be   :  { %v509_v60 = vmul.f32 0.5, %v508_v58 }
 0x1c0   :  { %v514_v61 = vmul.f32 %v512_v59, %v509_v60  ;;  %v521_v12 = vsub.f32 1.0, %v509_v60 }
 0x1c2   :  { %516 = vrot.lane.b32.xlu0 %v514_v61, %s4289_s28 }
 0x234   :  { %v517_v62 = vpop.permute.xlu0 %516 }
 0x235   :  { %v519_v63 = vadd.f32 %v517_v62, %v423_v53 }
 0x237   :  { %4171 = vtanh.f32 %v519_v63 }
 0x244   :  { %v4172_v6 = vpop.eup %4171 }
 0x245   :  { %523 = vrot.lane.b32.xlu1 %v4172_v6, %s4290_s3 }
 0x249   :  { %527 = vrot.lane.b32.xlu1 %v4512_v21, %s4291_s4  ;;  %v4666_v21 = vld [vmem:[%s5311_s17] ss:$0 sm:$0xff] }
 0x24a   :  { %v689_v27 = vadd.f32 %v4666_v21, %v688_v26 }
 0x24d   :  { %698 = vrot.lane.b32.xlu1 %v689_v27, %s4289_s28 }
 0x2b7   :  { %v524_v11 = vpop.permute.xlu1 %523 }
 0x2b8   :  { %v526_v14 = vmul.f32 %v524_v11, %v521_v12 }
 0x2bb   :  { %v528_v13 = vpop.permute.xlu1 %527 }
 0x2bc   :  { %v530_v15 = vmul.f32 %v528_v13, %v509_v60 }
 0x2be   :  { %v4659_v16 = vadd.f32 %v530_v15, %v526_v14 }
 0x2bf   :  { %v699_v53 = vpop.permute.xlu1 %698 }
 0x2c0   :  { %539 = vrot.lane.b32.xlu0 %v4659_v16, %s4290_s3 }
 0x332   :  { %v540_v29 = vpop.permute.xlu0 %539 }
 0x333   :  { %3808 = vmatmul.mubr.msk.f32.vlgmr.msra.gmra.mxu1 %vm80_vm0, %v540_v29  ;;  %3841 = vmatmul.mubr.msk.f32.vlgmr.msra.gmra.mxu0 %vm80_vm0, %v540_v29 }
 0x334   :  { %3822 = vmatpush3.msra.mxu1 %v4524_v22  ;;  %3829 = vmatprep.mubr.msk.f32.mxu1 %vm4288_vm1, %v4287_v2 }
 0x335   :  { %3823 = vmatprep.subr.mxu1 %v4287_v2  ;;  %3855 = vmatpush3.msra.mxu0 %v4586_v0 }
 0x336   :  { %3824 = vmatpush3.msra.mxu1 %v4531_v23  ;;  %3856 = vmatprep.subr.mxu0 %v4287_v2 }
 0x337   :  { %3825 = vmatprep.subr.mxu1 %v4287_v2  ;;  %3857 = vmatpush3.msra.mxu0 %v4591_v1 }
 0x338   :  { %3826 = vmatpush3.msra.mxu1 %v4538_v24  ;;  %3858 = vmatprep.subr.mxu0 %v4287_v2 }
 0x339   :  { %3827 = vmatprep.subr.mxu1 %v4287_v2  ;;  %3859 = vmatpush3.msra.mxu0 %v4603_v4 }
 0x33a   :  { %3828 = vmatpush3.msra.mxu1 %v4545_v25  ;;  %3860 = vmatprep.subr.mxu0 %v4287_v2 }
 0x33b   :  { %3830 = vmatmul.mubr.msk.f32.vlgmr.msra.gmra.mxu1 %vm80_vm0, %v731_v31  ;;  %3861 = vmatpush3.msra.mxu0 %v4617_v7 }
 0x33c   :  { %3862 = vmatprep.mubr.msk.f32.mxu0 %vm4288_vm1, %v4287_v2  ;;  %3843 = vmatprep.subr.mxu1 %v4287_v2 }
 0x33d   :  { %3844 = vmatpush3.msra.mxu1 %v4597_v3  ;;  %3876 = vmatprep.subr.mxu0 %v4287_v2 }
 0x33e   :  { %3845 = vmatprep.subr.mxu1 %v4287_v2  ;;  %3851 = vmatprep.mubr.msk.f32.mxu1 %vm4288_vm1, %v4287_v2 }
 0x33f   :  { %3846 = vmatpush3.msra.mxu1 %v4609_v5 }
 0x340   :  { %3847 = vmatprep.subr.mxu1 %v4287_v2 }
 0x341   :  { %3848 = vmatpush3.msra.mxu1 %v4623_v8 }
 0x342   :  { %3849 = vmatprep.subr.mxu1 %v4287_v2 }
 0x343   :  { %3850 = vmatpush3.msra.mxu1 %v4642_v10 }
 0x344   :  { %3865 = vmatprep.subr.mxu1 %v4287_v2 }
 0x3f3   :  { %v609_v33 = vpop.f32.mrf.mxu1  ;;  %v870_v34 = vpop.f32.mrf.mxu0 }
 0x3f4   :  { %v610_v35 = vadd.f32 %v4707_v32, %v609_v33  ;;  %v871_v36 = vadd.f32 %v4569_v47, %v870_v34 }
 0x3f5   :  { %v3809_v41 = vpop.f32.mrf.mxu1  ;;  %v3842_v42 = vpop.f32.mrf.mxu0 }
 0x3f6   :  { %v692_v43 = vadd.f32 %v689_v27, %v610_v35  ;;  %880 = vrot.lane.b32.xlu0 %v871_v36, %s4289_s28  ;;  %v1077_v42 = vmax.f32 %v4562_v44, 0.0 }
 0x3f8   :  { %v693_v46 = vmul.f32 0.5, %v692_v43  ;;  %v1079_v43 = vrot.slane %v1077_v42, 4 }
 0x3fa   :  { %4173 = vtanh.f32 %v693_v46 }
 0x3fb   :  { %v800_v48 = vpop.f32.mrf.mxu1 }
 0x3fc   :  { %v801_v56 = vadd.f32 %v4579_v51, %v800_v48 }
 0x3fd   :  { %v3831_v49 = vpop.f32.mrf.mxu1 }
 0x3fe   :  { %v874_v57 = vadd.f32 %v871_v36, %v801_v56 }
 0x400   :  { %v875_v58 = vmul.f32 0.5, %v874_v57 }
 0x402   :  { %4175 = vtanh.f32 %v875_v58 }
 0x407   :  { %v4174_v50 = vpop.eup %4173 }
 0x408   :  { %v695_v52 = vadd.f32 1.0, %v4174_v50 }
 0x40a   :  { %v696_v54 = vmul.f32 0.5, %v695_v52 }
 0x40c   :  { %v701_v55 = vmul.f32 %v699_v53, %v696_v54  ;;  %v708_v27 = vsub.f32 1.0, %v696_v54 }
 0x40e   :  { %703 = vrot.lane.b32.xlu1 %v701_v55, %s4289_s28 }
 0x40f   :  { %v4176_v59 = vpop.eup %4175 }
 0x410   :  { %v877_v60 = vadd.f32 1.0, %v4176_v59 }
 0x412   :  { %v878_v61 = vmul.f32 0.5, %v877_v60 }
 0x414   :  { %v896_v34 = vmul.f32 %v878_v61, %v4659_v16 }
 0x468   :  { %v881_v62 = vpop.permute.xlu0 %880 }
 0x469   :  { %v883_v63 = vmul.f32 %v881_v62, %v878_v61 }
 0x46b   :  { %885 = vrot.lane.b32.xlu0 %v883_v63, %s4289_s28 }
 0x46f   :  { %714 = vrot.lane.b32.xlu0 %v4630_v9, %s4291_s4  ;;  %v890_v9 = vsub.f32 1.0, %v878_v61 }
 0x480   :  { %v704_v6 = vpop.permute.xlu1 %703 }
 0x481   :  { %v706_v11 = vadd.f32 %v704_v6, %v610_v35 }
 0x483   :  { %4177 = vtanh.f32 %v706_v11 }
 0x490   :  { %v4178_v12 = vpop.eup %4177 }
 0x491   :  { %710 = vrot.lane.b32.xlu1 %v4178_v12, %s4290_s3 }
 0x4dd   :  { %v886_v13 = vpop.permute.xlu0 %885 }
 0x4de   :  { %v888_v14 = vadd.f32 %v886_v13, %v801_v56 }
 0x4e0   :  { %4179 = vtanh.f32 %v888_v14 }
 0x4e1   :  { %v715_v26 = vpop.permute.xlu0 %714 }
 0x4e2   :  { %v717_v29 = vmul.f32 %v715_v26, %v696_v54 }
 0x4ed   :  { %v4180_v15 = vpop.eup %4179 }
 0x4ee   :  { %892 = vrot.lane.b32.xlu1 %v4180_v15, %s4290_s3 }
 0x503   :  { %v711_v28 = vpop.permute.xlu1 %710 }
 0x504   :  { %v713_v30 = vmul.f32 %v711_v28, %v708_v27 }
 0x506   :  { %v4719_v31 = vadd.f32 %v717_v29, %v713_v30 }
 0x508   :  { %720 = vrot.lane.b32.xlu0 %v4719_v31, %s4290_s3 }
 0x560   :  { %v893_v33 = vpop.permute.xlu1 %892 }
 0x561   :  { %v895_v35 = vmul.f32 %v893_v33, %v890_v9 }
 0x563   :  { %v4724_v36 = vadd.f32 %v896_v34, %v895_v35 }
 0x565   :  { %899 = vrot.lane.b32.xlu1 %v4724_v36, %s4290_s3 }
 0x57a   :  { %v721_v41 = vpop.permute.xlu0 %720 }
 0x57b   :  { %724 = vst.msk [vmem:[#allocation2] sm:$0x3] %vm723_vm2, %v721_v41  ;;  %3863 = vmatmul.mubr.msk.f32.vlgmr.msra.gmra.mxu0 %vm80_vm0, %v721_v41 }
 0x57c   :  { %3877 = vmatpush3.msra.mxu0 %v4483_v17  ;;  %3884 = vmatprep.mubr.msk.f32.mxu0 %vm4288_vm1, %v4287_v2 }
 0x57d   :  { %3878 = vmatprep.subr.mxu0 %v4287_v2 }
 0x57e   :  { %3879 = vmatpush3.msra.mxu0 %v4490_v18 }
 0x57f   :  { %3880 = vmatprep.subr.mxu0 %v4287_v2 }
 0x580   :  { %3881 = vmatpush3.msra.mxu0 %v4499_v19 }
 0x581   :  { %3882 = vmatprep.subr.mxu0 %v4287_v2 }
 0x582   :  { %3883 = vmatpush3.msra.mxu0 %v4506_v20 }
 0x583   :  { %3898 = vmatprep.subr.mxu0 %v4287_v2 }
 0x5d7   :  { %v900_v16 = vpop.permute.xlu1 %899 }
 0x5d8   :  { %3852 = vmatmul.mubr.msk.f32.vlgmr.msra.gmra.mxu1 %vm80_vm0, %v900_v16  ;;  %3885 = vmatmul.mubr.msk.f32.vlgmr.msra.gmra.mxu0 %vm80_vm0, %v900_v16 }
 0x5d9   :  { %3866 = vmatpush3.msra.mxu1 %v4524_v22  ;;  %3873 = vmatprep.mubr.msk.f32.mxu1 %vm4288_vm1, %v4287_v2 }
 0x5da   :  { %3867 = vmatprep.subr.mxu1 %v4287_v2  ;;  %3899 = vmatpush3.msra.mxu0 %v4586_v0 }
 0x5db   :  { %3868 = vmatpush3.msra.mxu1 %v4531_v23  ;;  %3900 = vmatprep.subr.mxu0 %v4287_v2 }
 0x5dc   :  { %3869 = vmatprep.subr.mxu1 %v4287_v2  ;;  %3901 = vmatpush3.msra.mxu0 %v4591_v1 }
 0x5dd   :  { %3870 = vmatpush3.msra.mxu1 %v4538_v24  ;;  %3902 = vmatprep.subr.mxu0 %v4287_v2 }
 0x5de   :  { %3871 = vmatprep.subr.mxu1 %v4287_v2  ;;  %3903 = vmatpush3.msra.mxu0 %v4603_v4 }
 0x5df   :  { %3872 = vmatpush3.msra.mxu1 %v4545_v25  ;;  %3904 = vmatprep.subr.mxu0 %v4287_v2 }
 0x5e0   :  { %3874 = vmatmul.mubr.msk.f32.vlgmr.msra.gmra.mxu1 %vm80_vm0, %v1079_v43  ;;  %3905 = vmatpush3.msra.mxu0 %v4617_v7 }
 0x5e1   :  { %3906 = vmatprep.mubr.msk.f32.mxu0 %vm4288_vm1, %v4287_v2  ;;  %3887 = vmatprep.subr.mxu1 %v4287_v2 }
 0x5e2   :  { %3888 = vmatpush3.msra.mxu1 %v4597_v3  ;;  %3920 = vmatprep.subr.mxu0 %v4287_v2 }
 0x5e3   :  { %3889 = vmatprep.subr.mxu1 %v4287_v2  ;;  %3895 = vmatprep.mubr.msk.f32.mxu1 %vm4288_vm1, %v4287_v2 }
 0x5e4   :  { %3890 = vmatpush3.msra.mxu1 %v4609_v5 }
 0x5e5   :  { %3891 = vmatprep.subr.mxu1 %v4287_v2 }
 0x5e6   :  { %3892 = vmatpush3.msra.mxu1 %v4623_v8 }
 0x5e7   :  { %3893 = vmatprep.subr.mxu1 %v4287_v2 }
 0x5e8   :  { %3894 = vmatpush3.msra.mxu1 %v4642_v10 }
 0x5e9   :  { %3909 = vmatprep.subr.mxu1 %v4287_v2 }
 0x63b   :  { %v1041_v44 = vpop.f32.mrf.mxu0 }
 0x63c   :  { %v1042_v46 = vadd.f32 %v4666_v21, %v1041_v44 }
 0x63d   :  { %v3864_v48 = vpop.f32.mrf.mxu0 }
 0x63e   :  { %1051 = vrot.lane.b32.xlu0 %v1042_v46, %s4289_s28 }
 0x698   :  { %v969_v49 = vpop.f32.mrf.mxu1  ;;  %v1218_v50 = vpop.f32.mrf.mxu0 }
 0x699   :  { %v970_v52 = vadd.f32 %v4707_v32, %v969_v49  ;;  %v1219_v53 = vadd.f32 %v4569_v47, %v1218_v50 }
 0x69a   :  { %v3853_v54 = vpop.f32.mrf.mxu1  ;;  %v3886_v55 = vpop.f32.mrf.mxu0 }
 0x69b   :  { %v1045_v56 = vadd.f32 %v1042_v46, %v970_v52  ;;  %1228 = vrot.lane.b32.xlu1 %v1219_v53, %s4289_s28 }
 0x69d   :  { %v1046_v57 = vmul.f32 0.5, %v1045_v56 }
 0x69f   :  { %4181 = vtanh.f32 %v1046_v57 }
 0x6a0   :  { %v1148_v58 = vpop.f32.mrf.mxu1 }
 0x6a1   :  { %v1149_v11 = vadd.f32 %v4579_v51, %v1148_v58 }
 0x6a2   :  { %v3875_v59 = vpop.f32.mrf.mxu1 }
 0x6a3   :  { %v1222_v12 = vadd.f32 %v1219_v53, %v1149_v11 }
 0x6a5   :  { %v1223_v13 = vmul.f32 0.5, %v1222_v12 }
 0x6a7   :  { %4183 = vtanh.f32 %v1223_v13 }
 0x6ac   :  { %v4182_v60 = vpop.eup %4181 }
 0x6ad   :  { %v1048_v61 = vadd.f32 1.0, %v4182_v60 }
 0x6af   :  { %v1049_v62 = vmul.f32 0.5, %v1048_v61 }
 0x6b0   :  { %v1052_v63 = vpop.permute.xlu0 %1051 }
 0x6b1   :  { %v1054_v6 = vmul.f32 %v1052_v63, %v1049_v62  ;;  %v1061_v41 = vsub.f32 1.0, %v1049_v62  ;;  %v1067_v42 = vmul.f32 %v1049_v62, %v4719_v31 }
 0x6b3   :  { %1056 = vrot.lane.b32.xlu0 %v1054_v6, %s4289_s28 }
 0x6b4   :  { %v4184_v14 = vpop.eup %4183 }
 0x6b5   :  { %v1225_v15 = vadd.f32 1.0, %v4184_v14 }
 0x6b7   :  { %v1226_v26 = vmul.f32 0.5, %v1225_v15 }
 0x6b9   :  { %v1238_v46 = vsub.f32 1.0, %v1226_v26  ;;  %v1244_v49 = vmul.f32 %v1226_v26, %v4724_v36  ;;  %v1425_v36 = vmax.f32 %v4564_v45, 0.0 }
 0x6bb   :  { %v1427_v54 = vrot.slane %v1425_v36, 6 }
 0x70d   :  { %v1229_v27 = vpop.permute.xlu1 %1228 }
 0x70e   :  { %v1231_v28 = vmul.f32 %v1229_v27, %v1226_v26 }
 0x710   :  { %1233 = vrot.lane.b32.xlu1 %v1231_v28, %s4289_s28 }
 0x725   :  { %v1057_v29 = vpop.permute.xlu0 %1056 }
 0x726   :  { %v1059_v30 = vadd.f32 %v1057_v29, %v970_v52 }
 0x728   :  { %4185 = vtanh.f32 %v1059_v30 }
 0x735   :  { %v4186_v9 = vpop.eup %4185 }
 0x736   :  { %1063 = vrot.lane.b32.xlu0 %v4186_v9, %s4290_s3 }
 0x782   :  { %v1234_v33 = vpop.permute.xlu1 %1233 }
 0x783   :  { %v1236_v34 = vadd.f32 %v1234_v33, %v1149_v11 }
 0x785   :  { %4187 = vtanh.f32 %v1236_v34 }
 0x792   :  { %v4188_v35 = vpop.eup %4187 }
 0x793   :  { %1240 = vrot.lane.b32.xlu1 %v4188_v35, %s4290_s3 }
 0x7a8   :  { %v1064_v16 = vpop.permute.xlu0 %1063 }
 0x7a9   :  { %v1066_v43 = vmul.f32 %v1064_v16, %v1061_v41 }
 0x7ab   :  { %v4785_v44 = vadd.f32 %v1067_v42, %v1066_v43 }
 0x7ad   :  { %1070 = vrot.lane.b32.xlu0 %v4785_v44, %s4290_s3 }
 0x805   :  { %v1241_v48 = vpop.permute.xlu1 %1240 }
 0x806   :  { %v1243_v50 = vmul.f32 %v1241_v48, %v1238_v46 }
 0x808   :  { %v4790_v52 = vadd.f32 %v1244_v49, %v1243_v50 }
 0x80a   :  { %1247 = vrot.lane.b32.xlu1 %v4790_v52, %s4290_s3 }
 0x81f   :  { %v1071_v53 = vpop.permute.xlu0 %1070 }
 0x820   :  { %1073 = vst.msk [vmem:[#allocation2 + $0x2] sm:$0x3] %vm723_vm2, %v1071_v53  ;;  %3907 = vmatmul.mubr.msk.f32.vlgmr.msra.gmra.mxu0 %vm80_vm0, %v1071_v53 }
 0x821   :  { %3921 = vmatpush3.msra.mxu0 %v4483_v17  ;;  %3928 = vmatprep.mubr.msk.f32.mxu0 %vm4288_vm1, %v4287_v2 }
 0x822   :  { %3922 = vmatprep.subr.mxu0 %v4287_v2 }
 0x823   :  { %3923 = vmatpush3.msra.mxu0 %v4490_v18 }
 0x824   :  { %3924 = vmatprep.subr.mxu0 %v4287_v2 }
 0x825   :  { %3925 = vmatpush3.msra.mxu0 %v4499_v19 }
 0x826   :  { %3926 = vmatprep.subr.mxu0 %v4287_v2 }
 0x827   :  { %3927 = vmatpush3.msra.mxu0 %v4506_v20 }
 0x828   :  { %3942 = vmatprep.subr.mxu0 %v4287_v2 }
 0x87c   :  { %v1248_v31 = vpop.permute.xlu1 %1247 }
 0x87d   :  { %3896 = vmatmul.mubr.msk.f32.vlgmr.msra.gmra.mxu1 %vm80_vm0, %v1248_v31  ;;  %3929 = vmatmul.mubr.msk.f32.vlgmr.msra.gmra.mxu0 %vm80_vm0, %v1248_v31 }
 0x87e   :  { %3910 = vmatpush3.msra.mxu1 %v4524_v22  ;;  %3917 = vmatprep.mubr.msk.f32.mxu1 %vm4288_vm1, %v4287_v2 }
 0x87f   :  { %3911 = vmatprep.subr.mxu1 %v4287_v2  ;;  %3943 = vmatpush3.msra.mxu0 %v4586_v0 }
 0x880   :  { %3912 = vmatpush3.msra.mxu1 %v4531_v23  ;;  %3944 = vmatprep.subr.mxu0 %v4287_v2 }
 0x881   :  { %3913 = vmatprep.subr.mxu1 %v4287_v2  ;;  %3945 = vmatpush3.msra.mxu0 %v4591_v1 }
 0x882   :  { %3914 = vmatpush3.msra.mxu1 %v4538_v24  ;;  %3946 = vmatprep.subr.mxu0 %v4287_v2 }
 0x883   :  { %3915 = vmatprep.subr.mxu1 %v4287_v2  ;;  %3947 = vmatpush3.msra.mxu0 %v4603_v4 }
 0x884   :  { %3916 = vmatpush3.msra.mxu1 %v4545_v25  ;;  %3948 = vmatprep.subr.mxu0 %v4287_v2 }
 0x885   :  { %3918 = vmatmul.mubr.msk.f32.vlgmr.msra.gmra.mxu1 %vm80_vm0, %v1427_v54  ;;  %3949 = vmatpush3.msra.mxu0 %v4617_v7 }
 0x886   :  { %3950 = vmatprep.mubr.msk.f32.mxu0 %vm4288_vm1, %v4287_v2  ;;  %3931 = vmatprep.subr.mxu1 %v4287_v2 }
 0x887   :  { %3932 = vmatpush3.msra.mxu1 %v4597_v3  ;;  %3964 = vmatprep.subr.mxu0 %v4287_v2 }
 0x888   :  { %3933 = vmatprep.subr.mxu1 %v4287_v2  ;;  %3939 = vmatprep.mubr.msk.f32.mxu1 %vm4288_vm1, %v4287_v2 }
 0x889   :  { %3934 = vmatpush3.msra.mxu1 %v4609_v5 }
 0x88a   :  { %3935 = vmatprep.subr.mxu1 %v4287_v2 }
 0x88b   :  { %3936 = vmatpush3.msra.mxu1 %v4623_v8 }
 0x88c   :  { %3937 = vmatprep.subr.mxu1 %v4287_v2 }
 0x88d   :  { %3938 = vmatpush3.msra.mxu1 %v4642_v10 }
 0x88e   :  { %3953 = vmatprep.subr.mxu1 %v4287_v2 }
 0x8e0   :  { %v1389_v45 = vpop.f32.mrf.mxu0 }
 0x8e1   :  { %v1390_v55 = vadd.f32 %v4666_v21, %v1389_v45 }
 0x8e2   :  { %v3908_v56 = vpop.f32.mrf.mxu0 }
 0x8e3   :  { %1399 = vrot.lane.b32.xlu0 %v1390_v55, %s4289_s28 }
 0x93d   :  { %v1317_v57 = vpop.f32.mrf.mxu1  ;;  %v1566_v58 = vpop.f32.mrf.mxu0 }
 0x93e   :  { %v1318_v59 = vadd.f32 %v4707_v32, %v1317_v57  ;;  %v1567_v60 = vadd.f32 %v4569_v47, %v1566_v58 }
 0x93f   :  { %v3897_v61 = vpop.f32.mrf.mxu1  ;;  %v3930_v62 = vpop.f32.mrf.mxu0 }
 0x940   :  { %v1393_v63 = vadd.f32 %v1390_v55, %v1318_v59  ;;  %1576 = vrot.lane.b32.xlu1 %v1567_v60, %s4289_s28 }
 0x942   :  { %v1394_v6 = vmul.f32 0.5, %v1393_v63 }
 0x944   :  { %4189 = vtanh.f32 %v1394_v6 }
 0x945   :  { %v1496_v11 = vpop.f32.mrf.mxu1 }
 0x946   :  { %v1497_v28 = vadd.f32 %v4579_v51, %v1496_v11 }
 0x947   :  { %v3919_v12 = vpop.f32.mrf.mxu1 }
 0x948   :  { %v1570_v29 = vadd.f32 %v1567_v60, %v1497_v28 }
 0x94a   :  { %v1571_v30 = vmul.f32 0.5, %v1570_v29 }
 0x94c   :  { %4191 = vtanh.f32 %v1571_v30 }
 0x951   :  { %v4190_v13 = vpop.eup %4189 }
 0x952   :  { %v1396_v14 = vadd.f32 1.0, %v4190_v13 }
 0x954   :  { %v1397_v15 = vmul.f32 0.5, %v1396_v14 }
 0x955   :  { %v1400_v26 = vpop.permute.xlu0 %1399 }
 0x956   :  { %v1402_v27 = vmul.f32 %v1400_v26, %v1397_v15  ;;  %v1409_v50 = vsub.f32 1.0, %v1397_v15  ;;  %v1415_v31 = vmul.f32 %v1397_v15, %v4785_v44 }
 0x958   :  { %1404 = vrot.lane.b32.xlu0 %v1402_v27, %s4289_s28 }
 0x959   :  { %v4192_v9 = vpop.eup %4191 }
 0x95a   :  { %v1573_v33 = vadd.f32 1.0, %v4192_v9 }
 0x95c   :  { %v1574_v34 = vmul.f32 0.5, %v1573_v33 }
 0x95e   :  { %v1586_v45 = vsub.f32 1.0, %v1574_v34  ;;  %v1592_v56 = vmul.f32 %v1574_v34, %v4790_v52 }
 0x9b2   :  { %v1577_v35 = vpop.permute.xlu1 %1576 }
 0x9b3   :  { %v1579_v41 = vmul.f32 %v1577_v35, %v1574_v34 }
 0x9b5   :  { %1581 = vrot.lane.b32.xlu1 %v1579_v41, %s4289_s28 }
 0x9ca   :  { %v1405_v16 = vpop.permute.xlu0 %1404 }
 0x9cb   :  { %v1407_v42 = vadd.f32 %v1405_v16, %v1318_v59 }
 0x9cd   :  { %4193 = vtanh.f32 %v1407_v42 }
 0x9da   :  { %v4194_v43 = vpop.eup %4193 }
 0x9db   :  { %1411 = vrot.lane.b32.xlu0 %v4194_v43, %s4290_s3 }
 0xa27   :  { %v1582_v46 = vpop.permute.xlu1 %1581 }
 0xa28   :  { %v1584_v48 = vadd.f32 %v1582_v46, %v1497_v28 }
 0xa2a   :  { %4195 = vtanh.f32 %v1584_v48 }
 0xa37   :  { %v4196_v49 = vpop.eup %4195 }
 0xa38   :  { %1588 = vrot.lane.b32.xlu1 %v4196_v49, %s4290_s3 }
 0xa4d   :  { %v1412_v53 = vpop.permute.xlu0 %1411 }
 0xa4e   :  { %v1414_v36 = vmul.f32 %v1412_v53, %v1409_v50 }
 0xa50   :  { %v4851_v54 = vadd.f32 %v1415_v31, %v1414_v36 }
 0xa52   :  { %1418 = vrot.lane.b32.xlu0 %v4851_v54, %s4290_s3 }
 0xaaa   :  { %v1589_v55 = vpop.permute.xlu1 %1588 }
 0xaab   :  { %v1591_v57 = vmul.f32 %v1589_v55, %v1586_v45 }
 0xaad   :  { %v4856_v58 = vadd.f32 %v1592_v56, %v1591_v57 }
 0xaaf   :  { %1595 = vrot.lane.b32.xlu1 %v4856_v58, %s4290_s3 }
 0xac4   :  { %v1419_v59 = vpop.permute.xlu0 %1418 }
 0xac5   :  { %1421 = vst.msk [vmem:[#allocation2 + $0x4] sm:$0x3] %vm723_vm2, %v1419_v59  ;;  %3951 = vmatmul.mubr.msk.f32.vlgmr.msra.gmra.mxu0 %vm80_vm0, %v1419_v59 }
 0xac6   :  { %3965 = vmatpush3.msra.mxu0 %v4483_v17  ;;  %3972 = vmatprep.mubr.msk.f32.mxu0 %vm4288_vm1, %v4287_v2  ;;  %v1771_v17 = vmax.f32 %v4552_v37, 0.0 }
 0xac7   :  { %3966 = vmatprep.subr.mxu0 %v4287_v2 }
 0xac8   :  { %3967 = vmatpush3.msra.mxu0 %v4490_v18 }
 0xac9   :  { %3968 = vmatprep.subr.mxu0 %v4287_v2 }
 0xaca   :  { %3969 = vmatpush3.msra.mxu0 %v4499_v19 }
 0xacb   :  { %3970 = vmatprep.subr.mxu0 %v4287_v2 }
 0xacc   :  { %3971 = vmatpush3.msra.mxu0 %v4506_v20 }
 0xacd   :  { %3986 = vmatprep.subr.mxu0 %v4287_v2 }
 0xb21   :  { %v1596_v44 = vpop.permute.xlu1 %1595 }
 0xb22   :  { %3940 = vmatmul.mubr.msk.f32.vlgmr.msra.gmra.mxu1 %vm80_vm0, %v1596_v44  ;;  %3973 = vmatmul.mubr.msk.f32.vlgmr.msra.gmra.mxu0 %vm80_vm0, %v1596_v44 }
 0xb23   :  { %3954 = vmatpush3.msra.mxu1 %v4524_v22  ;;  %3961 = vmatprep.mubr.msk.f32.mxu1 %vm4288_vm1, %v4287_v2 }
 0xb24   :  { %3955 = vmatprep.subr.mxu1 %v4287_v2  ;;  %3987 = vmatpush3.msra.mxu0 %v4586_v0 }
 0xb25   :  { %3956 = vmatpush3.msra.mxu1 %v4531_v23  ;;  %3988 = vmatprep.subr.mxu0 %v4287_v2 }
 0xb26   :  { %3957 = vmatprep.subr.mxu1 %v4287_v2  ;;  %3989 = vmatpush3.msra.mxu0 %v4591_v1 }
 0xb27   :  { %3958 = vmatpush3.msra.mxu1 %v4538_v24  ;;  %3990 = vmatprep.subr.mxu0 %v4287_v2 }
 0xb28   :  { %3959 = vmatprep.subr.mxu1 %v4287_v2  ;;  %3991 = vmatpush3.msra.mxu0 %v4603_v4 }
 0xb29   :  { %3960 = vmatpush3.msra.mxu1 %v4545_v25  ;;  %3992 = vmatprep.subr.mxu0 %v4287_v2 }
 0xb2a   :  { %3962 = vmatmul.mubr.msk.f32.vlgmr.msra.gmra.mxu1 %vm80_vm0, %v1771_v17  ;;  %3993 = vmatpush3.msra.mxu0 %v4617_v7 }
 0xb2b   :  { %3994 = vmatprep.mubr.msk.f32.mxu0 %vm4288_vm1, %v4287_v2  ;;  %3975 = vmatprep.subr.mxu1 %v4287_v2 }
 0xb2c   :  { %3976 = vmatpush3.msra.mxu1 %v4597_v3  ;;  %4008 = vmatprep.subr.mxu0 %v4287_v2 }
 0xb2d   :  { %3977 = vmatprep.subr.mxu1 %v4287_v2  ;;  %3983 = vmatprep.mubr.msk.f32.mxu1 %vm4288_vm1, %v4287_v2 }
 0xb2e   :  { %3978 = vmatpush3.msra.mxu1 %v4609_v5 }
 0xb2f   :  { %3979 = vmatprep.subr.mxu1 %v4287_v2 }
 0xb30   :  { %3980 = vmatpush3.msra.mxu1 %v4623_v8 }
 0xb31   :  { %3981 = vmatprep.subr.mxu1 %v4287_v2 }
 0xb32   :  { %3982 = vmatpush3.msra.mxu1 %v4642_v10 }
 0xb33   :  { %3997 = vmatprep.subr.mxu1 %v4287_v2 }
 0xb85   :  { %v1737_v18 = vpop.f32.mrf.mxu0 }
 0xb86   :  { %v1738_v25 = vadd.f32 %v4666_v21, %v1737_v18 }
 0xb87   :  { %v3952_v37 = vpop.f32.mrf.mxu0 }
 0xb88   :  { %1747 = vrot.lane.b32.xlu0 %v1738_v25, %s4289_s28  ;;  %v2116_v37 = vmax.f32 %v4554_v38, 0.0 }
 0xbe2   :  { %v1665_v52 = vpop.f32.mrf.mxu1  ;;  %v1911_v60 = vpop.f32.mrf.mxu0 }
 0xbe3   :  { %v1666_v61 = vadd.f32 %v4707_v32, %v1665_v52  ;;  %v1912_v62 = vadd.f32 %v4569_v47, %v1911_v60 }
 0xbe4   :  { %v3941_v63 = vpop.f32.mrf.mxu1  ;;  %v3974_v6 = vpop.f32.mrf.mxu0 }
 0xbe5   :  { %v1741_v11 = vadd.f32 %v1738_v25, %v1666_v61  ;;  %1921 = vrot.lane.b32.xlu1 %v1912_v62, %s4289_s28 }
 0xbe7   :  { %v1742_v12 = vmul.f32 0.5, %v1741_v11 }
 0xbe9   :  { %4197 = vtanh.f32 %v1742_v12 }
 0xbea   :  { %v1841_v13 = vpop.f32.mrf.mxu1 }
 0xbeb   :  { %v1842_v30 = vadd.f32 %v4579_v51, %v1841_v13 }
 0xbec   :  { %v3963_v14 = vpop.f32.mrf.mxu1 }
 0xbed   :  { %v1915_v9 = vadd.f32 %v1912_v62, %v1842_v30 }
 0xbef   :  { %v1916_v33 = vmul.f32 0.5, %v1915_v9 }
 0xbf1   :  { %4199 = vtanh.f32 %v1916_v33 }
 0xbf6   :  { %v4198_v15 = vpop.eup %4197 }
 0xbf7   :  { %v1744_v26 = vadd.f32 1.0, %v4198_v15 }
 0xbf9   :  { %v1745_v27 = vmul.f32 0.5, %v1744_v26 }
 0xbfa   :  { %v1748_v28 = vpop.permute.xlu0 %1747 }
 0xbfb   :  { %v1750_v29 = vmul.f32 %v1748_v28, %v1745_v27  ;;  %v1757_v53 = vsub.f32 1.0, %v1745_v27  ;;  %v1763_v36 = vmul.f32 %v1745_v27, %v4851_v54  ;;  %v4931_v54 = vld [vmem:[%s5305_s11 + $0x18] sm:$0xff] }
 0xbfd   :  { %1752 = vrot.lane.b32.xlu0 %v1750_v29, %s4289_s28 }
 0xbfe   :  { %v4200_v34 = vpop.eup %4199 }
 0xbff   :  { %v1918_v35 = vadd.f32 1.0, %v4200_v34 }
 0xc01   :  { %v1919_v41 = vmul.f32 0.5, %v1918_v35 }
 0xc03   :  { %v1931_v56 = vsub.f32 1.0, %v1919_v41  ;;  %v1937_v59 = vmul.f32 %v1919_v41, %v4856_v58  ;;  %v4940_v58 = vld [vmem:[%s5305_s11 + $0x10] sm:$0xff] }
 0xc57   :  { %v1922_v16 = vpop.permute.xlu1 %1921 }
 0xc58   :  { %v1924_v42 = vmul.f32 %v1922_v16, %v1919_v41 }
 0xc5a   :  { %1926 = vrot.lane.b32.xlu1 %v1924_v42, %s4289_s28 }
 0xc6f   :  { %v1753_v43 = vpop.permute.xlu0 %1752 }
 0xc70   :  { %v1755_v46 = vadd.f32 %v1753_v43, %v1666_v61 }
 0xc72   :  { %4201 = vtanh.f32 %v1755_v46 }
 0xc7f   :  { %v4202_v48 = vpop.eup %4201 }
 0xc80   :  { %1759 = vrot.lane.b32.xlu0 %v4202_v48, %s4290_s3 }
 0xccc   :  { %v1927_v49 = vpop.permute.xlu1 %1926 }
 0xccd   :  { %v1929_v50 = vadd.f32 %v1927_v49, %v1842_v30 }
 0xccf   :  { %4203 = vtanh.f32 %v1929_v50 }
 0xcdc   :  { %v4204_v51 = vpop.eup %4203 }
 0xcdd   :  { %1933 = vrot.lane.b32.xlu1 %v4204_v51, %s4290_s3 }
 0xcf2   :  { %v1760_v31 = vpop.permute.xlu0 %1759 }
 0xcf3   :  { %v1762_v45 = vmul.f32 %v1760_v31, %v1757_v53  ;;  %v5023_v31 = vld [vmem:[%s5305_s11 + $0x8] sm:$0xff] }
 0xcf5   :  { %v4917_v55 = vadd.f32 %v1763_v36, %v1762_v45  ;;  %v5030_v36 = vld [vmem:[%s5305_s11] sm:$0xff] }
 0xcf7   :  { %1766 = vrot.lane.b32.xlu0 %v4917_v55, %s4290_s3 }
 0xd4f   :  { %v1934_v57 = vpop.permute.xlu1 %1933 }
 0xd50   :  { %v1936_v44 = vmul.f32 %v1934_v57, %v1931_v56  ;;  %v2462_v56 = vmax.f32 %v4556_v39, 0.0  ;;  %v5049_v57 = vld [vmem:[%s5309_s15 + $0x18] sm:$0xff]  ;;  %v5063_v39 = vld [vmem:[%s5309_s15 + $0x10] sm:$0xff] }
 0xd52   :  { %v4922_v17 = vadd.f32 %v1937_v59, %v1936_v44  ;;  %v5055_v59 = vld [vmem:[%s5304_s10 + $0x10] sm:$0xff]  ;;  %v5069_v44 = vld [vmem:[%s5304_s10 + $0x8] sm:$0xff] }
 0xd54   :  { %1940 = vrot.lane.b32.xlu1 %v4922_v17, %s4290_s3 }
 0xd69   :  { %v1767_v18 = vpop.permute.xlu0 %1766 }
 0xd6a   :  { %1769 = vst.msk [vmem:[#allocation2 + $0x6] sm:$0x3] %vm723_vm2, %v1767_v18  ;;  %3995 = vmatmul.mubr.msk.f32.vlgmr.msra.gmra.mxu0 %vm80_vm0, %v1767_v18  ;;  %v5077_v18 = vld [vmem:[%s5309_s15 + $0x8] sm:$0xff] }
 0xd6b   :  { %4009 = vmatpush3.msra.mxu0 %v4931_v54  ;;  %4016 = vmatprep.mubr.msk.f32.mxu0 %vm4288_vm1, %v4287_v2 }
 0xd6c   :  { %4010 = vmatprep.subr.mxu0 %v4287_v2 }
 0xd6d   :  { %4011 = vmatpush3.msra.mxu0 %v4940_v58 }
 0xd6e   :  { %4012 = vmatprep.subr.mxu0 %v4287_v2 }
 0xd6f   :  { %4013 = vmatpush3.msra.mxu0 %v4499_v19  ;;  %v2118_v19 = vrot.slane %v2116_v37, 2  ;;  %v5095_v37 = vld [vmem:[%s5308_s14 + $0x18] sm:$0xff] }
 0xd70   :  { %4014 = vmatprep.subr.mxu0 %v4287_v2 }
 0xd71   :  { %4015 = vmatpush3.msra.mxu0 %v4506_v20  ;;  %v4967_v20 = vld [vmem:[%s5304_s10] sm:$0xff] }
 0xd72   :  { %4030 = vmatprep.subr.mxu0 %v4287_v2 }
 0xdc6   :  { %v1941_v25 = vpop.permute.xlu1 %1940 }
 0xdc7   :  { %3984 = vmatmul.mubr.msk.f32.vlgmr.msra.gmra.mxu1 %vm80_vm0, %v1941_v25  ;;  %4017 = vmatmul.mubr.msk.f32.vlgmr.msra.gmra.mxu0 %vm80_vm0, %v1941_v25  ;;  %v5086_v25 = vld [vmem:[%s5309_s15] sm:$0xff] }
 0xdc8   :  { %3998 = vmatpush3.msra.mxu1 %v4524_v22  ;;  %4005 = vmatprep.mubr.msk.f32.mxu1 %vm4288_vm1, %v4287_v2 }
 0xdc9   :  { %3999 = vmatprep.subr.mxu1 %v4287_v2  ;;  %4031 = vmatpush3.msra.mxu0 %v4586_v0 }
 0xdca   :  { %4000 = vmatpush3.msra.mxu1 %v4531_v23  ;;  %4032 = vmatprep.subr.mxu0 %v4287_v2 }
 0xdcb   :  { %4001 = vmatprep.subr.mxu1 %v4287_v2  ;;  %4033 = vmatpush3.msra.mxu0 %v4591_v1 }
 0xdcc   :  { %4002 = vmatpush3.msra.mxu1 %v4538_v24  ;;  %4034 = vmatprep.subr.mxu0 %v4287_v2 }
 0xdcd   :  { %4003 = vmatprep.subr.mxu1 %v4287_v2  ;;  %4035 = vmatpush3.msra.mxu0 %v4603_v4 }
 0xdce   :  { %4004 = vmatpush3.msra.mxu1 %v4967_v20  ;;  %4036 = vmatprep.subr.mxu0 %v4287_v2 }
 0xdcf   :  { %4006 = vmatmul.mubr.msk.f32.vlgmr.msra.gmra.mxu1 %vm80_vm0, %v2118_v19  ;;  %4037 = vmatpush3.msra.mxu0 %v4617_v7  ;;  %v5105_v19 = vld [vmem:[%s5308_s14 + $0x10] sm:$0xff] }
 0xdd0   :  { %4038 = vmatprep.mubr.msk.f32.mxu0 %vm4288_vm1, %v4287_v2  ;;  %4019 = vmatprep.subr.mxu1 %v4287_v2 }
 0xdd1   :  { %4020 = vmatpush3.msra.mxu1 %v4597_v3  ;;  %4052 = vmatprep.subr.mxu0 %v4287_v2 }
 0xdd2   :  { %4021 = vmatprep.subr.mxu1 %v4287_v2  ;;  %4027 = vmatprep.mubr.msk.f32.mxu1 %vm4288_vm1, %v4287_v2 }
 0xdd3   :  { %4022 = vmatpush3.msra.mxu1 %v4609_v5 }
 0xdd4   :  { %4023 = vmatprep.subr.mxu1 %v4287_v2 }
 0xdd5   :  { %4024 = vmatpush3.msra.mxu1 %v4623_v8 }
 0xdd6   :  { %4025 = vmatprep.subr.mxu1 %v4287_v2 }
 0xdd7   :  { %4026 = vmatpush3.msra.mxu1 %v4642_v10 }
 0xdd8   :  { %4041 = vmatprep.subr.mxu1 %v4287_v2 }
 0xe2a   :  { %v2082_v22 = vpop.f32.mrf.mxu0 }
 0xe2b   :  { %v2083_v23 = vadd.f32 %v4666_v21, %v2082_v22  ;;  %v5112_v22 = vld [vmem:[%s5308_s14 + $0x8] sm:$0xff] }
 0xe2c   :  { %v3996_v24 = vpop.f32.mrf.mxu0 }
 0xe2d   :  { %2092 = vrot.lane.b32.xlu0 %v2083_v23, %s4289_s28 }
 0xe87   :  { %v2010_v38 = vpop.f32.mrf.mxu1  ;;  %v2257_v0 = vpop.f32.mrf.mxu0 }
 0xe88   :  { %v2011_v1 = vadd.f32 %v4707_v32, %v2010_v38  ;;  %v2258_v3 = vadd.f32 %v4569_v47, %v2257_v0  ;;  %v4996_v47 = vld [vmem:[%s5306_s12] ss:$0 sm:$0xff] }
 0xe89   :  { %v3985_v4 = vpop.f32.mrf.mxu1  ;;  %v4018_v5 = vpop.f32.mrf.mxu0  ;;  %v5126_v38 = vld [vmem:[%s5311_s17] ss:$0 sm:$0xff] }
 0xe8a   :  { %v2086_v7 = vadd.f32 %v2083_v23, %v2011_v1  ;;  %2267 = vrot.lane.b32.xlu1 %v2258_v3, %s4289_s28  ;;  %v5119_v23 = vld [vmem:[%s5308_s14] sm:$0xff] }
 0xe8c   :  { %v2087_v8 = vmul.f32 0.5, %v2086_v7  ;;  %v5134_v7 = vld [vmem:[%s5307_s13] ss:$0 sm:$0xff] }
 0xe8e   :  { %4205 = vtanh.f32 %v2087_v8 }
 0xe8f   :  { %v2187_v10 = vpop.f32.mrf.mxu1 }
 0xe90   :  { %v2188_v6 = vadd.f32 %v4996_v47, %v2187_v10 }
 0xe91   :  { %v4007_v52 = vpop.f32.mrf.mxu1 }
 0xe92   :  { %v2261_v11 = vadd.f32 %v2258_v3, %v2188_v6 }
 0xe94   :  { %v2262_v12 = vmul.f32 0.5, %v2261_v11 }
 0xe96   :  { %4207 = vtanh.f32 %v2262_v12 }
 0xe9b   :  { %v4206_v60 = vpop.eup %4205 }
 0xe9c   :  { %v2089_v21 = vadd.f32 1.0, %v4206_v60 }
 0xe9e   :  { %v2090_v61 = vmul.f32 0.5, %v2089_v21 }
 0xe9f   :  { %v2093_v62 = vpop.permute.xlu0 %2092 }
 0xea0   :  { %v2095_v63 = vmul.f32 %v2093_v62, %v2090_v61  ;;  %v2102_v35 = vsub.f32 1.0, %v2090_v61  ;;  %v2108_v16 = vmul.f32 %v2090_v61, %v4917_v55  ;;  %v5039_v55 = vld [vmem:[%s5304_s10 + $0x18] sm:$0xff] }
 0xea2   :  { %2097 = vrot.lane.b32.xlu0 %v2095_v63, %s4289_s28 }
 0xea3   :  { %v4208_v13 = vpop.eup %4207 }
 0xea4   :  { %v2264_v14 = vadd.f32 1.0, %v4208_v13 }
 0xea6   :  { %v2265_v15 = vmul.f32 0.5, %v2264_v14 }
 0xea8   :  { %v2277_v46 = vsub.f32 1.0, %v2265_v15  ;;  %v2283_v49 = vmul.f32 %v2265_v15, %v4922_v17  ;;  %v2464_v17 = vrot.slane %v2462_v56, 4 }
 0xefc   :  { %v2268_v26 = vpop.permute.xlu1 %2267 }
 0xefd   :  { %v2270_v27 = vmul.f32 %v2268_v26, %v2265_v15 }
 0xeff   :  { %2272 = vrot.lane.b32.xlu1 %v2270_v27, %s4289_s28 }
 0xf14   :  { %v2098_v28 = vpop.permute.xlu0 %2097 }
 0xf15   :  { %v2100_v29 = vadd.f32 %v2098_v28, %v2011_v1 }
 0xf17   :  { %4209 = vtanh.f32 %v2100_v29 }
 0xf24   :  { %v4210_v30 = vpop.eup %4209 }
 0xf25   :  { %2104 = vrot.lane.b32.xlu0 %v4210_v30, %s4290_s3 }
 0xf71   :  { %v2273_v9 = vpop.permute.xlu1 %2272 }
 0xf72   :  { %v2275_v33 = vadd.f32 %v2273_v9, %v2188_v6 }
 0xf74   :  { %4211 = vtanh.f32 %v2275_v33 }
 0xf81   :  { %v4212_v34 = vpop.eup %4211 }
 0xf82   :  { %2279 = vrot.lane.b32.xlu1 %v4212_v34, %s4290_s3 }
 0xf97   :  { %v2105_v41 = vpop.permute.xlu0 %2104 }
 0xf98   :  { %v2107_v42 = vmul.f32 %v2105_v41, %v2102_v35 }
 0xf9a   :  { %v5003_v43 = vadd.f32 %v2108_v16, %v2107_v42 }
 0xf9c   :  { %2111 = vrot.lane.b32.xlu0 %v5003_v43, %s4290_s3 }
 0xff4   :  { %v2280_v48 = vpop.permute.xlu1 %2279 }
 0xff5   :  { %v2282_v50 = vmul.f32 %v2280_v48, %v2277_v46 }
 0xff7   :  { %v5008_v51 = vadd.f32 %v2283_v49, %v2282_v50 }
 0xff9   :  { %2286 = vrot.lane.b32.xlu1 %v5008_v51, %s4290_s3 }
0x100e   :  { %v2112_v53 = vpop.permute.xlu0 %2111 }
0x100f   :  { %2114 = vst.msk [vmem:[#allocation2 + $0x8] sm:$0x3] %vm723_vm2, %v2112_v53  ;;  %4039 = vmatmul.mubr.msk.f32.vlgmr.msra.gmra.mxu0 %vm80_vm0, %v2112_v53 }
0x1010   :  { %4053 = vmatpush3.msra.mxu0 %v4931_v54  ;;  %4060 = vmatprep.mubr.msk.f32.mxu0 %vm4288_vm1, %v4287_v2 }
0x1011   :  { %4054 = vmatprep.subr.mxu0 %v4287_v2 }
0x1012   :  { %4055 = vmatpush3.msra.mxu0 %v4940_v58 }
0x1013   :  { %4056 = vmatprep.subr.mxu0 %v4287_v2 }
0x1014   :  { %4057 = vmatpush3.msra.mxu0 %v5023_v31 }
0x1015   :  { %4058 = vmatprep.subr.mxu0 %v4287_v2 }
0x1016   :  { %4059 = vmatpush3.msra.mxu0 %v5030_v36 }
0x1017   :  { %4074 = vmatprep.subr.mxu0 %v4287_v2 }
0x106b   :  { %v2287_v45 = vpop.permute.xlu1 %2286 }
0x106c   :  { %4028 = vmatmul.mubr.msk.f32.vlgmr.msra.gmra.mxu1 %vm80_vm0, %v2287_v45  ;;  %4061 = vmatmul.mubr.msk.f32.vlgmr.msra.gmra.mxu0 %vm80_vm0, %v2287_v45 }
0x106d   :  { %4042 = vmatpush3.msra.mxu1 %v5039_v55  ;;  %4049 = vmatprep.mubr.msk.f32.mxu1 %vm4288_vm1, %v4287_v2 }
0x106e   :  { %4043 = vmatprep.subr.mxu1 %v4287_v2  ;;  %4075 = vmatpush3.msra.mxu0 %v5049_v57 }
0x106f   :  { %4044 = vmatpush3.msra.mxu1 %v5055_v59  ;;  %4076 = vmatprep.subr.mxu0 %v4287_v2 }
0x1070   :  { %4045 = vmatprep.subr.mxu1 %v4287_v2  ;;  %4077 = vmatpush3.msra.mxu0 %v5063_v39 }
0x1071   :  { %4046 = vmatpush3.msra.mxu1 %v5069_v44  ;;  %4078 = vmatprep.subr.mxu0 %v4287_v2 }
0x1072   :  { %4047 = vmatprep.subr.mxu1 %v4287_v2  ;;  %4079 = vmatpush3.msra.mxu0 %v5077_v18 }
0x1073   :  { %4048 = vmatpush3.msra.mxu1 %v4967_v20  ;;  %4080 = vmatprep.subr.mxu0 %v4287_v2 }
0x1074   :  { %4050 = vmatmul.mubr.msk.f32.vlgmr.msra.gmra.mxu1 %vm80_vm0, %v2464_v17  ;;  %4081 = vmatpush3.msra.mxu0 %v5086_v25 }
0x1075   :  { %4082 = vmatprep.mubr.msk.f32.mxu0 %vm4288_vm1, %v4287_v2  ;;  %4063 = vmatprep.subr.mxu1 %v4287_v2 }
0x1076   :  { %4064 = vmatpush3.msra.mxu1 %v5095_v37  ;;  %4096 = vmatprep.subr.mxu0 %v4287_v2 }
0x1077   :  { %4065 = vmatprep.subr.mxu1 %v4287_v2  ;;  %4071 = vmatprep.mubr.msk.f32.mxu1 %vm4288_vm1, %v4287_v2 }
0x1078   :  { %4066 = vmatpush3.msra.mxu1 %v5105_v19 }
0x1079   :  { %4067 = vmatprep.subr.mxu1 %v4287_v2 }
0x107a   :  { %4068 = vmatpush3.msra.mxu1 %v5112_v22 }
0x107b   :  { %4069 = vmatprep.subr.mxu1 %v4287_v2 }
0x107c   :  { %4070 = vmatpush3.msra.mxu1 %v5119_v23 }
0x107d   :  { %4085 = vmatprep.subr.mxu1 %v4287_v2 }
0x10cf   :  { %v2428_v24 = vpop.f32.mrf.mxu0 }
0x10d0   :  { %v2429_v0 = vadd.f32 %v5126_v38, %v2428_v24 }
0x10d1   :  { %v4040_v1 = vpop.f32.mrf.mxu0 }
0x10d2   :  { %2438 = vrot.lane.b32.xlu0 %v2429_v0, %s4289_s28 }
0x112c   :  { %v2356_v3 = vpop.f32.mrf.mxu1  ;;  %v2603_v4 = vpop.f32.mrf.mxu0 }
0x112d   :  { %v2357_v5 = vadd.f32 %v4707_v32, %v2356_v3  ;;  %v2604_v8 = vadd.f32 %v5134_v7, %v2603_v4 }
0x112e   :  { %v4029_v10 = vpop.f32.mrf.mxu1  ;;  %v4062_v52 = vpop.f32.mrf.mxu0 }
0x112f   :  { %v2432_v60 = vadd.f32 %v2429_v0, %v2357_v5  ;;  %2613 = vrot.lane.b32.xlu1 %v2604_v8, %s4289_s28 }
0x1131   :  { %v2433_v21 = vmul.f32 0.5, %v2432_v60 }
0x1133   :  { %4213 = vtanh.f32 %v2433_v21 }
0x1134   :  { %v2533_v61 = vpop.f32.mrf.mxu1 }
0x1135   :  { %v2534_v13 = vadd.f32 %v4996_v47, %v2533_v61 }
0x1136   :  { %v4051_v62 = vpop.f32.mrf.mxu1 }
0x1137   :  { %v2607_v14 = vadd.f32 %v2604_v8, %v2534_v13 }
0x1139   :  { %v2608_v15 = vmul.f32 0.5, %v2607_v14 }
0x113b   :  { %4215 = vtanh.f32 %v2608_v15 }
0x1140   :  { %v4214_v63 = vpop.eup %4213 }
0x1141   :  { %v2435_v6 = vadd.f32 1.0, %v4214_v63 }
0x1143   :  { %v2436_v11 = vmul.f32 0.5, %v2435_v6 }
0x1144   :  { %v2439_v32 = vpop.permute.xlu0 %2438 }
0x1145   :  { %v2441_v12 = vmul.f32 %v2439_v32, %v2436_v11  ;;  %v2448_v42 = vsub.f32 1.0, %v2436_v11  ;;  %v2454_v48 = vmul.f32 %v2436_v11, %v5003_v43 }
0x1147   :  { %2443 = vrot.lane.b32.xlu0 %v2441_v12, %s4289_s28 }
0x1148   :  { %v4216_v26 = vpop.eup %4215 }
0x1149   :  { %v2610_v27 = vadd.f32 1.0, %v4216_v26 }
0x114b   :  { %v2611_v28 = vmul.f32 0.5, %v2610_v27 }
0x114d   :  { %v2623_v53 = vsub.f32 1.0, %v2611_v28  ;;  %v2629_v56 = vmul.f32 %v2611_v28, %v5008_v51 }
0x11a1   :  { %v2614_v29 = vpop.permute.xlu1 %2613 }
0x11a2   :  { %v2616_v30 = vmul.f32 %v2614_v29, %v2611_v28 }
0x11a4   :  { %2618 = vrot.lane.b32.xlu1 %v2616_v30, %s4289_s28 }
0x11b9   :  { %v2444_v9 = vpop.permute.xlu0 %2443 }
0x11ba   :  { %v2446_v33 = vadd.f32 %v2444_v9, %v2357_v5 }
0x11bc   :  { %4217 = vtanh.f32 %v2446_v33 }
0x11c9   :  { %v4218_v34 = vpop.eup %4217 }
0x11ca   :  { %2450 = vrot.lane.b32.xlu0 %v4218_v34, %s4290_s3  ;;  %v3157_v34 = vld [vmem:[#allocation2] sm:$0xff] }
0x1216   :  { %v2619_v35 = vpop.permute.xlu1 %2618 }
0x1217   :  { %v2621_v41 = vadd.f32 %v2619_v35, %v2534_v13 }
0x1219   :  { %4219 = vtanh.f32 %v2621_v41 }
0x1226   :  { %v4220_v16 = vpop.eup %4219 }
0x1227   :  { %2625 = vrot.lane.b32.xlu1 %v4220_v16, %s4290_s3 }
0x123c   :  { %v2451_v46 = vpop.permute.xlu0 %2450 }
0x123d   :  { %v2453_v49 = vmul.f32 %v2451_v46, %v2448_v42 }
0x123f   :  { %v5144_v50 = vadd.f32 %v2454_v48, %v2453_v49 }
0x1241   :  { %2457 = vrot.lane.b32.xlu0 %v5144_v50, %s4290_s3 }
0x1299   :  { %v2626_v45 = vpop.permute.xlu1 %2625 }
0x129a   :  { %v2628_v17 = vmul.f32 %v2626_v45, %v2623_v53 }
0x129c   :  { %v5149_v24 = vadd.f32 %v2629_v56, %v2628_v17 }
0x129e   :  { %2632 = vrot.lane.b32.xlu1 %v5149_v24, %s4290_s3 }
0x12b3   :  { %v2458_v0 = vpop.permute.xlu0 %2457 }
0x12b4   :  { %2460 = vst.msk [vmem:[#allocation2 + $0xa] sm:$0x3] %vm723_vm2, %v2458_v0  ;;  %4083 = vmatmul.mubr.msk.f32.vlgmr.msra.gmra.mxu0 %vm80_vm0, %v2458_v0 }
0x12b5   :  { %4097 = vmatpush3.msra.mxu0 %v4931_v54  ;;  %4104 = vmatprep.mubr.msk.f32.mxu0 %vm4288_vm1, %v4287_v2  ;;  %v2808_v54 = vmax.f32 %v4558_v40, 0.0 }
0x12b6   :  { %4098 = vmatprep.subr.mxu0 %v4287_v2 }
0x12b7   :  { %4099 = vmatpush3.msra.mxu0 %v4940_v58  ;;  %v2810_v58 = vrot.slane %v2808_v54, 6  ;;  %v3162_v54 = vld [vmem:[%s5312_s18 + $0x18] sm:$0xff] }
0x12b8   :  { %4100 = vmatprep.subr.mxu0 %v4287_v2 }
0x12b9   :  { %4101 = vmatpush3.msra.mxu0 %v5023_v31 }
0x12ba   :  { %4102 = vmatprep.subr.mxu0 %v4287_v2 }
0x12bb   :  { %4103 = vmatpush3.msra.mxu0 %v5030_v36 }
0x12bc   :  { %4118 = vmatprep.subr.mxu0 %v4287_v2 }
0x1310   :  { %v2633_v43 = vpop.permute.xlu1 %2632 }
0x1311   :  { %4072 = vmatmul.mubr.msk.f32.vlgmr.msra.gmra.mxu1 %vm80_vm0, %v2633_v43  ;;  %4105 = vmatmul.mubr.msk.f32.vlgmr.msra.gmra.mxu0 %vm80_vm0, %v2633_v43 }
0x1312   :  { %4086 = vmatpush3.msra.mxu1 %v5039_v55  ;;  %4093 = vmatprep.mubr.msk.f32.mxu1 %vm4288_vm1, %v4287_v2  ;;  %v4264_v55 = vld [vmem:[%s5310_s16] ss:$0 sm:$0xff] }
0x1313   :  { %4087 = vmatprep.subr.mxu1 %v4287_v2  ;;  %4119 = vmatpush3.msra.mxu0 %v5049_v57 }
0x1314   :  { %4088 = vmatpush3.msra.mxu1 %v5055_v59  ;;  %4120 = vmatprep.subr.mxu0 %v4287_v2 }
0x1315   :  { %4089 = vmatprep.subr.mxu1 %v4287_v2  ;;  %4121 = vmatpush3.msra.mxu0 %v5063_v39 }
0x1316   :  { %4090 = vmatpush3.msra.mxu1 %v5069_v44  ;;  %4122 = vmatprep.subr.mxu0 %v4287_v2 }
0x1317   :  { %4091 = vmatprep.subr.mxu1 %v4287_v2  ;;  %4123 = vmatpush3.msra.mxu0 %v5077_v18 }
0x1318   :  { %4092 = vmatpush3.msra.mxu1 %v4967_v20  ;;  %4124 = vmatprep.subr.mxu0 %v4287_v2 }
0x1319   :  { %4094 = vmatmul.mubr.msk.f32.vlgmr.msra.gmra.mxu1 %vm80_vm0, %v2810_v58  ;;  %4125 = vmatpush3.msra.mxu0 %v5086_v25  ;;  %v3161_v58 = vld [vmem:[%s5312_s18 + $0x10] sm:$0xff] }
0x131a   :  { %4126 = vmatprep.mubr.msk.f32.mxu0 %vm4288_vm1, %v4287_v2  ;;  %4107 = vmatprep.subr.mxu1 %v4287_v2 }
0x131b   :  { %4108 = vmatpush3.msra.mxu1 %v5095_v37  ;;  %4115 = vmatprep.mubr.msk.f32.mxu1 %vm4288_vm1, %v4287_v2 }
0x131c   :  { %4109 = vmatprep.subr.mxu1 %v4287_v2 }
0x131d   :  { %4110 = vmatpush3.msra.mxu1 %v5105_v19 }
0x131e   :  { %4111 = vmatprep.subr.mxu1 %v4287_v2 }
0x131f   :  { %4112 = vmatpush3.msra.mxu1 %v5112_v22 }
0x1320   :  { %4113 = vmatprep.subr.mxu1 %v4287_v2 }
0x1321   :  { %4114 = vmatpush3.msra.mxu1 %v5119_v23 }
0x1322   :  { %4129 = vmatprep.subr.mxu1 %v3162_v54 }
0x1374   :  { %v2774_v40 = vpop.f32.mrf.mxu0 }
0x1375   :  { %v2775_v20 = vadd.f32 %v5126_v38, %v2774_v40  ;;  %v3160_v40 = vld [vmem:[%s5312_s18 + $0x8] sm:$0xff] }
0x1376   :  { %v4084_v51 = vpop.f32.mrf.mxu0 }
0x1377   :  { %2784 = vrot.lane.b32.xlu0 %v2775_v20, %s4289_s28 }
0x13d1   :  { %v2702_v31 = vpop.f32.mrf.mxu1  ;;  %v2949_v36 = vpop.f32.mrf.mxu0 }
0x13d2   :  { %v2703_v57 = vadd.f32 %v4264_v55, %v2702_v31  ;;  %v2950_v59 = vadd.f32 %v5134_v7, %v2949_v36  ;;  %v3298_v36 = vld [vmem:[%s5338_s25 + $0x18] sm:$0xff] }
0x13d3   :  { %v4073_v39 = vpop.f32.mrf.mxu1  ;;  %v4106_v44 = vpop.f32.mrf.mxu0  ;;  %4140 = vmatprep.subr.mxu0 %v3298_v36 }
0x13d4   :  { %v2778_v2 = vadd.f32 %v2775_v20, %v2703_v57  ;;  %2959 = vrot.lane.b32.xlu1 %v2950_v59, %s4289_s28  ;;  %v3159_v20 = vld [vmem:[%s5312_s18] sm:$0xff] }
0x13d6   :  { %v2779_v18 = vmul.f32 0.5, %v2778_v2  ;;  %v3297_v2 = vld [vmem:[%s5338_s25 + $0x10] sm:$0xff] }
0x13d8   :  { %4221 = vtanh.f32 %v2779_v18  ;;  %v3296_v18 = vld [vmem:[%s5338_s25 + $0x8] sm:$0xff] }
0x13d9   :  { %v2879_v25 = vpop.f32.mrf.mxu1 }
0x13da   :  { %v2880_v4 = vadd.f32 %v4996_v47, %v2879_v25  ;;  %v3295_v25 = vld [vmem:[%s5338_s25] sm:$0xff] }
0x13db   :  { %v4095_v37 = vpop.f32.mrf.mxu1 }
0x13dc   :  { %v2953_v5 = vadd.f32 %v2950_v59, %v2880_v4  ;;  %v3543_v37 = vld [vmem:[%s5313_s19] ss:$0 sm:$0xff] }
0x13de   :  { %v2954_v7 = vmul.f32 0.5, %v2953_v5 }
0x13e0   :  { %4223 = vtanh.f32 %v2954_v7 }
0x13e5   :  { %v4222_v19 = vpop.eup %4221 }
0x13e6   :  { %v2781_v22 = vadd.f32 1.0, %v4222_v19 }
0x13e8   :  { %v2782_v23 = vmul.f32 0.5, %v2781_v22 }
0x13e9   :  { %v2785_v1 = vpop.permute.xlu0 %2784 }
0x13ea   :  { %v2787_v3 = vmul.f32 %v2785_v1, %v2782_v23  ;;  %v2794_v32 = vsub.f32 1.0, %v2782_v23  ;;  %v2800_v13 = vmul.f32 %v2782_v23, %v5144_v50 }
0x13ec   :  { %2789 = vrot.lane.b32.xlu0 %v2787_v3, %s4289_s28 }
0x13ed   :  { %v4224_v8 = vpop.eup %4223 }
0x13ee   :  { %v2956_v10 = vadd.f32 1.0, %v4224_v8 }
0x13f0   :  { %v2957_v52 = vmul.f32 0.5, %v2956_v10 }
0x13f2   :  { %v2969_v26 = vsub.f32 1.0, %v2957_v52  ;;  %v2975_v28 = vmul.f32 %v2957_v52, %v5149_v24 }
0x1446   :  { %v2960_v60 = vpop.permute.xlu1 %2959 }
0x1447   :  { %v2962_v21 = vmul.f32 %v2960_v60, %v2957_v52 }
0x1449   :  { %2964 = vrot.lane.b32.xlu1 %v2962_v21, %s4289_s28 }
0x145e   :  { %v2790_v61 = vpop.permute.xlu0 %2789 }
0x145f   :  { %v2792_v62 = vadd.f32 %v2790_v61, %v2703_v57 }
0x1461   :  { %4225 = vtanh.f32 %v2792_v62 }
0x146e   :  { %v4226_v63 = vpop.eup %4225 }
0x146f   :  { %2796 = vrot.lane.b32.xlu0 %v4226_v63, %s4290_s3 }
0x14bb   :  { %v2965_v6 = vpop.permute.xlu1 %2964 }
0x14bc   :  { %v2967_v11 = vadd.f32 %v2965_v6, %v2880_v4 }
0x14be   :  { %4227 = vtanh.f32 %v2967_v11 }
0x14cb   :  { %v4228_v47 = vpop.eup %4227 }
0x14cc   :  { %2971 = vrot.lane.b32.xlu1 %v4228_v47, %s4290_s3 }
0x14e1   :  { %v2797_v12 = vpop.permute.xlu0 %2796 }
0x14e2   :  { %v2799_v14 = vmul.f32 %v2797_v12, %v2794_v32 }
0x14e4   :  { %v2801_v15 = vadd.f32 %v2800_v13, %v2799_v14 }
0x14e6   :  { %2803 = vrot.lane.b32.xlu0 %v2801_v15, %s4290_s3 }
0x153e   :  { %v2972_v27 = vpop.permute.xlu1 %2971 }
0x153f   :  { %v2974_v29 = vmul.f32 %v2972_v27, %v2969_v26 }
0x1541   :  { %v2976_v30 = vadd.f32 %v2975_v28, %v2974_v29 }
0x1543   :  { %2978 = vrot.lane.b32.xlu1 %v2976_v30, %s4290_s3 }
0x1558   :  { %v2804_v9 = vpop.permute.xlu0 %2803 }
0x1559   :  { %2806 = vst.msk [vmem:[#allocation2 + $0xc] sm:$0x3] %vm723_vm2, %v2804_v9  ;;  %4127 = vmatmul.mubr.msk.f32.vlgmr.msra.gmra.mxu0 %vm80_vm0, %v2804_v9 }
0x155a   :  { %4141 = vmatpush3.msra.mxu0 %v3298_v36 }
0x155b   :  { %4142 = vmatprep.subr.mxu0 %v3297_v2 }
0x155c   :  { %4143 = vmatpush3.msra.mxu0 %v3297_v2 }
0x155d   :  { %4144 = vmatprep.subr.mxu0 %v3296_v18 }
0x155e   :  { %4145 = vmatpush3.msra.mxu0 %v3296_v18 }
0x155f   :  { %4146 = vmatprep.subr.mxu0 %v3295_v25 }
0x1560   :  { %4147 = vmatpush3.msra.mxu0 %v3295_v25 }
0x15b5   :  { %v2979_v33 = vpop.permute.xlu1 %2978 }
0x15b6   :  { %3154 = vst.msk [vmem:[#allocation3] sm:$0x3] %vm723_vm2, %v2979_v33  ;;  %4116 = vmatmul.mubr.msk.f32.vlgmr.msra.gmra.mxu1 %vm80_vm0, %v2979_v33 }
0x15b7   :  { %4137 = vmatprep.mubr.msk.f32.mxu1 %vm80_vm0, %v3157_v34  ;;  %4130 = vmatpush3.msra.mxu1 %v3162_v54 }
0x15b8   :  { %4131 = vmatprep.subr.mxu1 %v3161_v58 }
0x15b9   :  { %4132 = vmatpush3.msra.mxu1 %v3161_v58 }
0x15ba   :  { %4133 = vmatprep.subr.mxu1 %v3160_v40 }
0x15bb   :  { %4134 = vmatpush3.msra.mxu1 %v3160_v40 }
0x15bc   :  { %4135 = vmatprep.subr.mxu1 %v3159_v20 }
0x15bd   :  { %4136 = vmatpush3.msra.mxu1 %v3159_v20 }
0x15be   :  { %4151 = vmatprep.subr.mxu1 %v3298_v36 }
0x1619   :  { %v3120_v35 = vpop.f32.mrf.mxu0 }
0x161a   :  { %v3121_v41 = vadd.f32 %v5126_v38, %v3120_v35 }
0x161b   :  { %v4128_v16 = vpop.f32.mrf.mxu0 }
0x161c   :  { %3130 = vrot.lane.b32.xlu0 %v3121_v41, %s4289_s28 }
0x1676   :  { %v3048_v42 = vpop.f32.mrf.mxu1 }
0x1677   :  { %v3049_v46 = vadd.f32 %v4264_v55, %v3048_v42 }
0x1678   :  { %v4117_v48 = vpop.f32.mrf.mxu1 }
0x1679   :  { %v3124_v49 = vadd.f32 %v3121_v41, %v3049_v46 }
0x167b   :  { %v3125_v50 = vmul.f32 0.5, %v3124_v49 }
0x167d   :  { %4229 = vtanh.f32 %v3125_v50 }
0x168a   :  { %v4230_v53 = vpop.eup %4229 }
0x168b   :  { %v3127_v45 = vadd.f32 1.0, %v4230_v53 }
0x168d   :  { %v3128_v56 = vmul.f32 0.5, %v3127_v45 }
0x168e   :  { %v3131_v17 = vpop.permute.xlu0 %3130 }
0x168f   :  { %v3133_v24 = vmul.f32 %v3131_v17, %v3128_v56  ;;  %v3140_v51 = vsub.f32 1.0, %v3128_v56  ;;  %v3146_v55 = vmul.f32 %v3128_v56, %v2801_v15 }
0x1691   :  { %3135 = vrot.lane.b32.xlu1 %v3133_v24, %s4289_s28 }
0x1703   :  { %v3136_v0 = vpop.permute.xlu1 %3135 }
0x1704   :  { %v3138_v43 = vadd.f32 %v3136_v0, %v3049_v46 }
0x1706   :  { %4231 = vtanh.f32 %v3138_v43 }
0x1713   :  { %v4232_v38 = vpop.eup %4231 }
0x1714   :  { %3142 = vrot.lane.b32.xlu0 %v4232_v38, %s4290_s3 }
0x1786   :  { %v3143_v31 = vpop.permute.xlu0 %3142 }
0x1787   :  { %v3145_v57 = vmul.f32 %v3143_v31, %v3140_v51 }
0x1789   :  { %v3147_v59 = vadd.f32 %v3146_v55, %v3145_v57 }
0x178b   :  { %3149 = vrot.lane.b32.xlu1 %v3147_v59, %s4290_s3 }
0x17fd   :  { %v3150_v39 = vpop.permute.xlu1 %3149 }
0x17fe   :  { %3152 = vst.msk [vmem:[#allocation2 + $0xe] sm:$0x3] %vm723_vm2, %v3150_v39  ;;  %3156 = vst.msk [vmem:[#allocation3 + $0x2] sm:$0x3] %vm723_vm2, %v3150_v39 }
0x1805   :  { %v3158_v44 = vld [vmem:[#allocation2 + $0x8] sm:$0xff] }
0x1806   :  { %4138 = vmatmul.mubr.msk.f32.vlgmr.msra.gmra.mxu1 %vm80_vm0, %v3158_v44 }
0x1807   :  { %4152 = vmatpush3.msra.mxu1 %v3298_v36 }
0x1808   :  { %4153 = vmatprep.subr.mxu1 %v3297_v2 }
0x1809   :  { %4154 = vmatpush3.msra.mxu1 %v3297_v2 }
0x180a   :  { %4155 = vmatprep.subr.mxu1 %v3296_v18 }
0x180b   :  { %4156 = vmatpush3.msra.mxu1 %v3296_v18 }
0x180c   :  { %4157 = vmatprep.subr.mxu1 %v3295_v25 }
0x180d   :  { %4158 = vmatpush3.msra.mxu1 %v3295_v25 }
0x18c6   :  { %v4139_v19 = vpop.f32.mrf.mxu1 }
0x18c7   :  { %v3248_v22 = vadd.f32 %v4139_v19, %v3543_v37 }
0x18c8   :  { %v3242_v23 = vpop.f32.mrf.mxu1 }
0x18c9   :  { %v3254_v1 = vand.u32 2147483647, %v3248_v22  ;;  %3270 = vst.msk [vmem:[%s5315_s21 + $0x8] sm:$0xff] %vm80_vm0, %v3248_v22  ;;  %v3243_v3 = vadd.f32 %v3543_v37, %v3242_v23  ;;  %v3252_v63 = vmax.f32 %v3248_v22, 0.0 }
0x18cb   :  { %v3256_v4 = vsub.f32 0.0, %v3254_v1  ;;  %v3253_v5 = vand.u32 2147483647, %v3243_v3  ;;  %3269 = vst.msk [vmem:[%s5315_s21] sm:$0xff] %vm80_vm0, %v3243_v3  ;;  %4159 = vmatprep.mubr.msk.f32.mxu1 %vm80_vm0, %v3243_v3  ;;  %v3251_v32 = vmax.f32 %v3243_v3, 0.0 }
0x18cc   :  { %4160 = vmatmul.mubr.msk.f32.vlgmr.msra.gmra.mxu1 %vm80_vm0, %v3248_v22 }
0x18cd   :  { %v3259_v7 = vmul.f32 1.442695, %v3256_v4  ;;  %v3255_v8 = vsub.f32 0.0, %v3253_v5 }
0x18cf   :  { %4233 = vpow2.f32 %v3259_v7  ;;  %v3257_v10 = vmul.f32 1.442695, %v3255_v8 }
0x18d1   :  { %4235 = vpow2.f32 %v3257_v10 }
0x18dc   :  { %v4234_v52 = vpop.eup %4233 }
0x18dd   :  { %v3262_v60 = vadd.f32 1.0, %v4234_v52 }
0x18de   :  { %v4236_v21 = vpop.eup %4235 }
0x18df   :  { %4237 = vlog2.f32 %v3262_v60  ;;  %v3261_v61 = vadd.f32 1.0, %v4236_v21 }
0x18e1   :  { %4239 = vlog2.f32 %v3261_v61 }
0x18ec   :  { %v4238_v62 = vpop.eup %4237 }
0x18ed   :  { %v3266_v6 = vmul.f32 0.6931472, %v4238_v62 }
0x18ee   :  { %v4240_v11 = vpop.eup %4239 }
0x18ef   :  { %v3268_v47 = vadd.f32 %v3266_v6, %v3252_v63  ;;  %v3264_v12 = vmul.f32 0.6931472, %v4240_v11 }
0x18f1   :  { %v3267_v13 = vadd.f32 %v3264_v12, %v3251_v32  ;;  %4241 = vrsqrt.f32 %v3268_v47  ;;  %vm3290_vm3 = vcmp.eq.f32.partialorder %v3268_v47, inf  ;;  %v3293_v27 = vand.u32 2147483648, %v3268_v47 }
0x18f2   :  { %vm3292_vm4 = vcmp.eq.f32.partialorder %v3268_v47, 0.0 }
0x18f3   :  { %4243 = vrsqrt.f32 %v3267_v13  ;;  %vm3283_vm5 = vcmp.eq.f32.partialorder %v3267_v13, inf  ;;  %v3286_v9 = vand.u32 2147483648, %v3267_v13  ;;  %vm3285_vm6 = vcmp.eq.f32.partialorder %v3267_v13, 0.0 }
0x18fe   :  { %v4242_v14 = vpop.eup %4241 }
0x18ff   :  { %v3289_v15 = vmul.f32 %v4242_v14, %v3268_v47 }
0x1900   :  { %v4244_v26 = vpop.eup %4243 }
0x1901   :  { %v3291_v28 = vsel %vm3290_vm3, %v3268_v47, %v3289_v15  ;;  %v3282_v29 = vmul.f32 %v4244_v26, %v3267_v13 }
0x1902   :  { %v3294_v30 = vsel %vm3292_vm4, %v3293_v27, %v3291_v28 }
0x1903   :  { %3303 = vrot.lane.b32.xlu1 %v3294_v30, %s4290_s3  ;;  %v3284_v33 = vsel %vm3283_vm5, %v3267_v13, %v3282_v29 }
0x1904   :  { %v3287_v34 = vsel %vm3285_vm6, %v3286_v9, %v3284_v33 }
0x1905   :  { %3301 = vrot.lane.b32.xlu0 %v3287_v34, %s4290_s3 }
0x1907   :  { %3275 = vrot.lane.b32.xlu1 %v3268_v47, %s4290_s3 }
0x1909   :  { %3273 = vrot.lane.b32.xlu0 %v3267_v13, %s4290_s3  ;;  %s3484_s3 = sshll.u32 %s4292_s9, 4  ;;  %s3485_s3 = int_to_ptr.vmem [resolvable:$true] %s3484_s3 }
0x190a   :  { %s4265_s5 = scalar_lea.vmem %s3485_s3, 64  ;;  %p4270_p1 = scmp.lt.s32.totalorder %s3485_s3, %s3485_s3 }
0x190b   :  { %p4266_p0 = scmp.ne.s32.totalorder %s3485_s3, %s4265_s5  ;;  %p4271_p2 = scmp.lt.s32.totalorder %s4265_s5, %s4265_s5 }
0x190d   :  { %p4272_p3 = por %p4271_p2, %p4270_p1 }
0x190f   :  { %p4273_p4 = pnand %p4272_p3, %p4266_p0 }
0x1975   :  { %v3304_v35 = vpop.permute.xlu1 %3303 }
0x1977   :  { %v3302_v41 = vpop.permute.xlu0 %3301 }
0x1978   :  { %4148 = vmatprep.mubr.msk.f32.mxu0 %vm80_vm0, %v3302_v41 }
0x1979   :  { %v3276_v16 = vpop.permute.xlu1 %3275  ;;  %4149 = vmatmul.mubr.msk.f32.vlgmr.msra.gmra.mxu0 %vm80_vm0, %v3304_v35 }
0x197a   :  { %3280 = vst.msk [vmem:[%s5316_s22 + $0x8] sm:$0xff] %vm80_vm0, %v3276_v16 }
0x197b   :  { %v3274_v42 = vpop.permute.xlu0 %3273 }
0x197c   :  { %3279 = vst.msk [vmem:[%s5316_s22] sm:$0xff] %vm80_vm0, %v3274_v42 }
0x197d   :  { %4276 = shalt.err (!%p4273_p4)
}
0x197e   :  { %s4293_s29 = smov 2   ;;  %s5339_s22 = sld [smem:[#allocation10_spill]] }
0x197f   :  { %3490 = dma.vmem_to_hbm [thread:$0]  %s3485_s3, 64, %s5317_s23, [#allocation4], %s4291_s4, %s4291_s4, %s4293_s29  }
0x1984   :  { %v3466_v46 = vld [vmem:[%s5339_s22 + $0x8] sm:$0xff]  ;;  %v3465_v50 = vld [vmem:[%s5339_s22] sm:$0xff] }
0x198c   :  { %v4161_v48 = vpop.f32.mrf.mxu1 }
0x198e   :  { %v3456_v24 = vpop.f32.mrf.mxu1 }
0x1a39   :  { %v4150_v49 = vpop.f32.mrf.mxu0 }
0x1a3a   :  { %v3468_v53 = vmul.f32 %v4150_v49, %v3466_v46 }
0x1a3b   :  { %v3375_v45 = vpop.f32.mrf.mxu0 }
0x1a3c   :  { %v3470_v56 = vadd.f32 %v4161_v48, %v3468_v53  ;;  %v3467_v17 = vmul.f32 %v3465_v50, %v3375_v45 }
0x1a3e   :  { %3472 = vst [vmem:[%s5314_s20 + $0x8] sm:$0xff] %v3470_v56  ;;  %v3469_v0 = vadd.f32 %v3467_v17, %v3456_v24 }
0x1a40   :  { %3471 = vst [vmem:[%s5314_s20] sm:$0xff] %v3469_v0 }
0x1a41   :  { %4285 = dma.done.wait [#allocation4], 64  }
0x1a42   :  { %4286 = vsyncadd [#allocation4], 4294967232 }
0x1a43   :  { %3500 = vsyncpa [#allocation4], 1 }

</bundles_post_ra>
